<compile_context>
chip_gen: v7x
topology: tpu7x:2x2x1
jax: 0.10.0
libtpu: 0.0.40
codegen_flags: <defaults>
</compile_context>

<pallas_src>
import functools

import jax
import jax.numpy as jnp
from jax.experimental import pallas as pl
from jax.experimental.pallas import tpu as pltpu


def _esr_tm_kernel(xp_hbm, w_ref, o_ref, xbuf, sem, *, W, K, C, r, TH):
    """One (batch, row-stripe) step: 9-tap VPU conv + per-subpixel attention."""
    r2 = r * r
    n = pl.program_id(0)
    t = pl.program_id(1)
    row0 = pl.multiple_of(t * TH, TH)

    # Fetch the overlapping (TH + K - 1, Wp) halo stripe of batch element n
    # from HBM into VMEM.  Kept blocking & self-contained (no cross-step
    # prefetch state) so both grid axes can safely be "parallel".
    cp = pltpu.make_async_copy(
        xp_hbm.at[n, pl.ds(row0, TH + K - 1), :], xbuf, sem)
    cp.start()
    cp.wait()

    # The K*K shifted (TH, W) views of the stripe, shared by every channel.
    taps = [xbuf[ki:ki + TH, kj:kj + W] for ki in range(K) for kj in range(K)]

    def conv_channel(s_idx, cc):
        # w_ref is flat, ordered [subpixel s][channel cc: value0..C-1, key0..C-1][ki][kj]
        base = (s_idx * 2 * C + cc) * K * K
        acc = w_ref[base] * taps[0]
        for p in range(1, K * K):
            acc = acc + w_ref[base + p] * taps[p]
        return acc                                           # (TH, W) f32

    for s_idx in range(r2):
        vals = [conv_channel(s_idx, c) for c in range(C)]
        keys = [conv_channel(s_idx, C + c) for c in range(C)]

        # Softmax over the C channels: elementwise across C tiles (VPU/EUP only).
        m = keys[0]
        for c in range(1, C):
            m = jnp.maximum(m, keys[c])
        exps = [jnp.exp(k - m) for k in keys]                # EUP
        denom = exps[0]
        num = vals[0] * exps[0]
        for c in range(1, C):
            denom = denom + exps[c]
            num = num + vals[c] * exps[c]
        inv = pl.reciprocal(denom, approx=True)              # EUP slot, ~free
        o_ref[0, s_idx] = num * inv                          # dense (TH, W) store


def edge_sr_tm(x, weight, *, C, K, r, TH=8):
    """x: (N, 1, H, W) f32; weight: (2*r*r*C, 1, K, K) f32 (torch Conv2d OIHW)."""
    N, _, H, W = x.shape
    pad = (K - 1) // 2
    r2 = r * r
    Wp = W + K - 1
    if H % TH != 0:
        TH = H  # fallback: one stripe per batch element

    # glue: zero-pad the single-channel input (the conv's "same" padding)
    xp = jnp.pad(x[:, 0], ((0, 0), (pad, pad), (pad, pad)))            # (N, Hp, Wp)

    # glue: reorder weights to [subpixel s][value0..C-1, key0..C-1][ki][kj]
    # (original conv out channel = c2 * r2 + s, matching nn.PixelShuffle).
    w = weight[:, 0].reshape(2 * C, r2, K, K).transpose(1, 0, 2, 3)    # (r2, 2C, K, K)
    w_flat = w.reshape(-1)                                             # (r2*2C*K*K,)

    kernel = functools.partial(_esr_tm_kernel, W=W, K=K, C=C, r=r, TH=TH)
    out_lr = pl.pallas_call(
        kernel,
        out_shape=jax.ShapeDtypeStruct((N, r2, H, W), jnp.float32),
        grid_spec=pltpu.PrefetchScalarGridSpec(
            num_scalar_prefetch=0,
            grid=(N, H // TH),
            in_specs=[
                pl.BlockSpec(memory_space=pl.ANY),                     # padded image, HBM
                pl.BlockSpec(memory_space=pltpu.MemorySpace.SMEM),     # 288 weights, SMEM
            ],
            out_specs=pl.BlockSpec((1, r2, TH, W), lambda n, t: (n, 0, t, 0)),
            scratch_shapes=[
                pltpu.VMEM((TH + K - 1, Wp), jnp.float32),  # halo stripe buffer
                pltpu.SemaphoreType.DMA(()),
            ],
        ),
        compiler_params=pltpu.CompilerParams(
            dimension_semantics=("parallel", "parallel"),
            vmem_limit_bytes=32 * 1024 * 1024,
        ),
    )(xp, w_flat)

    # glue: subpixel-major LR result (N, r2, H, W) -> pixel shuffle -> NCHW HR
    out = out_lr.reshape(N, r, r, H, W).transpose(0, 3, 1, 4, 2)       # (N, H, r, W, r)
    return out.reshape(N, 1, H * r, W * r)


def _reference(x, weight, *, C, r, pad):
    """Pure-JAX reproduction of the PyTorch forward for validation."""
    conv = jax.lax.conv_general_dilated(
        x, weight, window_strides=(1, 1),
        padding=[(pad, pad), (pad, pad)],
        dimension_numbers=("NCHW", "OIHW", "NCHW"))
    N, OC, H, W = conv.shape
    C2 = OC // (r * r)
    ps = conv.reshape(N, C2, r, r, H, W).transpose(0, 1, 4, 2, 5, 3)
    ps = ps.reshape(N, C2, H * r, W * r)                     # nn.PixelShuffle(r)
    value, key = ps[:, :C], ps[:, C:]
    attn = jax.nn.softmax(key, axis=1)
    return jnp.sum(value * attn, axis=1, keepdims=True)


if __name__ == "__main__":
    # model_id = "eSR-TM_C4_K3_s2"  ->  channels=4, kernel=3x3, stride(=upscale)=2
    C, K, r = 4, 3, 2
    N, H, W = 2, 16, 16
    OC = 2 * r * r * C

    key0 = jax.random.PRNGKey(0)
    kx, kw = jax.random.split(key0)
    x = jax.random.normal(kx, (N, 1, H, W), dtype=jnp.float32)

    # deterministic xavier_normal_(gain=1.0) for Conv2d weight (OC, 1, K, K),
    # then the module's center-tap assignment weight[:, 0, K//2, K//2] = 1.0
    fan_in, fan_out = 1 * K * K, OC * K * K
    std = (2.0 / (fan_in + fan_out)) ** 0.5
    weight = std * jax.random.normal(kw, (OC, 1, K, K), dtype=jnp.float32)
    weight = weight.at[:, 0, K // 2, K // 2].set(1.0)

    out = jax.block_until_ready(edge_sr_tm(x, weight, C=C, K=K, r=r))

    ref = _reference(x, weight, C=C, r=r, pad=(K - 1) // 2)
    assert out.shape == (N, 1, H * r, W * r), out.shape
    # Tolerance loosened from 1e-4 only because of the approximate EUP
    # reciprocal (pl.reciprocal(..., approx=True)); approx=False restores 1e-4.
    assert jnp.allclose(out, ref, atol=5e-3, rtol=5e-3), float(
        jnp.max(jnp.abs(out - ref)))
    print("KERNEL_OK")
</pallas_src>

<mosaic_0001>
module attributes {stable_mosaic.version = 11 : i64} {
  func.func @_esr_tm_kernel(%arg0: i32, %arg1: i32, %arg2: memref<2x18x18xf32, #tpu.memory_space<any>>, %arg3: memref<288xf32, #tpu.memory_space<smem>>, %arg4: memref<1x4x8x16xf32, #tpu.memory_space<vmem>>, %arg5: memref<10x18xf32, #tpu.memory_space<vmem>>, %arg6: memref<!tpu.dma_semaphore, #tpu.memory_space<semaphore_mem>>) attributes {dimension_semantics = [#tpu.dimension_semantics<parallel>, #tpu.dimension_semantics<parallel>], iteration_bounds = array<i64: 2, 2>, scalar_prefetch = 0 : i64, scratch_operands = 2 : i64, tpu.core_type = #tpu.core_type<tc>, window_params = [{}, {transform_indices = @transform_1, window_bounds = array<i64: 288>}, {transform_indices = @transform_2, window_bounds = array<i64: 1, 4, 8, 16>}]} {
    %c8_i32 = arith.constant 8 : i32
    %0 = arith.muli %arg1, %c8_i32 : i32
    %1 = tpu.assume_multiple %0, 8 : i32
    %c0_i32 = arith.constant 0 : i32
    %2 = tpu.memref_slice %arg2[%arg0, %1, %c0_i32] : memref<2x18x18xf32, #tpu.memory_space<any>> -> memref<1x10x18xf32, #tpu.memory_space<any>>
    %3 = tpu.memref_squeeze %2 : memref<1x10x18xf32, #tpu.memory_space<any>> -> memref<10x18xf32, #tpu.memory_space<any>>
    tpu.enqueue_dma source(%3 : memref<10x18xf32, #tpu.memory_space<any>>) target(%arg5 : memref<10x18xf32, #tpu.memory_space<vmem>>) target_semaphore(%arg6 : memref<!tpu.dma_semaphore, #tpu.memory_space<semaphore_mem>>)
    %c0_i32_0 = arith.constant 0 : i32
    %4 = tpu.memref_slice %arg2[%arg0, %1, %c0_i32_0] : memref<2x18x18xf32, #tpu.memory_space<any>> -> memref<1x10x18xf32, #tpu.memory_space<any>>
    %5 = tpu.memref_squeeze %4 : memref<1x10x18xf32, #tpu.memory_space<any>> -> memref<10x18xf32, #tpu.memory_space<any>>
    tpu.wait_dma2 semaphore(%arg6 : memref<!tpu.dma_semaphore, #tpu.memory_space<semaphore_mem>>) src(%5 : memref<10x18xf32, #tpu.memory_space<any>>) dst(%arg5 : memref<10x18xf32, #tpu.memory_space<vmem>>)
    %c0 = arith.constant 0 : index
    %c0_1 = arith.constant 0 : index
    %6 = vector.load %arg5[%c0, %c0_1] : memref<10x18xf32, #tpu.memory_space<vmem>>, vector<8x16xf32>
    %c0_2 = arith.constant 0 : index
    %c1 = arith.constant 1 : index
    %7 = vector.load %arg5[%c0_2, %c1] : memref<10x18xf32, #tpu.memory_space<vmem>>, vector<8x16xf32>
    %c0_3 = arith.constant 0 : index
    %c2 = arith.constant 2 : index
    %8 = vector.load %arg5[%c0_3, %c2] : memref<10x18xf32, #tpu.memory_space<vmem>>, vector<8x16xf32>
    %c1_4 = arith.constant 1 : index
    %c0_5 = arith.constant 0 : index
    %9 = vector.load %arg5[%c1_4, %c0_5] : memref<10x18xf32, #tpu.memory_space<vmem>>, vector<8x16xf32>
    %c1_6 = arith.constant 1 : index
    %c1_7 = arith.constant 1 : index
    %10 = vector.load %arg5[%c1_6, %c1_7] : memref<10x18xf32, #tpu.memory_space<vmem>>, vector<8x16xf32>
    %c1_8 = arith.constant 1 : index
    %c2_9 = arith.constant 2 : index
    %11 = vector.load %arg5[%c1_8, %c2_9] : memref<10x18xf32, #tpu.memory_space<vmem>>, vector<8x16xf32>
    %c2_10 = arith.constant 2 : index
    %c0_11 = arith.constant 0 : index
    %12 = vector.load %arg5[%c2_10, %c0_11] : memref<10x18xf32, #tpu.memory_space<vmem>>, vector<8x16xf32>
    %c2_12 = arith.constant 2 : index
    %c1_13 = arith.constant 1 : index
    %13 = vector.load %arg5[%c2_12, %c1_13] : memref<10x18xf32, #tpu.memory_space<vmem>>, vector<8x16xf32>
    %c2_14 = arith.constant 2 : index
    %c2_15 = arith.constant 2 : index
    %14 = vector.load %arg5[%c2_14, %c2_15] : memref<10x18xf32, #tpu.memory_space<vmem>>, vector<8x16xf32>
    %c0_16 = arith.constant 0 : index
    %15 = memref.load %arg3[%c0_16] : memref<288xf32, #tpu.memory_space<smem>>
    %16 = vector.broadcast %15 : f32 to vector<8x16xf32>
    %17 = arith.mulf %16, %6 : vector<8x16xf32>
    %c1_17 = arith.constant 1 : index
    %18 = memref.load %arg3[%c1_17] : memref<288xf32, #tpu.memory_space<smem>>
    %19 = vector.broadcast %18 : f32 to vector<8x16xf32>
    %20 = arith.mulf %19, %7 : vector<8x16xf32>
    %21 = arith.addf %17, %20 : vector<8x16xf32>
    %c2_18 = arith.constant 2 : index
    %22 = memref.load %arg3[%c2_18] : memref<288xf32, #tpu.memory_space<smem>>
    %23 = vector.broadcast %22 : f32 to vector<8x16xf32>
    %24 = arith.mulf %23, %8 : vector<8x16xf32>
    %25 = arith.addf %21, %24 : vector<8x16xf32>
    %c3 = arith.constant 3 : index
    %26 = memref.load %arg3[%c3] : memref<288xf32, #tpu.memory_space<smem>>
    %27 = vector.broadcast %26 : f32 to vector<8x16xf32>
    %28 = arith.mulf %27, %9 : vector<8x16xf32>
    %29 = arith.addf %25, %28 : vector<8x16xf32>
    %c4 = arith.constant 4 : index
    %30 = memref.load %arg3[%c4] : memref<288xf32, #tpu.memory_space<smem>>
    %31 = vector.broadcast %30 : f32 to vector<8x16xf32>
    %32 = arith.mulf %31, %10 : vector<8x16xf32>
    %33 = arith.addf %29, %32 : vector<8x16xf32>
    %c5 = arith.constant 5 : index
    %34 = memref.load %arg3[%c5] : memref<288xf32, #tpu.memory_space<smem>>
    %35 = vector.broadcast %34 : f32 to vector<8x16xf32>
    %36 = arith.mulf %35, %11 : vector<8x16xf32>
    %37 = arith.addf %33, %36 : vector<8x16xf32>
    %c6 = arith.constant 6 : index
    %38 = memref.load %arg3[%c6] : memref<288xf32, #tpu.memory_space<smem>>
    %39 = vector.broadcast %38 : f32 to vector<8x16xf32>
    %40 = arith.mulf %39, %12 : vector<8x16xf32>
    %41 = arith.addf %37, %40 : vector<8x16xf32>
    %c7 = arith.constant 7 : index
    %42 = memref.load %arg3[%c7] : memref<288xf32, #tpu.memory_space<smem>>
    %43 = vector.broadcast %42 : f32 to vector<8x16xf32>
    %44 = arith.mulf %43, %13 : vector<8x16xf32>
    %45 = arith.addf %41, %44 : vector<8x16xf32>
    %c8 = arith.constant 8 : index
    %46 = memref.load %arg3[%c8] : memref<288xf32, #tpu.memory_space<smem>>
    %47 = vector.broadcast %46 : f32 to vector<8x16xf32>
    %48 = arith.mulf %47, %14 : vector<8x16xf32>
    %49 = arith.addf %45, %48 : vector<8x16xf32>
    %c9 = arith.constant 9 : index
    %50 = memref.load %arg3[%c9] : memref<288xf32, #tpu.memory_space<smem>>
    %51 = vector.broadcast %50 : f32 to vector<8x16xf32>
    %52 = arith.mulf %51, %6 : vector<8x16xf32>
    %c10 = arith.constant 10 : index
    %53 = memref.load %arg3[%c10] : memref<288xf32, #tpu.memory_space<smem>>
    %54 = vector.broadcast %53 : f32 to vector<8x16xf32>
    %55 = arith.mulf %54, %7 : vector<8x16xf32>
    %56 = arith.addf %52, %55 : vector<8x16xf32>
    %c11 = arith.constant 11 : index
    %57 = memref.load %arg3[%c11] : memref<288xf32, #tpu.memory_space<smem>>
    %58 = vector.broadcast %57 : f32 to vector<8x16xf32>
    %59 = arith.mulf %58, %8 : vector<8x16xf32>
    %60 = arith.addf %56, %59 : vector<8x16xf32>
    %c12 = arith.constant 12 : index
    %61 = memref.load %arg3[%c12] : memref<288xf32, #tpu.memory_space<smem>>
    %62 = vector.broadcast %61 : f32 to vector<8x16xf32>
    %63 = arith.mulf %62, %9 : vector<8x16xf32>
    %64 = arith.addf %60, %63 : vector<8x16xf32>
    %c13 = arith.constant 13 : index
    %65 = memref.load %arg3[%c13] : memref<288xf32, #tpu.memory_space<smem>>
    %66 = vector.broadcast %65 : f32 to vector<8x16xf32>
    %67 = arith.mulf %66, %10 : vector<8x16xf32>
    %68 = arith.addf %64, %67 : vector<8x16xf32>
    %c14 = arith.constant 14 : index
    %69 = memref.load %arg3[%c14] : memref<288xf32, #tpu.memory_space<smem>>
    %70 = vector.broadcast %69 : f32 to vector<8x16xf32>
    %71 = arith.mulf %70, %11 : vector<8x16xf32>
    %72 = arith.addf %68, %71 : vector<8x16xf32>
    %c15 = arith.constant 15 : index
    %73 = memref.load %arg3[%c15] : memref<288xf32, #tpu.memory_space<smem>>
    %74 = vector.broadcast %73 : f32 to vector<8x16xf32>
    %75 = arith.mulf %74, %12 : vector<8x16xf32>
    %76 = arith.addf %72, %75 : vector<8x16xf32>
    %c16 = arith.constant 16 : index
    %77 = memref.load %arg3[%c16] : memref<288xf32, #tpu.memory_space<smem>>
    %78 = vector.broadcast %77 : f32 to vector<8x16xf32>
    %79 = arith.mulf %78, %13 : vector<8x16xf32>
    %80 = arith.addf %76, %79 : vector<8x16xf32>
    %c17 = arith.constant 17 : index
    %81 = memref.load %arg3[%c17] : memref<288xf32, #tpu.memory_space<smem>>
    %82 = vector.broadcast %81 : f32 to vector<8x16xf32>
    %83 = arith.mulf %82, %14 : vector<8x16xf32>
    %84 = arith.addf %80, %83 : vector<8x16xf32>
    %c18 = arith.constant 18 : index
    %85 = memref.load %arg3[%c18] : memref<288xf32, #tpu.memory_space<smem>>
    %86 = vector.broadcast %85 : f32 to vector<8x16xf32>
    %87 = arith.mulf %86, %6 : vector<8x16xf32>
    %c19 = arith.constant 19 : index
    %88 = memref.load %arg3[%c19] : memref<288xf32, #tpu.memory_space<smem>>
    %89 = vector.broadcast %88 : f32 to vector<8x16xf32>
    %90 = arith.mulf %89, %7 : vector<8x16xf32>
    %91 = arith.addf %87, %90 : vector<8x16xf32>
    %c20 = arith.constant 20 : index
    %92 = memref.load %arg3[%c20] : memref<288xf32, #tpu.memory_space<smem>>
    %93 = vector.broadcast %92 : f32 to vector<8x16xf32>
    %94 = arith.mulf %93, %8 : vector<8x16xf32>
    %95 = arith.addf %91, %94 : vector<8x16xf32>
    %c21 = arith.constant 21 : index
    %96 = memref.load %arg3[%c21] : memref<288xf32, #tpu.memory_space<smem>>
    %97 = vector.broadcast %96 : f32 to vector<8x16xf32>
    %98 = arith.mulf %97, %9 : vector<8x16xf32>
    %99 = arith.addf %95, %98 : vector<8x16xf32>
    %c22 = arith.constant 22 : index
    %100 = memref.load %arg3[%c22] : memref<288xf32, #tpu.memory_space<smem>>
    %101 = vector.broadcast %100 : f32 to vector<8x16xf32>
    %102 = arith.mulf %101, %10 : vector<8x16xf32>
    %103 = arith.addf %99, %102 : vector<8x16xf32>
    %c23 = arith.constant 23 : index
    %104 = memref.load %arg3[%c23] : memref<288xf32, #tpu.memory_space<smem>>
    %105 = vector.broadcast %104 : f32 to vector<8x16xf32>
    %106 = arith.mulf %105, %11 : vector<8x16xf32>
    %107 = arith.addf %103, %106 : vector<8x16xf32>
    %c24 = arith.constant 24 : index
    %108 = memref.load %arg3[%c24] : memref<288xf32, #tpu.memory_space<smem>>
    %109 = vector.broadcast %108 : f32 to vector<8x16xf32>
    %110 = arith.mulf %109, %12 : vector<8x16xf32>
    %111 = arith.addf %107, %110 : vector<8x16xf32>
    %c25 = arith.constant 25 : index
    %112 = memref.load %arg3[%c25] : memref<288xf32, #tpu.memory_space<smem>>
    %113 = vector.broadcast %112 : f32 to vector<8x16xf32>
    %114 = arith.mulf %113, %13 : vector<8x16xf32>
    %115 = arith.addf %111, %114 : vector<8x16xf32>
    %c26 = arith.constant 26 : index
    %116 = memref.load %arg3[%c26] : memref<288xf32, #tpu.memory_space<smem>>
    %117 = vector.broadcast %116 : f32 to vector<8x16xf32>
    %118 = arith.mulf %117, %14 : vector<8x16xf32>
    %119 = arith.addf %115, %118 : vector<8x16xf32>
    %c27 = arith.constant 27 : index
    %120 = memref.load %arg3[%c27] : memref<288xf32, #tpu.memory_space<smem>>
    %121 = vector.broadcast %120 : f32 to vector<8x16xf32>
    %122 = arith.mulf %121, %6 : vector<8x16xf32>
    %c28 = arith.constant 28 : index
    %123 = memref.load %arg3[%c28] : memref<288xf32, #tpu.memory_space<smem>>
    %124 = vector.broadcast %123 : f32 to vector<8x16xf32>
    %125 = arith.mulf %124, %7 : vector<8x16xf32>
    %126 = arith.addf %122, %125 : vector<8x16xf32>
    %c29 = arith.constant 29 : index
    %127 = memref.load %arg3[%c29] : memref<288xf32, #tpu.memory_space<smem>>
    %128 = vector.broadcast %127 : f32 to vector<8x16xf32>
    %129 = arith.mulf %128, %8 : vector<8x16xf32>
    %130 = arith.addf %126, %129 : vector<8x16xf32>
    %c30 = arith.constant 30 : index
    %131 = memref.load %arg3[%c30] : memref<288xf32, #tpu.memory_space<smem>>
    %132 = vector.broadcast %131 : f32 to vector<8x16xf32>
    %133 = arith.mulf %132, %9 : vector<8x16xf32>
    %134 = arith.addf %130, %133 : vector<8x16xf32>
    %c31 = arith.constant 31 : index
    %135 = memref.load %arg3[%c31] : memref<288xf32, #tpu.memory_space<smem>>
    %136 = vector.broadcast %135 : f32 to vector<8x16xf32>
    %137 = arith.mulf %136, %10 : vector<8x16xf32>
    %138 = arith.addf %134, %137 : vector<8x16xf32>
    %c32 = arith.constant 32 : index
    %139 = memref.load %arg3[%c32] : memref<288xf32, #tpu.memory_space<smem>>
    %140 = vector.broadcast %139 : f32 to vector<8x16xf32>
    %141 = arith.mulf %140, %11 : vector<8x16xf32>
    %142 = arith.addf %138, %141 : vector<8x16xf32>
    %c33 = arith.constant 33 : index
    %143 = memref.load %arg3[%c33] : memref<288xf32, #tpu.memory_space<smem>>
    %144 = vector.broadcast %143 : f32 to vector<8x16xf32>
    %145 = arith.mulf %144, %12 : vector<8x16xf32>
    %146 = arith.addf %142, %145 : vector<8x16xf32>
    %c34 = arith.constant 34 : index
    %147 = memref.load %arg3[%c34] : memref<288xf32, #tpu.memory_space<smem>>
    %148 = vector.broadcast %147 : f32 to vector<8x16xf32>
    %149 = arith.mulf %148, %13 : vector<8x16xf32>
    %150 = arith.addf %146, %149 : vector<8x16xf32>
    %c35 = arith.constant 35 : index
    %151 = memref.load %arg3[%c35] : memref<288xf32, #tpu.memory_space<smem>>
    %152 = vector.broadcast %151 : f32 to vector<8x16xf32>
    %153 = arith.mulf %152, %14 : vector<8x16xf32>
    %154 = arith.addf %150, %153 : vector<8x16xf32>
    %c36 = arith.constant 36 : index
    %155 = memref.load %arg3[%c36] : memref<288xf32, #tpu.memory_space<smem>>
    %156 = vector.broadcast %155 : f32 to vector<8x16xf32>
    %157 = arith.mulf %156, %6 : vector<8x16xf32>
    %c37 = arith.constant 37 : index
    %158 = memref.load %arg3[%c37] : memref<288xf32, #tpu.memory_space<smem>>
    %159 = vector.broadcast %158 : f32 to vector<8x16xf32>
    %160 = arith.mulf %159, %7 : vector<8x16xf32>
    %161 = arith.addf %157, %160 : vector<8x16xf32>
    %c38 = arith.constant 38 : index
    %162 = memref.load %arg3[%c38] : memref<288xf32, #tpu.memory_space<smem>>
    %163 = vector.broadcast %162 : f32 to vector<8x16xf32>
    %164 = arith.mulf %163, %8 : vector<8x16xf32>
    %165 = arith.addf %161, %164 : vector<8x16xf32>
    %c39 = arith.constant 39 : index
    %166 = memref.load %arg3[%c39] : memref<288xf32, #tpu.memory_space<smem>>
    %167 = vector.broadcast %166 : f32 to vector<8x16xf32>
    %168 = arith.mulf %167, %9 : vector<8x16xf32>
    %169 = arith.addf %165, %168 : vector<8x16xf32>
    %c40 = arith.constant 40 : index
    %170 = memref.load %arg3[%c40] : memref<288xf32, #tpu.memory_space<smem>>
    %171 = vector.broadcast %170 : f32 to vector<8x16xf32>
    %172 = arith.mulf %171, %10 : vector<8x16xf32>
    %173 = arith.addf %169, %172 : vector<8x16xf32>
    %c41 = arith.constant 41 : index
    %174 = memref.load %arg3[%c41] : memref<288xf32, #tpu.memory_space<smem>>
    %175 = vector.broadcast %174 : f32 to vector<8x16xf32>
    %176 = arith.mulf %175, %11 : vector<8x16xf32>
    %177 = arith.addf %173, %176 : vector<8x16xf32>
    %c42 = arith.constant 42 : index
    %178 = memref.load %arg3[%c42] : memref<288xf32, #tpu.memory_space<smem>>
    %179 = vector.broadcast %178 : f32 to vector<8x16xf32>
    %180 = arith.mulf %179, %12 : vector<8x16xf32>
    %181 = arith.addf %177, %180 : vector<8x16xf32>
    %c43 = arith.constant 43 : index
    %182 = memref.load %arg3[%c43] : memref<288xf32, #tpu.memory_space<smem>>
    %183 = vector.broadcast %182 : f32 to vector<8x16xf32>
    %184 = arith.mulf %183, %13 : vector<8x16xf32>
    %185 = arith.addf %181, %184 : vector<8x16xf32>
    %c44 = arith.constant 44 : index
    %186 = memref.load %arg3[%c44] : memref<288xf32, #tpu.memory_space<smem>>
    %187 = vector.broadcast %186 : f32 to vector<8x16xf32>
    %188 = arith.mulf %187, %14 : vector<8x16xf32>
    %189 = arith.addf %185, %188 : vector<8x16xf32>
    %c45 = arith.constant 45 : index
    %190 = memref.load %arg3[%c45] : memref<288xf32, #tpu.memory_space<smem>>
    %191 = vector.broadcast %190 : f32 to vector<8x16xf32>
    %192 = arith.mulf %191, %6 : vector<8x16xf32>
    %c46 = arith.constant 46 : index
    %193 = memref.load %arg3[%c46] : memref<288xf32, #tpu.memory_space<smem>>
    %194 = vector.broadcast %193 : f32 to vector<8x16xf32>
    %195 = arith.mulf %194, %7 : vector<8x16xf32>
    %196 = arith.addf %192, %195 : vector<8x16xf32>
    %c47 = arith.constant 47 : index
    %197 = memref.load %arg3[%c47] : memref<288xf32, #tpu.memory_space<smem>>
    %198 = vector.broadcast %197 : f32 to vector<8x16xf32>
    %199 = arith.mulf %198, %8 : vector<8x16xf32>
    %200 = arith.addf %196, %199 : vector<8x16xf32>
    %c48 = arith.constant 48 : index
    %201 = memref.load %arg3[%c48] : memref<288xf32, #tpu.memory_space<smem>>
    %202 = vector.broadcast %201 : f32 to vector<8x16xf32>
    %203 = arith.mulf %202, %9 : vector<8x16xf32>
    %204 = arith.addf %200, %203 : vector<8x16xf32>
    %c49 = arith.constant 49 : index
    %205 = memref.load %arg3[%c49] : memref<288xf32, #tpu.memory_space<smem>>
    %206 = vector.broadcast %205 : f32 to vector<8x16xf32>
    %207 = arith.mulf %206, %10 : vector<8x16xf32>
    %208 = arith.addf %204, %207 : vector<8x16xf32>
    %c50 = arith.constant 50 : index
    %209 = memref.load %arg3[%c50] : memref<288xf32, #tpu.memory_space<smem>>
    %210 = vector.broadcast %209 : f32 to vector<8x16xf32>
    %211 = arith.mulf %210, %11 : vector<8x16xf32>
    %212 = arith.addf %208, %211 : vector<8x16xf32>
    %c51 = arith.constant 51 : index
    %213 = memref.load %arg3[%c51] : memref<288xf32, #tpu.memory_space<smem>>
    %214 = vector.broadcast %213 : f32 to vector<8x16xf32>
    %215 = arith.mulf %214, %12 : vector<8x16xf32>
    %216 = arith.addf %212, %215 : vector<8x16xf32>
    %c52 = arith.constant 52 : index
    %217 = memref.load %arg3[%c52] : memref<288xf32, #tpu.memory_space<smem>>
    %218 = vector.broadcast %217 : f32 to vector<8x16xf32>
    %219 = arith.mulf %218, %13 : vector<8x16xf32>
    %220 = arith.addf %216, %219 : vector<8x16xf32>
    %c53 = arith.constant 53 : index
    %221 = memref.load %arg3[%c53] : memref<288xf32, #tpu.memory_space<smem>>
    %222 = vector.broadcast %221 : f32 to vector<8x16xf32>
    %223 = arith.mulf %222, %14 : vector<8x16xf32>
    %224 = arith.addf %220, %223 : vector<8x16xf32>
    %c54 = arith.constant 54 : index
    %225 = memref.load %arg3[%c54] : memref<288xf32, #tpu.memory_space<smem>>
    %226 = vector.broadcast %225 : f32 to vector<8x16xf32>
    %227 = arith.mulf %226, %6 : vector<8x16xf32>
    %c55 = arith.constant 55 : index
    %228 = memref.load %arg3[%c55] : memref<288xf32, #tpu.memory_space<smem>>
    %229 = vector.broadcast %228 : f32 to vector<8x16xf32>
    %230 = arith.mulf %229, %7 : vector<8x16xf32>
    %231 = arith.addf %227, %230 : vector<8x16xf32>
    %c56 = arith.constant 56 : index
    %232 = memref.load %arg3[%c56] : memref<288xf32, #tpu.memory_space<smem>>
    %233 = vector.broadcast %232 : f32 to vector<8x16xf32>
    %234 = arith.mulf %233, %8 : vector<8x16xf32>
    %235 = arith.addf %231, %234 : vector<8x16xf32>
    %c57 = arith.constant 57 : index
    %236 = memref.load %arg3[%c57] : memref<288xf32, #tpu.memory_space<smem>>
    %237 = vector.broadcast %236 : f32 to vector<8x16xf32>
    %238 = arith.mulf %237, %9 : vector<8x16xf32>
    %239 = arith.addf %235, %238 : vector<8x16xf32>
    %c58 = arith.constant 58 : index
    %240 = memref.load %arg3[%c58] : memref<288xf32, #tpu.memory_space<smem>>
    %241 = vector.broadcast %240 : f32 to vector<8x16xf32>
    %242 = arith.mulf %241, %10 : vector<8x16xf32>
    %243 = arith.addf %239, %242 : vector<8x16xf32>
    %c59 = arith.constant 59 : index
    %244 = memref.load %arg3[%c59] : memref<288xf32, #tpu.memory_space<smem>>
    %245 = vector.broadcast %244 : f32 to vector<8x16xf32>
    %246 = arith.mulf %245, %11 : vector<8x16xf32>
    %247 = arith.addf %243, %246 : vector<8x16xf32>
    %c60 = arith.constant 60 : index
    %248 = memref.load %arg3[%c60] : memref<288xf32, #tpu.memory_space<smem>>
    %249 = vector.broadcast %248 : f32 to vector<8x16xf32>
    %250 = arith.mulf %249, %12 : vector<8x16xf32>
    %251 = arith.addf %247, %250 : vector<8x16xf32>
    %c61 = arith.constant 61 : index
    %252 = memref.load %arg3[%c61] : memref<288xf32, #tpu.memory_space<smem>>
    %253 = vector.broadcast %252 : f32 to vector<8x16xf32>
    %254 = arith.mulf %253, %13 : vector<8x16xf32>
    %255 = arith.addf %251, %254 : vector<8x16xf32>
    %c62 = arith.constant 62 : index
    %256 = memref.load %arg3[%c62] : memref<288xf32, #tpu.memory_space<smem>>
    %257 = vector.broadcast %256 : f32 to vector<8x16xf32>
    %258 = arith.mulf %257, %14 : vector<8x16xf32>
    %259 = arith.addf %255, %258 : vector<8x16xf32>
    %c63 = arith.constant 63 : index
    %260 = memref.load %arg3[%c63] : memref<288xf32, #tpu.memory_space<smem>>
    %261 = vector.broadcast %260 : f32 to vector<8x16xf32>
    %262 = arith.mulf %261, %6 : vector<8x16xf32>
    %c64 = arith.constant 64 : index
    %263 = memref.load %arg3[%c64] : memref<288xf32, #tpu.memory_space<smem>>
    %264 = vector.broadcast %263 : f32 to vector<8x16xf32>
    %265 = arith.mulf %264, %7 : vector<8x16xf32>
    %266 = arith.addf %262, %265 : vector<8x16xf32>
    %c65 = arith.constant 65 : index
    %267 = memref.load %arg3[%c65] : memref<288xf32, #tpu.memory_space<smem>>
    %268 = vector.broadcast %267 : f32 to vector<8x16xf32>
    %269 = arith.mulf %268, %8 : vector<8x16xf32>
    %270 = arith.addf %266, %269 : vector<8x16xf32>
    %c66 = arith.constant 66 : index
    %271 = memref.load %arg3[%c66] : memref<288xf32, #tpu.memory_space<smem>>
    %272 = vector.broadcast %271 : f32 to vector<8x16xf32>
    %273 = arith.mulf %272, %9 : vector<8x16xf32>
    %274 = arith.addf %270, %273 : vector<8x16xf32>
    %c67 = arith.constant 67 : index
    %275 = memref.load %arg3[%c67] : memref<288xf32, #tpu.memory_space<smem>>
    %276 = vector.broadcast %275 : f32 to vector<8x16xf32>
    %277 = arith.mulf %276, %10 : vector<8x16xf32>
    %278 = arith.addf %274, %277 : vector<8x16xf32>
    %c68 = arith.constant 68 : index
    %279 = memref.load %arg3[%c68] : memref<288xf32, #tpu.memory_space<smem>>
    %280 = vector.broadcast %279 : f32 to vector<8x16xf32>
    %281 = arith.mulf %280, %11 : vector<8x16xf32>
    %282 = arith.addf %278, %281 : vector<8x16xf32>
    %c69 = arith.constant 69 : index
    %283 = memref.load %arg3[%c69] : memref<288xf32, #tpu.memory_space<smem>>
    %284 = vector.broadcast %283 : f32 to vector<8x16xf32>
    %285 = arith.mulf %284, %12 : vector<8x16xf32>
    %286 = arith.addf %282, %285 : vector<8x16xf32>
    %c70 = arith.constant 70 : index
    %287 = memref.load %arg3[%c70] : memref<288xf32, #tpu.memory_space<smem>>
    %288 = vector.broadcast %287 : f32 to vector<8x16xf32>
    %289 = arith.mulf %288, %13 : vector<8x16xf32>
    %290 = arith.addf %286, %289 : vector<8x16xf32>
    %c71 = arith.constant 71 : index
    %291 = memref.load %arg3[%c71] : memref<288xf32, #tpu.memory_space<smem>>
    %292 = vector.broadcast %291 : f32 to vector<8x16xf32>
    %293 = arith.mulf %292, %14 : vector<8x16xf32>
    %294 = arith.addf %290, %293 : vector<8x16xf32>
    %295 = arith.maximumf %189, %224 : vector<8x16xf32>
    %296 = arith.maximumf %295, %259 : vector<8x16xf32>
    %297 = arith.maximumf %296, %294 : vector<8x16xf32>
    %298 = arith.subf %189, %297 : vector<8x16xf32>
    %299 = math.exp %298 : vector<8x16xf32>
    %300 = arith.subf %224, %297 : vector<8x16xf32>
    %301 = math.exp %300 : vector<8x16xf32>
    %302 = arith.subf %259, %297 : vector<8x16xf32>
    %303 = math.exp %302 : vector<8x16xf32>
    %304 = arith.subf %294, %297 : vector<8x16xf32>
    %305 = math.exp %304 : vector<8x16xf32>
    %306 = arith.mulf %49, %299 : vector<8x16xf32>
    %307 = arith.addf %299, %301 : vector<8x16xf32>
    %308 = arith.mulf %84, %301 : vector<8x16xf32>
    %309 = arith.addf %306, %308 : vector<8x16xf32>
    %310 = arith.addf %307, %303 : vector<8x16xf32>
    %311 = arith.mulf %119, %303 : vector<8x16xf32>
    %312 = arith.addf %309, %311 : vector<8x16xf32>
    %313 = arith.addf %310, %305 : vector<8x16xf32>
    %314 = arith.mulf %154, %305 : vector<8x16xf32>
    %315 = arith.addf %312, %314 : vector<8x16xf32>
    %316 = tpu.reciprocal %313 {approx = true} : vector<8x16xf32> -> vector<8x16xf32>
    %317 = arith.mulf %315, %316 : vector<8x16xf32>
    %c0_19 = arith.constant 0 : index
    %c0_20 = arith.constant 0 : index
    %c0_21 = arith.constant 0 : index
    %c0_22 = arith.constant 0 : index
    %318 = vector.load %arg4[%c0_19, %c0_20, %c0_21, %c0_22] : memref<1x4x8x16xf32, #tpu.memory_space<vmem>>, vector<1x1x8x16xf32>
    %319 = vector.shape_cast %318 : vector<1x1x8x16xf32> to vector<8x16xf32>
    %320 = vector.shape_cast %317 : vector<8x16xf32> to vector<1x1x8x16xf32>
    tpu.vector_store %arg4[%c0_19, %c0_20, %c0_21, %c0_22], %320 {strides = array<i32>} : memref<1x4x8x16xf32, #tpu.memory_space<vmem>>, vector<1x1x8x16xf32>,
    %c72 = arith.constant 72 : index
    %321 = memref.load %arg3[%c72] : memref<288xf32, #tpu.memory_space<smem>>
    %322 = vector.broadcast %321 : f32 to vector<8x16xf32>
    %323 = arith.mulf %322, %6 : vector<8x16xf32>
    %c73 = arith.constant 73 : index
    %324 = memref.load %arg3[%c73] : memref<288xf32, #tpu.memory_space<smem>>
    %325 = vector.broadcast %324 : f32 to vector<8x16xf32>
    %326 = arith.mulf %325, %7 : vector<8x16xf32>
    %327 = arith.addf %323, %326 : vector<8x16xf32>
    %c74 = arith.constant 74 : index
    %328 = memref.load %arg3[%c74] : memref<288xf32, #tpu.memory_space<smem>>
    %329 = vector.broadcast %328 : f32 to vector<8x16xf32>
    %330 = arith.mulf %329, %8 : vector<8x16xf32>
    %331 = arith.addf %327, %330 : vector<8x16xf32>
    %c75 = arith.constant 75 : index
    %332 = memref.load %arg3[%c75] : memref<288xf32, #tpu.memory_space<smem>>
    %333 = vector.broadcast %332 : f32 to vector<8x16xf32>
    %334 = arith.mulf %333, %9 : vector<8x16xf32>
    %335 = arith.addf %331, %334 : vector<8x16xf32>
    %c76 = arith.constant 76 : index
    %336 = memref.load %arg3[%c76] : memref<288xf32, #tpu.memory_space<smem>>
    %337 = vector.broadcast %336 : f32 to vector<8x16xf32>
    %338 = arith.mulf %337, %10 : vector<8x16xf32>
    %339 = arith.addf %335, %338 : vector<8x16xf32>
    %c77 = arith.constant 77 : index
    %340 = memref.load %arg3[%c77] : memref<288xf32, #tpu.memory_space<smem>>
    %341 = vector.broadcast %340 : f32 to vector<8x16xf32>
    %342 = arith.mulf %341, %11 : vector<8x16xf32>
    %343 = arith.addf %339, %342 : vector<8x16xf32>
    %c78 = arith.constant 78 : index
    %344 = memref.load %arg3[%c78] : memref<288xf32, #tpu.memory_space<smem>>
    %345 = vector.broadcast %344 : f32 to vector<8x16xf32>
    %346 = arith.mulf %345, %12 : vector<8x16xf32>
    %347 = arith.addf %343, %346 : vector<8x16xf32>
    %c79 = arith.constant 79 : index
    %348 = memref.load %arg3[%c79] : memref<288xf32, #tpu.memory_space<smem>>
    %349 = vector.broadcast %348 : f32 to vector<8x16xf32>
    %350 = arith.mulf %349, %13 : vector<8x16xf32>
    %351 = arith.addf %347, %350 : vector<8x16xf32>
    %c80 = arith.constant 80 : index
    %352 = memref.load %arg3[%c80] : memref<288xf32, #tpu.memory_space<smem>>
    %353 = vector.broadcast %352 : f32 to vector<8x16xf32>
    %354 = arith.mulf %353, %14 : vector<8x16xf32>
    %355 = arith.addf %351, %354 : vector<8x16xf32>
    %c81 = arith.constant 81 : index
    %356 = memref.load %arg3[%c81] : memref<288xf32, #tpu.memory_space<smem>>
    %357 = vector.broadcast %356 : f32 to vector<8x16xf32>
    %358 = arith.mulf %357, %6 : vector<8x16xf32>
    %c82 = arith.constant 82 : index
    %359 = memref.load %arg3[%c82] : memref<288xf32, #tpu.memory_space<smem>>
    %360 = vector.broadcast %359 : f32 to vector<8x16xf32>
    %361 = arith.mulf %360, %7 : vector<8x16xf32>
    %362 = arith.addf %358, %361 : vector<8x16xf32>
    %c83 = arith.constant 83 : index
    %363 = memref.load %arg3[%c83] : memref<288xf32, #tpu.memory_space<smem>>
    %364 = vector.broadcast %363 : f32 to vector<8x16xf32>
    %365 = arith.mulf %364, %8 : vector<8x16xf32>
    %366 = arith.addf %362, %365 : vector<8x16xf32>
    %c84 = arith.constant 84 : index
    %367 = memref.load %arg3[%c84] : memref<288xf32, #tpu.memory_space<smem>>
    %368 = vector.broadcast %367 : f32 to vector<8x16xf32>
    %369 = arith.mulf %368, %9 : vector<8x16xf32>
    %370 = arith.addf %366, %369 : vector<8x16xf32>
    %c85 = arith.constant 85 : index
    %371 = memref.load %arg3[%c85] : memref<288xf32, #tpu.memory_space<smem>>
    %372 = vector.broadcast %371 : f32 to vector<8x16xf32>
    %373 = arith.mulf %372, %10 : vector<8x16xf32>
    %374 = arith.addf %370, %373 : vector<8x16xf32>
    %c86 = arith.constant 86 : index
    %375 = memref.load %arg3[%c86] : memref<288xf32, #tpu.memory_space<smem>>
    %376 = vector.broadcast %375 : f32 to vector<8x16xf32>
    %377 = arith.mulf %376, %11 : vector<8x16xf32>
    %378 = arith.addf %374, %377 : vector<8x16xf32>
    %c87 = arith.constant 87 : index
    %379 = memref.load %arg3[%c87] : memref<288xf32, #tpu.memory_space<smem>>
    %380 = vector.broadcast %379 : f32 to vector<8x16xf32>
    %381 = arith.mulf %380, %12 : vector<8x16xf32>
    %382 = arith.addf %378, %381 : vector<8x16xf32>
    %c88 = arith.constant 88 : index
    %383 = memref.load %arg3[%c88] : memref<288xf32, #tpu.memory_space<smem>>
    %384 = vector.broadcast %383 : f32 to vector<8x16xf32>
    %385 = arith.mulf %384, %13 : vector<8x16xf32>
    %386 = arith.addf %382, %385 : vector<8x16xf32>
    %c89 = arith.constant 89 : index
    %387 = memref.load %arg3[%c89] : memref<288xf32, #tpu.memory_space<smem>>
    %388 = vector.broadcast %387 : f32 to vector<8x16xf32>
    %389 = arith.mulf %388, %14 : vector<8x16xf32>
    %390 = arith.addf %386, %389 : vector<8x16xf32>
    %c90 = arith.constant 90 : index
    %391 = memref.load %arg3[%c90] : memref<288xf32, #tpu.memory_space<smem>>
    %392 = vector.broadcast %391 : f32 to vector<8x16xf32>
    %393 = arith.mulf %392, %6 : vector<8x16xf32>
    %c91 = arith.constant 91 : index
    %394 = memref.load %arg3[%c91] : memref<288xf32, #tpu.memory_space<smem>>
    %395 = vector.broadcast %394 : f32 to vector<8x16xf32>
    %396 = arith.mulf %395, %7 : vector<8x16xf32>
    %397 = arith.addf %393, %396 : vector<8x16xf32>
    %c92 = arith.constant 92 : index
    %398 = memref.load %arg3[%c92] : memref<288xf32, #tpu.memory_space<smem>>
    %399 = vector.broadcast %398 : f32 to vector<8x16xf32>
    %400 = arith.mulf %399, %8 : vector<8x16xf32>
    %401 = arith.addf %397, %400 : vector<8x16xf32>
    %c93 = arith.constant 93 : index
    %402 = memref.load %arg3[%c93] : memref<288xf32, #tpu.memory_space<smem>>
    %403 = vector.broadcast %402 : f32 to vector<8x16xf32>
    %404 = arith.mulf %403, %9 : vector<8x16xf32>
    %405 = arith.addf %401, %404 : vector<8x16xf32>
    %c94 = arith.constant 94 : index
    %406 = memref.load %arg3[%c94] : memref<288xf32, #tpu.memory_space<smem>>
    %407 = vector.broadcast %406 : f32 to vector<8x16xf32>
    %408 = arith.mulf %407, %10 : vector<8x16xf32>
    %409 = arith.addf %405, %408 : vector<8x16xf32>
    %c95 = arith.constant 95 : index
    %410 = memref.load %arg3[%c95] : memref<288xf32, #tpu.memory_space<smem>>
    %411 = vector.broadcast %410 : f32 to vector<8x16xf32>
    %412 = arith.mulf %411, %11 : vector<8x16xf32>
    %413 = arith.addf %409, %412 : vector<8x16xf32>
    %c96 = arith.constant 96 : index
    %414 = memref.load %arg3[%c96] : memref<288xf32, #tpu.memory_space<smem>>
    %415 = vector.broadcast %414 : f32 to vector<8x16xf32>
    %416 = arith.mulf %415, %12 : vector<8x16xf32>
    %417 = arith.addf %413, %416 : vector<8x16xf32>
    %c97 = arith.constant 97 : index
    %418 = memref.load %arg3[%c97] : memref<288xf32, #tpu.memory_space<smem>>
    %419 = vector.broadcast %418 : f32 to vector<8x16xf32>
    %420 = arith.mulf %419, %13 : vector<8x16xf32>
    %421 = arith.addf %417, %420 : vector<8x16xf32>
    %c98 = arith.constant 98 : index
    %422 = memref.load %arg3[%c98] : memref<288xf32, #tpu.memory_space<smem>>
    %423 = vector.broadcast %422 : f32 to vector<8x16xf32>
    %424 = arith.mulf %423, %14 : vector<8x16xf32>
    %425 = arith.addf %421, %424 : vector<8x16xf32>
    %c99 = arith.constant 99 : index
    %426 = memref.load %arg3[%c99] : memref<288xf32, #tpu.memory_space<smem>>
    %427 = vector.broadcast %426 : f32 to vector<8x16xf32>
    %428 = arith.mulf %427, %6 : vector<8x16xf32>
    %c100 = arith.constant 100 : index
    %429 = memref.load %arg3[%c100] : memref<288xf32, #tpu.memory_space<smem>>
    %430 = vector.broadcast %429 : f32 to vector<8x16xf32>
    %431 = arith.mulf %430, %7 : vector<8x16xf32>
    %432 = arith.addf %428, %431 : vector<8x16xf32>
    %c101 = arith.constant 101 : index
    %433 = memref.load %arg3[%c101] : memref<288xf32, #tpu.memory_space<smem>>
    %434 = vector.broadcast %433 : f32 to vector<8x16xf32>
    %435 = arith.mulf %434, %8 : vector<8x16xf32>
    %436 = arith.addf %432, %435 : vector<8x16xf32>
    %c102 = arith.constant 102 : index
    %437 = memref.load %arg3[%c102] : memref<288xf32, #tpu.memory_space<smem>>
    %438 = vector.broadcast %437 : f32 to vector<8x16xf32>
    %439 = arith.mulf %438, %9 : vector<8x16xf32>
    %440 = arith.addf %436, %439 : vector<8x16xf32>
    %c103 = arith.constant 103 : index
    %441 = memref.load %arg3[%c103] : memref<288xf32, #tpu.memory_space<smem>>
    %442 = vector.broadcast %441 : f32 to vector<8x16xf32>
    %443 = arith.mulf %442, %10 : vector<8x16xf32>
    %444 = arith.addf %440, %443 : vector<8x16xf32>
    %c104 = arith.constant 104 : index
    %445 = memref.load %arg3[%c104] : memref<288xf32, #tpu.memory_space<smem>>
    %446 = vector.broadcast %445 : f32 to vector<8x16xf32>
    %447 = arith.mulf %446, %11 : vector<8x16xf32>
    %448 = arith.addf %444, %447 : vector<8x16xf32>
    %c105 = arith.constant 105 : index
    %449 = memref.load %arg3[%c105] : memref<288xf32, #tpu.memory_space<smem>>
    %450 = vector.broadcast %449 : f32 to vector<8x16xf32>
    %451 = arith.mulf %450, %12 : vector<8x16xf32>
    %452 = arith.addf %448, %451 : vector<8x16xf32>
    %c106 = arith.constant 106 : index
    %453 = memref.load %arg3[%c106] : memref<288xf32, #tpu.memory_space<smem>>
    %454 = vector.broadcast %453 : f32 to vector<8x16xf32>
    %455 = arith.mulf %454, %13 : vector<8x16xf32>
    %456 = arith.addf %452, %455 : vector<8x16xf32>
    %c107 = arith.constant 107 : index
    %457 = memref.load %arg3[%c107] : memref<288xf32, #tpu.memory_space<smem>>
    %458 = vector.broadcast %457 : f32 to vector<8x16xf32>
    %459 = arith.mulf %458, %14 : vector<8x16xf32>
    %460 = arith.addf %456, %459 : vector<8x16xf32>
    %c108 = arith.constant 108 : index
    %461 = memref.load %arg3[%c108] : memref<288xf32, #tpu.memory_space<smem>>
    %462 = vector.broadcast %461 : f32 to vector<8x16xf32>
    %463 = arith.mulf %462, %6 : vector<8x16xf32>
    %c109 = arith.constant 109 : index
    %464 = memref.load %arg3[%c109] : memref<288xf32, #tpu.memory_space<smem>>
    %465 = vector.broadcast %464 : f32 to vector<8x16xf32>
    %466 = arith.mulf %465, %7 : vector<8x16xf32>
    %467 = arith.addf %463, %466 : vector<8x16xf32>
    %c110 = arith.constant 110 : index
    %468 = memref.load %arg3[%c110] : memref<288xf32, #tpu.memory_space<smem>>
    %469 = vector.broadcast %468 : f32 to vector<8x16xf32>
    %470 = arith.mulf %469, %8 : vector<8x16xf32>
    %471 = arith.addf %467, %470 : vector<8x16xf32>
    %c111 = arith.constant 111 : index
    %472 = memref.load %arg3[%c111] : memref<288xf32, #tpu.memory_space<smem>>
    %473 = vector.broadcast %472 : f32 to vector<8x16xf32>
    %474 = arith.mulf %473, %9 : vector<8x16xf32>
    %475 = arith.addf %471, %474 : vector<8x16xf32>
    %c112 = arith.constant 112 : index
    %476 = memref.load %arg3[%c112] : memref<288xf32, #tpu.memory_space<smem>>
    %477 = vector.broadcast %476 : f32 to vector<8x16xf32>
    %478 = arith.mulf %477, %10 : vector<8x16xf32>
    %479 = arith.addf %475, %478 : vector<8x16xf32>
    %c113 = arith.constant 113 : index
    %480 = memref.load %arg3[%c113] : memref<288xf32, #tpu.memory_space<smem>>
    %481 = vector.broadcast %480 : f32 to vector<8x16xf32>
    %482 = arith.mulf %481, %11 : vector<8x16xf32>
    %483 = arith.addf %479, %482 : vector<8x16xf32>
    %c114 = arith.constant 114 : index
    %484 = memref.load %arg3[%c114] : memref<288xf32, #tpu.memory_space<smem>>
    %485 = vector.broadcast %484 : f32 to vector<8x16xf32>
    %486 = arith.mulf %485, %12 : vector<8x16xf32>
    %487 = arith.addf %483, %486 : vector<8x16xf32>
    %c115 = arith.constant 115 : index
    %488 = memref.load %arg3[%c115] : memref<288xf32, #tpu.memory_space<smem>>
    %489 = vector.broadcast %488 : f32 to vector<8x16xf32>
    %490 = arith.mulf %489, %13 : vector<8x16xf32>
    %491 = arith.addf %487, %490 : vector<8x16xf32>
    %c116 = arith.constant 116 : index
    %492 = memref.load %arg3[%c116] : memref<288xf32, #tpu.memory_space<smem>>
    %493 = vector.broadcast %492 : f32 to vector<8x16xf32>
    %494 = arith.mulf %493, %14 : vector<8x16xf32>
    %495 = arith.addf %491, %494 : vector<8x16xf32>
    %c117 = arith.constant 117 : index
    %496 = memref.load %arg3[%c117] : memref<288xf32, #tpu.memory_space<smem>>
    %497 = vector.broadcast %496 : f32 to vector<8x16xf32>
    %498 = arith.mulf %497, %6 : vector<8x16xf32>
    %c118 = arith.constant 118 : index
    %499 = memref.load %arg3[%c118] : memref<288xf32, #tpu.memory_space<smem>>
    %500 = vector.broadcast %499 : f32 to vector<8x16xf32>
    %501 = arith.mulf %500, %7 : vector<8x16xf32>
    %502 = arith.addf %498, %501 : vector<8x16xf32>
    %c119 = arith.constant 119 : index
    %503 = memref.load %arg3[%c119] : memref<288xf32, #tpu.memory_space<smem>>
    %504 = vector.broadcast %503 : f32 to vector<8x16xf32>
    %505 = arith.mulf %504, %8 : vector<8x16xf32>
    %506 = arith.addf %502, %505 : vector<8x16xf32>
    %c120 = arith.constant 120 : index
    %507 = memref.load %arg3[%c120] : memref<288xf32, #tpu.memory_space<smem>>
    %508 = vector.broadcast %507 : f32 to vector<8x16xf32>
    %509 = arith.mulf %508, %9 : vector<8x16xf32>
    %510 = arith.addf %506, %509 : vector<8x16xf32>
    %c121 = arith.constant 121 : index
    %511 = memref.load %arg3[%c121] : memref<288xf32, #tpu.memory_space<smem>>
    %512 = vector.broadcast %511 : f32 to vector<8x16xf32>
    %513 = arith.mulf %512, %10 : vector<8x16xf32>
    %514 = arith.addf %510, %513 : vector<8x16xf32>
    %c122 = arith.constant 122 : index
    %515 = memref.load %arg3[%c122] : memref<288xf32, #tpu.memory_space<smem>>
    %516 = vector.broadcast %515 : f32 to vector<8x16xf32>
    %517 = arith.mulf %516, %11 : vector<8x16xf32>
    %518 = arith.addf %514, %517 : vector<8x16xf32>
    %c123 = arith.constant 123 : index
    %519 = memref.load %arg3[%c123] : memref<288xf32, #tpu.memory_space<smem>>
    %520 = vector.broadcast %519 : f32 to vector<8x16xf32>
    %521 = arith.mulf %520, %12 : vector<8x16xf32>
    %522 = arith.addf %518, %521 : vector<8x16xf32>
    %c124 = arith.constant 124 : index
    %523 = memref.load %arg3[%c124] : memref<288xf32, #tpu.memory_space<smem>>
    %524 = vector.broadcast %523 : f32 to vector<8x16xf32>
    %525 = arith.mulf %524, %13 : vector<8x16xf32>
    %526 = arith.addf %522, %525 : vector<8x16xf32>
    %c125 = arith.constant 125 : index
    %527 = memref.load %arg3[%c125] : memref<288xf32, #tpu.memory_space<smem>>
    %528 = vector.broadcast %527 : f32 to vector<8x16xf32>
    %529 = arith.mulf %528, %14 : vector<8x16xf32>
    %530 = arith.addf %526, %529 : vector<8x16xf32>
    %c126 = arith.constant 126 : index
    %531 = memref.load %arg3[%c126] : memref<288xf32, #tpu.memory_space<smem>>
    %532 = vector.broadcast %531 : f32 to vector<8x16xf32>
    %533 = arith.mulf %532, %6 : vector<8x16xf32>
    %c127 = arith.constant 127 : index
    %534 = memref.load %arg3[%c127] : memref<288xf32, #tpu.memory_space<smem>>
    %535 = vector.broadcast %534 : f32 to vector<8x16xf32>
    %536 = arith.mulf %535, %7 : vector<8x16xf32>
    %537 = arith.addf %533, %536 : vector<8x16xf32>
    %c128 = arith.constant 128 : index
    %538 = memref.load %arg3[%c128] : memref<288xf32, #tpu.memory_space<smem>>
    %539 = vector.broadcast %538 : f32 to vector<8x16xf32>
    %540 = arith.mulf %539, %8 : vector<8x16xf32>
    %541 = arith.addf %537, %540 : vector<8x16xf32>
    %c129 = arith.constant 129 : index
    %542 = memref.load %arg3[%c129] : memref<288xf32, #tpu.memory_space<smem>>
    %543 = vector.broadcast %542 : f32 to vector<8x16xf32>
    %544 = arith.mulf %543, %9 : vector<8x16xf32>
    %545 = arith.addf %541, %544 : vector<8x16xf32>
    %c130 = arith.constant 130 : index
    %546 = memref.load %arg3[%c130] : memref<288xf32, #tpu.memory_space<smem>>
    %547 = vector.broadcast %546 : f32 to vector<8x16xf32>
    %548 = arith.mulf %547, %10 : vector<8x16xf32>
    %549 = arith.addf %545, %548 : vector<8x16xf32>
    %c131 = arith.constant 131 : index
    %550 = memref.load %arg3[%c131] : memref<288xf32, #tpu.memory_space<smem>>
    %551 = vector.broadcast %550 : f32 to vector<8x16xf32>
    %552 = arith.mulf %551, %11 : vector<8x16xf32>
    %553 = arith.addf %549, %552 : vector<8x16xf32>
    %c132 = arith.constant 132 : index
    %554 = memref.load %arg3[%c132] : memref<288xf32, #tpu.memory_space<smem>>
    %555 = vector.broadcast %554 : f32 to vector<8x16xf32>
    %556 = arith.mulf %555, %12 : vector<8x16xf32>
    %557 = arith.addf %553, %556 : vector<8x16xf32>
    %c133 = arith.constant 133 : index
    %558 = memref.load %arg3[%c133] : memref<288xf32, #tpu.memory_space<smem>>
    %559 = vector.broadcast %558 : f32 to vector<8x16xf32>
    %560 = arith.mulf %559, %13 : vector<8x16xf32>
    %561 = arith.addf %557, %560 : vector<8x16xf32>
    %c134 = arith.constant 134 : index
    %562 = memref.load %arg3[%c134] : memref<288xf32, #tpu.memory_space<smem>>
    %563 = vector.broadcast %562 : f32 to vector<8x16xf32>
    %564 = arith.mulf %563, %14 : vector<8x16xf32>
    %565 = arith.addf %561, %564 : vector<8x16xf32>
    %c135 = arith.constant 135 : index
    %566 = memref.load %arg3[%c135] : memref<288xf32, #tpu.memory_space<smem>>
    %567 = vector.broadcast %566 : f32 to vector<8x16xf32>
    %568 = arith.mulf %567, %6 : vector<8x16xf32>
    %c136 = arith.constant 136 : index
    %569 = memref.load %arg3[%c136] : memref<288xf32, #tpu.memory_space<smem>>
    %570 = vector.broadcast %569 : f32 to vector<8x16xf32>
    %571 = arith.mulf %570, %7 : vector<8x16xf32>
    %572 = arith.addf %568, %571 : vector<8x16xf32>
    %c137 = arith.constant 137 : index
    %573 = memref.load %arg3[%c137] : memref<288xf32, #tpu.memory_space<smem>>
    %574 = vector.broadcast %573 : f32 to vector<8x16xf32>
    %575 = arith.mulf %574, %8 : vector<8x16xf32>
    %576 = arith.addf %572, %575 : vector<8x16xf32>
    %c138 = arith.constant 138 : index
    %577 = memref.load %arg3[%c138] : memref<288xf32, #tpu.memory_space<smem>>
    %578 = vector.broadcast %577 : f32 to vector<8x16xf32>
    %579 = arith.mulf %578, %9 : vector<8x16xf32>
    %580 = arith.addf %576, %579 : vector<8x16xf32>
    %c139 = arith.constant 139 : index
    %581 = memref.load %arg3[%c139] : memref<288xf32, #tpu.memory_space<smem>>
    %582 = vector.broadcast %581 : f32 to vector<8x16xf32>
    %583 = arith.mulf %582, %10 : vector<8x16xf32>
    %584 = arith.addf %580, %583 : vector<8x16xf32>
    %c140 = arith.constant 140 : index
    %585 = memref.load %arg3[%c140] : memref<288xf32, #tpu.memory_space<smem>>
    %586 = vector.broadcast %585 : f32 to vector<8x16xf32>
    %587 = arith.mulf %586, %11 : vector<8x16xf32>
    %588 = arith.addf %584, %587 : vector<8x16xf32>
    %c141 = arith.constant 141 : index
    %589 = memref.load %arg3[%c141] : memref<288xf32, #tpu.memory_space<smem>>
    %590 = vector.broadcast %589 : f32 to vector<8x16xf32>
    %591 = arith.mulf %590, %12 : vector<8x16xf32>
    %592 = arith.addf %588, %591 : vector<8x16xf32>
    %c142 = arith.constant 142 : index
    %593 = memref.load %arg3[%c142] : memref<288xf32, #tpu.memory_space<smem>>
    %594 = vector.broadcast %593 : f32 to vector<8x16xf32>
    %595 = arith.mulf %594, %13 : vector<8x16xf32>
    %596 = arith.addf %592, %595 : vector<8x16xf32>
    %c143 = arith.constant 143 : index
    %597 = memref.load %arg3[%c143] : memref<288xf32, #tpu.memory_space<smem>>
    %598 = vector.broadcast %597 : f32 to vector<8x16xf32>
    %599 = arith.mulf %598, %14 : vector<8x16xf32>
    %600 = arith.addf %596, %599 : vector<8x16xf32>
    %601 = arith.maximumf %495, %530 : vector<8x16xf32>
    %602 = arith.maximumf %601, %565 : vector<8x16xf32>
    %603 = arith.maximumf %602, %600 : vector<8x16xf32>
    %604 = arith.subf %495, %603 : vector<8x16xf32>
    %605 = math.exp %604 : vector<8x16xf32>
    %606 = arith.subf %530, %603 : vector<8x16xf32>
    %607 = math.exp %606 : vector<8x16xf32>
    %608 = arith.subf %565, %603 : vector<8x16xf32>
    %609 = math.exp %608 : vector<8x16xf32>
    %610 = arith.subf %600, %603 : vector<8x16xf32>
    %611 = math.exp %610 : vector<8x16xf32>
    %612 = arith.mulf %355, %605 : vector<8x16xf32>
    %613 = arith.addf %605, %607 : vector<8x16xf32>
    %614 = arith.mulf %390, %607 : vector<8x16xf32>
    %615 = arith.addf %612, %614 : vector<8x16xf32>
    %616 = arith.addf %613, %609 : vector<8x16xf32>
    %617 = arith.mulf %425, %609 : vector<8x16xf32>
    %618 = arith.addf %615, %617 : vector<8x16xf32>
    %619 = arith.addf %616, %611 : vector<8x16xf32>
    %620 = arith.mulf %460, %611 : vector<8x16xf32>
    %621 = arith.addf %618, %620 : vector<8x16xf32>
    %622 = tpu.reciprocal %619 {approx = true} : vector<8x16xf32> -> vector<8x16xf32>
    %623 = arith.mulf %621, %622 : vector<8x16xf32>
    %c0_23 = arith.constant 0 : index
    %c1_24 = arith.constant 1 : index
    %c0_25 = arith.constant 0 : index
    %c0_26 = arith.constant 0 : index
    %624 = vector.load %arg4[%c0_23, %c1_24, %c0_25, %c0_26] : memref<1x4x8x16xf32, #tpu.memory_space<vmem>>, vector<1x1x8x16xf32>
    %625 = vector.shape_cast %624 : vector<1x1x8x16xf32> to vector<8x16xf32>
    %626 = vector.shape_cast %623 : vector<8x16xf32> to vector<1x1x8x16xf32>
    tpu.vector_store %arg4[%c0_23, %c1_24, %c0_25, %c0_26], %626 {strides = array<i32>} : memref<1x4x8x16xf32, #tpu.memory_space<vmem>>, vector<1x1x8x16xf32>,
    %c144 = arith.constant 144 : index
    %627 = memref.load %arg3[%c144] : memref<288xf32, #tpu.memory_space<smem>>
    %628 = vector.broadcast %627 : f32 to vector<8x16xf32>
    %629 = arith.mulf %628, %6 : vector<8x16xf32>
    %c145 = arith.constant 145 : index
    %630 = memref.load %arg3[%c145] : memref<288xf32, #tpu.memory_space<smem>>
    %631 = vector.broadcast %630 : f32 to vector<8x16xf32>
    %632 = arith.mulf %631, %7 : vector<8x16xf32>
    %633 = arith.addf %629, %632 : vector<8x16xf32>
    %c146 = arith.constant 146 : index
    %634 = memref.load %arg3[%c146] : memref<288xf32, #tpu.memory_space<smem>>
    %635 = vector.broadcast %634 : f32 to vector<8x16xf32>
    %636 = arith.mulf %635, %8 : vector<8x16xf32>
    %637 = arith.addf %633, %636 : vector<8x16xf32>
    %c147 = arith.constant 147 : index
    %638 = memref.load %arg3[%c147] : memref<288xf32, #tpu.memory_space<smem>>
    %639 = vector.broadcast %638 : f32 to vector<8x16xf32>
    %640 = arith.mulf %639, %9 : vector<8x16xf32>
    %641 = arith.addf %637, %640 : vector<8x16xf32>
    %c148 = arith.constant 148 : index
    %642 = memref.load %arg3[%c148] : memref<288xf32, #tpu.memory_space<smem>>
    %643 = vector.broadcast %642 : f32 to vector<8x16xf32>
    %644 = arith.mulf %643, %10 : vector<8x16xf32>
    %645 = arith.addf %641, %644 : vector<8x16xf32>
    %c149 = arith.constant 149 : index
    %646 = memref.load %arg3[%c149] : memref<288xf32, #tpu.memory_space<smem>>
    %647 = vector.broadcast %646 : f32 to vector<8x16xf32>
    %648 = arith.mulf %647, %11 : vector<8x16xf32>
    %649 = arith.addf %645, %648 : vector<8x16xf32>
    %c150 = arith.constant 150 : index
    %650 = memref.load %arg3[%c150] : memref<288xf32, #tpu.memory_space<smem>>
    %651 = vector.broadcast %650 : f32 to vector<8x16xf32>
    %652 = arith.mulf %651, %12 : vector<8x16xf32>
    %653 = arith.addf %649, %652 : vector<8x16xf32>
    %c151 = arith.constant 151 : index
    %654 = memref.load %arg3[%c151] : memref<288xf32, #tpu.memory_space<smem>>
    %655 = vector.broadcast %654 : f32 to vector<8x16xf32>
    %656 = arith.mulf %655, %13 : vector<8x16xf32>
    %657 = arith.addf %653, %656 : vector<8x16xf32>
    %c152 = arith.constant 152 : index
    %658 = memref.load %arg3[%c152] : memref<288xf32, #tpu.memory_space<smem>>
    %659 = vector.broadcast %658 : f32 to vector<8x16xf32>
    %660 = arith.mulf %659, %14 : vector<8x16xf32>
    %661 = arith.addf %657, %660 : vector<8x16xf32>
    %c153 = arith.constant 153 : index
    %662 = memref.load %arg3[%c153] : memref<288xf32, #tpu.memory_space<smem>>
    %663 = vector.broadcast %662 : f32 to vector<8x16xf32>
    %664 = arith.mulf %663, %6 : vector<8x16xf32>
    %c154 = arith.constant 154 : index
    %665 = memref.load %arg3[%c154] : memref<288xf32, #tpu.memory_space<smem>>
    %666 = vector.broadcast %665 : f32 to vector<8x16xf32>
    %667 = arith.mulf %666, %7 : vector<8x16xf32>
    %668 = arith.addf %664, %667 : vector<8x16xf32>
    %c155 = arith.constant 155 : index
    %669 = memref.load %arg3[%c155] : memref<288xf32, #tpu.memory_space<smem>>
    %670 = vector.broadcast %669 : f32 to vector<8x16xf32>
    %671 = arith.mulf %670, %8 : vector<8x16xf32>
    %672 = arith.addf %668, %671 : vector<8x16xf32>
    %c156 = arith.constant 156 : index
    %673 = memref.load %arg3[%c156] : memref<288xf32, #tpu.memory_space<smem>>
    %674 = vector.broadcast %673 : f32 to vector<8x16xf32>
    %675 = arith.mulf %674, %9 : vector<8x16xf32>
    %676 = arith.addf %672, %675 : vector<8x16xf32>
    %c157 = arith.constant 157 : index
    %677 = memref.load %arg3[%c157] : memref<288xf32, #tpu.memory_space<smem>>
    %678 = vector.broadcast %677 : f32 to vector<8x16xf32>
    %679 = arith.mulf %678, %10 : vector<8x16xf32>
    %680 = arith.addf %676, %679 : vector<8x16xf32>
    %c158 = arith.constant 158 : index
    %681 = memref.load %arg3[%c158] : memref<288xf32, #tpu.memory_space<smem>>
    %682 = vector.broadcast %681 : f32 to vector<8x16xf32>
    %683 = arith.mulf %682, %11 : vector<8x16xf32>
    %684 = arith.addf %680, %683 : vector<8x16xf32>
    %c159 = arith.constant 159 : index
    %685 = memref.load %arg3[%c159] : memref<288xf32, #tpu.memory_space<smem>>
    %686 = vector.broadcast %685 : f32 to vector<8x16xf32>
    %687 = arith.mulf %686, %12 : vector<8x16xf32>
    %688 = arith.addf %684, %687 : vector<8x16xf32>
    %c160 = arith.constant 160 : index
    %689 = memref.load %arg3[%c160] : memref<288xf32, #tpu.memory_space<smem>>
    %690 = vector.broadcast %689 : f32 to vector<8x16xf32>
    %691 = arith.mulf %690, %13 : vector<8x16xf32>
    %692 = arith.addf %688, %691 : vector<8x16xf32>
    %c161 = arith.constant 161 : index
    %693 = memref.load %arg3[%c161] : memref<288xf32, #tpu.memory_space<smem>>
    %694 = vector.broadcast %693 : f32 to vector<8x16xf32>
    %695 = arith.mulf %694, %14 : vector<8x16xf32>
    %696 = arith.addf %692, %695 : vector<8x16xf32>
    %c162 = arith.constant 162 : index
    %697 = memref.load %arg3[%c162] : memref<288xf32, #tpu.memory_space<smem>>
    %698 = vector.broadcast %697 : f32 to vector<8x16xf32>
    %699 = arith.mulf %698, %6 : vector<8x16xf32>
    %c163 = arith.constant 163 : index
    %700 = memref.load %arg3[%c163] : memref<288xf32, #tpu.memory_space<smem>>
    %701 = vector.broadcast %700 : f32 to vector<8x16xf32>
    %702 = arith.mulf %701, %7 : vector<8x16xf32>
    %703 = arith.addf %699, %702 : vector<8x16xf32>
    %c164 = arith.constant 164 : index
    %704 = memref.load %arg3[%c164] : memref<288xf32, #tpu.memory_space<smem>>
    %705 = vector.broadcast %704 : f32 to vector<8x16xf32>
    %706 = arith.mulf %705, %8 : vector<8x16xf32>
    %707 = arith.addf %703, %706 : vector<8x16xf32>
    %c165 = arith.constant 165 : index
    %708 = memref.load %arg3[%c165] : memref<288xf32, #tpu.memory_space<smem>>
    %709 = vector.broadcast %708 : f32 to vector<8x16xf32>
    %710 = arith.mulf %709, %9 : vector<8x16xf32>
    %711 = arith.addf %707, %710 : vector<8x16xf32>
    %c166 = arith.constant 166 : index
    %712 = memref.load %arg3[%c166] : memref<288xf32, #tpu.memory_space<smem>>
    %713 = vector.broadcast %712 : f32 to vector<8x16xf32>
    %714 = arith.mulf %713, %10 : vector<8x16xf32>
    %715 = arith.addf %711, %714 : vector<8x16xf32>
    %c167 = arith.constant 167 : index
    %716 = memref.load %arg3[%c167] : memref<288xf32, #tpu.memory_space<smem>>
    %717 = vector.broadcast %716 : f32 to vector<8x16xf32>
    %718 = arith.mulf %717, %11 : vector<8x16xf32>
    %719 = arith.addf %715, %718 : vector<8x16xf32>
    %c168 = arith.constant 168 : index
    %720 = memref.load %arg3[%c168] : memref<288xf32, #tpu.memory_space<smem>>
    %721 = vector.broadcast %720 : f32 to vector<8x16xf32>
    %722 = arith.mulf %721, %12 : vector<8x16xf32>
    %723 = arith.addf %719, %722 : vector<8x16xf32>
    %c169 = arith.constant 169 : index
    %724 = memref.load %arg3[%c169] : memref<288xf32, #tpu.memory_space<smem>>
    %725 = vector.broadcast %724 : f32 to vector<8x16xf32>
    %726 = arith.mulf %725, %13 : vector<8x16xf32>
    %727 = arith.addf %723, %726 : vector<8x16xf32>
    %c170 = arith.constant 170 : index
    %728 = memref.load %arg3[%c170] : memref<288xf32, #tpu.memory_space<smem>>
    %729 = vector.broadcast %728 : f32 to vector<8x16xf32>
    %730 = arith.mulf %729, %14 : vector<8x16xf32>
    %731 = arith.addf %727, %730 : vector<8x16xf32>
    %c171 = arith.constant 171 : index
    %732 = memref.load %arg3[%c171] : memref<288xf32, #tpu.memory_space<smem>>
    %733 = vector.broadcast %732 : f32 to vector<8x16xf32>
    %734 = arith.mulf %733, %6 : vector<8x16xf32>
    %c172 = arith.constant 172 : index
    %735 = memref.load %arg3[%c172] : memref<288xf32, #tpu.memory_space<smem>>
    %736 = vector.broadcast %735 : f32 to vector<8x16xf32>
    %737 = arith.mulf %736, %7 : vector<8x16xf32>
    %738 = arith.addf %734, %737 : vector<8x16xf32>
    %c173 = arith.constant 173 : index
    %739 = memref.load %arg3[%c173] : memref<288xf32, #tpu.memory_space<smem>>
    %740 = vector.broadcast %739 : f32 to vector<8x16xf32>
    %741 = arith.mulf %740, %8 : vector<8x16xf32>
    %742 = arith.addf %738, %741 : vector<8x16xf32>
    %c174 = arith.constant 174 : index
    %743 = memref.load %arg3[%c174] : memref<288xf32, #tpu.memory_space<smem>>
    %744 = vector.broadcast %743 : f32 to vector<8x16xf32>
    %745 = arith.mulf %744, %9 : vector<8x16xf32>
    %746 = arith.addf %742, %745 : vector<8x16xf32>
    %c175 = arith.constant 175 : index
    %747 = memref.load %arg3[%c175] : memref<288xf32, #tpu.memory_space<smem>>
    %748 = vector.broadcast %747 : f32 to vector<8x16xf32>
    %749 = arith.mulf %748, %10 : vector<8x16xf32>
    %750 = arith.addf %746, %749 : vector<8x16xf32>
    %c176 = arith.constant 176 : index
    %751 = memref.load %arg3[%c176] : memref<288xf32, #tpu.memory_space<smem>>
    %752 = vector.broadcast %751 : f32 to vector<8x16xf32>
    %753 = arith.mulf %752, %11 : vector<8x16xf32>
    %754 = arith.addf %750, %753 : vector<8x16xf32>
    %c177 = arith.constant 177 : index
    %755 = memref.load %arg3[%c177] : memref<288xf32, #tpu.memory_space<smem>>
    %756 = vector.broadcast %755 : f32 to vector<8x16xf32>
    %757 = arith.mulf %756, %12 : vector<8x16xf32>
    %758 = arith.addf %754, %757 : vector<8x16xf32>
    %c178 = arith.constant 178 : index
    %759 = memref.load %arg3[%c178] : memref<288xf32, #tpu.memory_space<smem>>
    %760 = vector.broadcast %759 : f32 to vector<8x16xf32>
    %761 = arith.mulf %760, %13 : vector<8x16xf32>
    %762 = arith.addf %758, %761 : vector<8x16xf32>
    %c179 = arith.constant 179 : index
    %763 = memref.load %arg3[%c179] : memref<288xf32, #tpu.memory_space<smem>>
    %764 = vector.broadcast %763 : f32 to vector<8x16xf32>
    %765 = arith.mulf %764, %14 : vector<8x16xf32>
    %766 = arith.addf %762, %765 : vector<8x16xf32>
    %c180 = arith.constant 180 : index
    %767 = memref.load %arg3[%c180] : memref<288xf32, #tpu.memory_space<smem>>
    %768 = vector.broadcast %767 : f32 to vector<8x16xf32>
    %769 = arith.mulf %768, %6 : vector<8x16xf32>
    %c181 = arith.constant 181 : index
    %770 = memref.load %arg3[%c181] : memref<288xf32, #tpu.memory_space<smem>>
    %771 = vector.broadcast %770 : f32 to vector<8x16xf32>
    %772 = arith.mulf %771, %7 : vector<8x16xf32>
    %773 = arith.addf %769, %772 : vector<8x16xf32>
    %c182 = arith.constant 182 : index
    %774 = memref.load %arg3[%c182] : memref<288xf32, #tpu.memory_space<smem>>
    %775 = vector.broadcast %774 : f32 to vector<8x16xf32>
    %776 = arith.mulf %775, %8 : vector<8x16xf32>
    %777 = arith.addf %773, %776 : vector<8x16xf32>
    %c183 = arith.constant 183 : index
    %778 = memref.load %arg3[%c183] : memref<288xf32, #tpu.memory_space<smem>>
    %779 = vector.broadcast %778 : f32 to vector<8x16xf32>
    %780 = arith.mulf %779, %9 : vector<8x16xf32>
    %781 = arith.addf %777, %780 : vector<8x16xf32>
    %c184 = arith.constant 184 : index
    %782 = memref.load %arg3[%c184] : memref<288xf32, #tpu.memory_space<smem>>
    %783 = vector.broadcast %782 : f32 to vector<8x16xf32>
    %784 = arith.mulf %783, %10 : vector<8x16xf32>
    %785 = arith.addf %781, %784 : vector<8x16xf32>
    %c185 = arith.constant 185 : index
    %786 = memref.load %arg3[%c185] : memref<288xf32, #tpu.memory_space<smem>>
    %787 = vector.broadcast %786 : f32 to vector<8x16xf32>
    %788 = arith.mulf %787, %11 : vector<8x16xf32>
    %789 = arith.addf %785, %788 : vector<8x16xf32>
    %c186 = arith.constant 186 : index
    %790 = memref.load %arg3[%c186] : memref<288xf32, #tpu.memory_space<smem>>
    %791 = vector.broadcast %790 : f32 to vector<8x16xf32>
    %792 = arith.mulf %791, %12 : vector<8x16xf32>
    %793 = arith.addf %789, %792 : vector<8x16xf32>
    %c187 = arith.constant 187 : index
    %794 = memref.load %arg3[%c187] : memref<288xf32, #tpu.memory_space<smem>>
    %795 = vector.broadcast %794 : f32 to vector<8x16xf32>
    %796 = arith.mulf %795, %13 : vector<8x16xf32>
    %797 = arith.addf %793, %796 : vector<8x16xf32>
    %c188 = arith.constant 188 : index
    %798 = memref.load %arg3[%c188] : memref<288xf32, #tpu.memory_space<smem>>
    %799 = vector.broadcast %798 : f32 to vector<8x16xf32>
    %800 = arith.mulf %799, %14 : vector<8x16xf32>
    %801 = arith.addf %797, %800 : vector<8x16xf32>
    %c189 = arith.constant 189 : index
    %802 = memref.load %arg3[%c189] : memref<288xf32, #tpu.memory_space<smem>>
    %803 = vector.broadcast %802 : f32 to vector<8x16xf32>
    %804 = arith.mulf %803, %6 : vector<8x16xf32>
    %c190 = arith.constant 190 : index
    %805 = memref.load %arg3[%c190] : memref<288xf32, #tpu.memory_space<smem>>
    %806 = vector.broadcast %805 : f32 to vector<8x16xf32>
    %807 = arith.mulf %806, %7 : vector<8x16xf32>
    %808 = arith.addf %804, %807 : vector<8x16xf32>
    %c191 = arith.constant 191 : index
    %809 = memref.load %arg3[%c191] : memref<288xf32, #tpu.memory_space<smem>>
    %810 = vector.broadcast %809 : f32 to vector<8x16xf32>
    %811 = arith.mulf %810, %8 : vector<8x16xf32>
    %812 = arith.addf %808, %811 : vector<8x16xf32>
    %c192 = arith.constant 192 : index
    %813 = memref.load %arg3[%c192] : memref<288xf32, #tpu.memory_space<smem>>
    %814 = vector.broadcast %813 : f32 to vector<8x16xf32>
    %815 = arith.mulf %814, %9 : vector<8x16xf32>
    %816 = arith.addf %812, %815 : vector<8x16xf32>
    %c193 = arith.constant 193 : index
    %817 = memref.load %arg3[%c193] : memref<288xf32, #tpu.memory_space<smem>>
    %818 = vector.broadcast %817 : f32 to vector<8x16xf32>
    %819 = arith.mulf %818, %10 : vector<8x16xf32>
    %820 = arith.addf %816, %819 : vector<8x16xf32>
    %c194 = arith.constant 194 : index
    %821 = memref.load %arg3[%c194] : memref<288xf32, #tpu.memory_space<smem>>
    %822 = vector.broadcast %821 : f32 to vector<8x16xf32>
    %823 = arith.mulf %822, %11 : vector<8x16xf32>
    %824 = arith.addf %820, %823 : vector<8x16xf32>
    %c195 = arith.constant 195 : index
    %825 = memref.load %arg3[%c195] : memref<288xf32, #tpu.memory_space<smem>>
    %826 = vector.broadcast %825 : f32 to vector<8x16xf32>
    %827 = arith.mulf %826, %12 : vector<8x16xf32>
    %828 = arith.addf %824, %827 : vector<8x16xf32>
    %c196 = arith.constant 196 : index
    %829 = memref.load %arg3[%c196] : memref<288xf32, #tpu.memory_space<smem>>
    %830 = vector.broadcast %829 : f32 to vector<8x16xf32>
    %831 = arith.mulf %830, %13 : vector<8x16xf32>
    %832 = arith.addf %828, %831 : vector<8x16xf32>
    %c197 = arith.constant 197 : index
    %833 = memref.load %arg3[%c197] : memref<288xf32, #tpu.memory_space<smem>>
    %834 = vector.broadcast %833 : f32 to vector<8x16xf32>
    %835 = arith.mulf %834, %14 : vector<8x16xf32>
    %836 = arith.addf %832, %835 : vector<8x16xf32>
    %c198 = arith.constant 198 : index
    %837 = memref.load %arg3[%c198] : memref<288xf32, #tpu.memory_space<smem>>
    %838 = vector.broadcast %837 : f32 to vector<8x16xf32>
    %839 = arith.mulf %838, %6 : vector<8x16xf32>
    %c199 = arith.constant 199 : index
    %840 = memref.load %arg3[%c199] : memref<288xf32, #tpu.memory_space<smem>>
    %841 = vector.broadcast %840 : f32 to vector<8x16xf32>
    %842 = arith.mulf %841, %7 : vector<8x16xf32>
    %843 = arith.addf %839, %842 : vector<8x16xf32>
    %c200 = arith.constant 200 : index
    %844 = memref.load %arg3[%c200] : memref<288xf32, #tpu.memory_space<smem>>
    %845 = vector.broadcast %844 : f32 to vector<8x16xf32>
    %846 = arith.mulf %845, %8 : vector<8x16xf32>
    %847 = arith.addf %843, %846 : vector<8x16xf32>
    %c201 = arith.constant 201 : index
    %848 = memref.load %arg3[%c201] : memref<288xf32, #tpu.memory_space<smem>>
    %849 = vector.broadcast %848 : f32 to vector<8x16xf32>
    %850 = arith.mulf %849, %9 : vector<8x16xf32>
    %851 = arith.addf %847, %850 : vector<8x16xf32>
    %c202 = arith.constant 202 : index
    %852 = memref.load %arg3[%c202] : memref<288xf32, #tpu.memory_space<smem>>
    %853 = vector.broadcast %852 : f32 to vector<8x16xf32>
    %854 = arith.mulf %853, %10 : vector<8x16xf32>
    %855 = arith.addf %851, %854 : vector<8x16xf32>
    %c203 = arith.constant 203 : index
    %856 = memref.load %arg3[%c203] : memref<288xf32, #tpu.memory_space<smem>>
    %857 = vector.broadcast %856 : f32 to vector<8x16xf32>
    %858 = arith.mulf %857, %11 : vector<8x16xf32>
    %859 = arith.addf %855, %858 : vector<8x16xf32>
    %c204 = arith.constant 204 : index
    %860 = memref.load %arg3[%c204] : memref<288xf32, #tpu.memory_space<smem>>
    %861 = vector.broadcast %860 : f32 to vector<8x16xf32>
    %862 = arith.mulf %861, %12 : vector<8x16xf32>
    %863 = arith.addf %859, %862 : vector<8x16xf32>
    %c205 = arith.constant 205 : index
    %864 = memref.load %arg3[%c205] : memref<288xf32, #tpu.memory_space<smem>>
    %865 = vector.broadcast %864 : f32 to vector<8x16xf32>
    %866 = arith.mulf %865, %13 : vector<8x16xf32>
    %867 = arith.addf %863, %866 : vector<8x16xf32>
    %c206 = arith.constant 206 : index
    %868 = memref.load %arg3[%c206] : memref<288xf32, #tpu.memory_space<smem>>
    %869 = vector.broadcast %868 : f32 to vector<8x16xf32>
    %870 = arith.mulf %869, %14 : vector<8x16xf32>
    %871 = arith.addf %867, %870 : vector<8x16xf32>
    %c207 = arith.constant 207 : index
    %872 = memref.load %arg3[%c207] : memref<288xf32, #tpu.memory_space<smem>>
    %873 = vector.broadcast %872 : f32 to vector<8x16xf32>
    %874 = arith.mulf %873, %6 : vector<8x16xf32>
    %c208 = arith.constant 208 : index
    %875 = memref.load %arg3[%c208] : memref<288xf32, #tpu.memory_space<smem>>
    %876 = vector.broadcast %875 : f32 to vector<8x16xf32>
    %877 = arith.mulf %876, %7 : vector<8x16xf32>
    %878 = arith.addf %874, %877 : vector<8x16xf32>
    %c209 = arith.constant 209 : index
    %879 = memref.load %arg3[%c209] : memref<288xf32, #tpu.memory_space<smem>>
    %880 = vector.broadcast %879 : f32 to vector<8x16xf32>
    %881 = arith.mulf %880, %8 : vector<8x16xf32>
    %882 = arith.addf %878, %881 : vector<8x16xf32>
    %c210 = arith.constant 210 : index
    %883 = memref.load %arg3[%c210] : memref<288xf32, #tpu.memory_space<smem>>
    %884 = vector.broadcast %883 : f32 to vector<8x16xf32>
    %885 = arith.mulf %884, %9 : vector<8x16xf32>
    %886 = arith.addf %882, %885 : vector<8x16xf32>
    %c211 = arith.constant 211 : index
    %887 = memref.load %arg3[%c211] : memref<288xf32, #tpu.memory_space<smem>>
    %888 = vector.broadcast %887 : f32 to vector<8x16xf32>
    %889 = arith.mulf %888, %10 : vector<8x16xf32>
    %890 = arith.addf %886, %889 : vector<8x16xf32>
    %c212 = arith.constant 212 : index
    %891 = memref.load %arg3[%c212] : memref<288xf32, #tpu.memory_space<smem>>
    %892 = vector.broadcast %891 : f32 to vector<8x16xf32>
    %893 = arith.mulf %892, %11 : vector<8x16xf32>
    %894 = arith.addf %890, %893 : vector<8x16xf32>
    %c213 = arith.constant 213 : index
    %895 = memref.load %arg3[%c213] : memref<288xf32, #tpu.memory_space<smem>>
    %896 = vector.broadcast %895 : f32 to vector<8x16xf32>
    %897 = arith.mulf %896, %12 : vector<8x16xf32>
    %898 = arith.addf %894, %897 : vector<8x16xf32>
    %c214 = arith.constant 214 : index
    %899 = memref.load %arg3[%c214] : memref<288xf32, #tpu.memory_space<smem>>
    %900 = vector.broadcast %899 : f32 to vector<8x16xf32>
    %901 = arith.mulf %900, %13 : vector<8x16xf32>
    %902 = arith.addf %898, %901 : vector<8x16xf32>
    %c215 = arith.constant 215 : index
    %903 = memref.load %arg3[%c215] : memref<288xf32, #tpu.memory_space<smem>>
    %904 = vector.broadcast %903 : f32 to vector<8x16xf32>
    %905 = arith.mulf %904, %14 : vector<8x16xf32>
    %906 = arith.addf %902, %905 : vector<8x16xf32>
    %907 = arith.maximumf %801, %836 : vector<8x16xf32>
    %908 = arith.maximumf %907, %871 : vector<8x16xf32>
    %909 = arith.maximumf %908, %906 : vector<8x16xf32>
    %910 = arith.subf %801, %909 : vector<8x16xf32>
    %911 = math.exp %910 : vector<8x16xf32>
    %912 = arith.subf %836, %909 : vector<8x16xf32>
    %913 = math.exp %912 : vector<8x16xf32>
    %914 = arith.subf %871, %909 : vector<8x16xf32>
    %915 = math.exp %914 : vector<8x16xf32>
    %916 = arith.subf %906, %909 : vector<8x16xf32>
    %917 = math.exp %916 : vector<8x16xf32>
    %918 = arith.mulf %661, %911 : vector<8x16xf32>
    %919 = arith.addf %911, %913 : vector<8x16xf32>
    %920 = arith.mulf %696, %913 : vector<8x16xf32>
    %921 = arith.addf %918, %920 : vector<8x16xf32>
    %922 = arith.addf %919, %915 : vector<8x16xf32>
    %923 = arith.mulf %731, %915 : vector<8x16xf32>
    %924 = arith.addf %921, %923 : vector<8x16xf32>
    %925 = arith.addf %922, %917 : vector<8x16xf32>
    %926 = arith.mulf %766, %917 : vector<8x16xf32>
    %927 = arith.addf %924, %926 : vector<8x16xf32>
    %928 = tpu.reciprocal %925 {approx = true} : vector<8x16xf32> -> vector<8x16xf32>
    %929 = arith.mulf %927, %928 : vector<8x16xf32>
    %c0_27 = arith.constant 0 : index
    %c2_28 = arith.constant 2 : index
    %c0_29 = arith.constant 0 : index
    %c0_30 = arith.constant 0 : index
    %930 = vector.load %arg4[%c0_27, %c2_28, %c0_29, %c0_30] : memref<1x4x8x16xf32, #tpu.memory_space<vmem>>, vector<1x1x8x16xf32>
    %931 = vector.shape_cast %930 : vector<1x1x8x16xf32> to vector<8x16xf32>
    %932 = vector.shape_cast %929 : vector<8x16xf32> to vector<1x1x8x16xf32>
    tpu.vector_store %arg4[%c0_27, %c2_28, %c0_29, %c0_30], %932 {strides = array<i32>} : memref<1x4x8x16xf32, #tpu.memory_space<vmem>>, vector<1x1x8x16xf32>,
    %c216 = arith.constant 216 : index
    %933 = memref.load %arg3[%c216] : memref<288xf32, #tpu.memory_space<smem>>
    %934 = vector.broadcast %933 : f32 to vector<8x16xf32>
    %935 = arith.mulf %934, %6 : vector<8x16xf32>
    %c217 = arith.constant 217 : index
    %936 = memref.load %arg3[%c217] : memref<288xf32, #tpu.memory_space<smem>>
    %937 = vector.broadcast %936 : f32 to vector<8x16xf32>
    %938 = arith.mulf %937, %7 : vector<8x16xf32>
    %939 = arith.addf %935, %938 : vector<8x16xf32>
    %c218 = arith.constant 218 : index
    %940 = memref.load %arg3[%c218] : memref<288xf32, #tpu.memory_space<smem>>
    %941 = vector.broadcast %940 : f32 to vector<8x16xf32>
    %942 = arith.mulf %941, %8 : vector<8x16xf32>
    %943 = arith.addf %939, %942 : vector<8x16xf32>
    %c219 = arith.constant 219 : index
    %944 = memref.load %arg3[%c219] : memref<288xf32, #tpu.memory_space<smem>>
    %945 = vector.broadcast %944 : f32 to vector<8x16xf32>
    %946 = arith.mulf %945, %9 : vector<8x16xf32>
    %947 = arith.addf %943, %946 : vector<8x16xf32>
    %c220 = arith.constant 220 : index
    %948 = memref.load %arg3[%c220] : memref<288xf32, #tpu.memory_space<smem>>
    %949 = vector.broadcast %948 : f32 to vector<8x16xf32>
    %950 = arith.mulf %949, %10 : vector<8x16xf32>
    %951 = arith.addf %947, %950 : vector<8x16xf32>
    %c221 = arith.constant 221 : index
    %952 = memref.load %arg3[%c221] : memref<288xf32, #tpu.memory_space<smem>>
    %953 = vector.broadcast %952 : f32 to vector<8x16xf32>
    %954 = arith.mulf %953, %11 : vector<8x16xf32>
    %955 = arith.addf %951, %954 : vector<8x16xf32>
    %c222 = arith.constant 222 : index
    %956 = memref.load %arg3[%c222] : memref<288xf32, #tpu.memory_space<smem>>
    %957 = vector.broadcast %956 : f32 to vector<8x16xf32>
    %958 = arith.mulf %957, %12 : vector<8x16xf32>
    %959 = arith.addf %955, %958 : vector<8x16xf32>
    %c223 = arith.constant 223 : index
    %960 = memref.load %arg3[%c223] : memref<288xf32, #tpu.memory_space<smem>>
    %961 = vector.broadcast %960 : f32 to vector<8x16xf32>
    %962 = arith.mulf %961, %13 : vector<8x16xf32>
    %963 = arith.addf %959, %962 : vector<8x16xf32>
    %c224 = arith.constant 224 : index
    %964 = memref.load %arg3[%c224] : memref<288xf32, #tpu.memory_space<smem>>
    %965 = vector.broadcast %964 : f32 to vector<8x16xf32>
    %966 = arith.mulf %965, %14 : vector<8x16xf32>
    %967 = arith.addf %963, %966 : vector<8x16xf32>
    %c225 = arith.constant 225 : index
    %968 = memref.load %arg3[%c225] : memref<288xf32, #tpu.memory_space<smem>>
    %969 = vector.broadcast %968 : f32 to vector<8x16xf32>
    %970 = arith.mulf %969, %6 : vector<8x16xf32>
    %c226 = arith.constant 226 : index
    %971 = memref.load %arg3[%c226] : memref<288xf32, #tpu.memory_space<smem>>
    %972 = vector.broadcast %971 : f32 to vector<8x16xf32>
    %973 = arith.mulf %972, %7 : vector<8x16xf32>
    %974 = arith.addf %970, %973 : vector<8x16xf32>
    %c227 = arith.constant 227 : index
    %975 = memref.load %arg3[%c227] : memref<288xf32, #tpu.memory_space<smem>>
    %976 = vector.broadcast %975 : f32 to vector<8x16xf32>
    %977 = arith.mulf %976, %8 : vector<8x16xf32>
    %978 = arith.addf %974, %977 : vector<8x16xf32>
    %c228 = arith.constant 228 : index
    %979 = memref.load %arg3[%c228] : memref<288xf32, #tpu.memory_space<smem>>
    %980 = vector.broadcast %979 : f32 to vector<8x16xf32>
    %981 = arith.mulf %980, %9 : vector<8x16xf32>
    %982 = arith.addf %978, %981 : vector<8x16xf32>
    %c229 = arith.constant 229 : index
    %983 = memref.load %arg3[%c229] : memref<288xf32, #tpu.memory_space<smem>>
    %984 = vector.broadcast %983 : f32 to vector<8x16xf32>
    %985 = arith.mulf %984, %10 : vector<8x16xf32>
    %986 = arith.addf %982, %985 : vector<8x16xf32>
    %c230 = arith.constant 230 : index
    %987 = memref.load %arg3[%c230] : memref<288xf32, #tpu.memory_space<smem>>
    %988 = vector.broadcast %987 : f32 to vector<8x16xf32>
    %989 = arith.mulf %988, %11 : vector<8x16xf32>
    %990 = arith.addf %986, %989 : vector<8x16xf32>
    %c231 = arith.constant 231 : index
    %991 = memref.load %arg3[%c231] : memref<288xf32, #tpu.memory_space<smem>>
    %992 = vector.broadcast %991 : f32 to vector<8x16xf32>
    %993 = arith.mulf %992, %12 : vector<8x16xf32>
    %994 = arith.addf %990, %993 : vector<8x16xf32>
    %c232 = arith.constant 232 : index
    %995 = memref.load %arg3[%c232] : memref<288xf32, #tpu.memory_space<smem>>
    %996 = vector.broadcast %995 : f32 to vector<8x16xf32>
    %997 = arith.mulf %996, %13 : vector<8x16xf32>
    %998 = arith.addf %994, %997 : vector<8x16xf32>
    %c233 = arith.constant 233 : index
    %999 = memref.load %arg3[%c233] : memref<288xf32, #tpu.memory_space<smem>>
    %1000 = vector.broadcast %999 : f32 to vector<8x16xf32>
    %1001 = arith.mulf %1000, %14 : vector<8x16xf32>
    %1002 = arith.addf %998, %1001 : vector<8x16xf32>
    %c234 = arith.constant 234 : index
    %1003 = memref.load %arg3[%c234] : memref<288xf32, #tpu.memory_space<smem>>
    %1004 = vector.broadcast %1003 : f32 to vector<8x16xf32>
    %1005 = arith.mulf %1004, %6 : vector<8x16xf32>
    %c235 = arith.constant 235 : index
    %1006 = memref.load %arg3[%c235] : memref<288xf32, #tpu.memory_space<smem>>
    %1007 = vector.broadcast %1006 : f32 to vector<8x16xf32>
    %1008 = arith.mulf %1007, %7 : vector<8x16xf32>
    %1009 = arith.addf %1005, %1008 : vector<8x16xf32>
    %c236 = arith.constant 236 : index
    %1010 = memref.load %arg3[%c236] : memref<288xf32, #tpu.memory_space<smem>>
    %1011 = vector.broadcast %1010 : f32 to vector<8x16xf32>
    %1012 = arith.mulf %1011, %8 : vector<8x16xf32>
    %1013 = arith.addf %1009, %1012 : vector<8x16xf32>
    %c237 = arith.constant 237 : index
    %1014 = memref.load %arg3[%c237] : memref<288xf32, #tpu.memory_space<smem>>
    %1015 = vector.broadcast %1014 : f32 to vector<8x16xf32>
    %1016 = arith.mulf %1015, %9 : vector<8x16xf32>
    %1017 = arith.addf %1013, %1016 : vector<8x16xf32>
    %c238 = arith.constant 238 : index
    %1018 = memref.load %arg3[%c238] : memref<288xf32, #tpu.memory_space<smem>>
    %1019 = vector.broadcast %1018 : f32 to vector<8x16xf32>
    %1020 = arith.mulf %1019, %10 : vector<8x16xf32>
    %1021 = arith.addf %1017, %1020 : vector<8x16xf32>
    %c239 = arith.constant 239 : index
    %1022 = memref.load %arg3[%c239] : memref<288xf32, #tpu.memory_space<smem>>
    %1023 = vector.broadcast %1022 : f32 to vector<8x16xf32>
    %1024 = arith.mulf %1023, %11 : vector<8x16xf32>
    %1025 = arith.addf %1021, %1024 : vector<8x16xf32>
    %c240 = arith.constant 240 : index
    %1026 = memref.load %arg3[%c240] : memref<288xf32, #tpu.memory_space<smem>>
    %1027 = vector.broadcast %1026 : f32 to vector<8x16xf32>
    %1028 = arith.mulf %1027, %12 : vector<8x16xf32>
    %1029 = arith.addf %1025, %1028 : vector<8x16xf32>
    %c241 = arith.constant 241 : index
    %1030 = memref.load %arg3[%c241] : memref<288xf32, #tpu.memory_space<smem>>
    %1031 = vector.broadcast %1030 : f32 to vector<8x16xf32>
    %1032 = arith.mulf %1031, %13 : vector<8x16xf32>
    %1033 = arith.addf %1029, %1032 : vector<8x16xf32>
    %c242 = arith.constant 242 : index
    %1034 = memref.load %arg3[%c242] : memref<288xf32, #tpu.memory_space<smem>>
    %1035 = vector.broadcast %1034 : f32 to vector<8x16xf32>
    %1036 = arith.mulf %1035, %14 : vector<8x16xf32>
    %1037 = arith.addf %1033, %1036 : vector<8x16xf32>
    %c243 = arith.constant 243 : index
    %1038 = memref.load %arg3[%c243] : memref<288xf32, #tpu.memory_space<smem>>
    %1039 = vector.broadcast %1038 : f32 to vector<8x16xf32>
    %1040 = arith.mulf %1039, %6 : vector<8x16xf32>
    %c244 = arith.constant 244 : index
    %1041 = memref.load %arg3[%c244] : memref<288xf32, #tpu.memory_space<smem>>
    %1042 = vector.broadcast %1041 : f32 to vector<8x16xf32>
    %1043 = arith.mulf %1042, %7 : vector<8x16xf32>
    %1044 = arith.addf %1040, %1043 : vector<8x16xf32>
    %c245 = arith.constant 245 : index
    %1045 = memref.load %arg3[%c245] : memref<288xf32, #tpu.memory_space<smem>>
    %1046 = vector.broadcast %1045 : f32 to vector<8x16xf32>
    %1047 = arith.mulf %1046, %8 : vector<8x16xf32>
    %1048 = arith.addf %1044, %1047 : vector<8x16xf32>
    %c246 = arith.constant 246 : index
    %1049 = memref.load %arg3[%c246] : memref<288xf32, #tpu.memory_space<smem>>
    %1050 = vector.broadcast %1049 : f32 to vector<8x16xf32>
    %1051 = arith.mulf %1050, %9 : vector<8x16xf32>
    %1052 = arith.addf %1048, %1051 : vector<8x16xf32>
    %c247 = arith.constant 247 : index
    %1053 = memref.load %arg3[%c247] : memref<288xf32, #tpu.memory_space<smem>>
    %1054 = vector.broadcast %1053 : f32 to vector<8x16xf32>
    %1055 = arith.mulf %1054, %10 : vector<8x16xf32>
    %1056 = arith.addf %1052, %1055 : vector<8x16xf32>
    %c248 = arith.constant 248 : index
    %1057 = memref.load %arg3[%c248] : memref<288xf32, #tpu.memory_space<smem>>
    %1058 = vector.broadcast %1057 : f32 to vector<8x16xf32>
    %1059 = arith.mulf %1058, %11 : vector<8x16xf32>
    %1060 = arith.addf %1056, %1059 : vector<8x16xf32>
    %c249 = arith.constant 249 : index
    %1061 = memref.load %arg3[%c249] : memref<288xf32, #tpu.memory_space<smem>>
    %1062 = vector.broadcast %1061 : f32 to vector<8x16xf32>
    %1063 = arith.mulf %1062, %12 : vector<8x16xf32>
    %1064 = arith.addf %1060, %1063 : vector<8x16xf32>
    %c250 = arith.constant 250 : index
    %1065 = memref.load %arg3[%c250] : memref<288xf32, #tpu.memory_space<smem>>
    %1066 = vector.broadcast %1065 : f32 to vector<8x16xf32>
    %1067 = arith.mulf %1066, %13 : vector<8x16xf32>
    %1068 = arith.addf %1064, %1067 : vector<8x16xf32>
    %c251 = arith.constant 251 : index
    %1069 = memref.load %arg3[%c251] : memref<288xf32, #tpu.memory_space<smem>>
    %1070 = vector.broadcast %1069 : f32 to vector<8x16xf32>
    %1071 = arith.mulf %1070, %14 : vector<8x16xf32>
    %1072 = arith.addf %1068, %1071 : vector<8x16xf32>
    %c252 = arith.constant 252 : index
    %1073 = memref.load %arg3[%c252] : memref<288xf32, #tpu.memory_space<smem>>
    %1074 = vector.broadcast %1073 : f32 to vector<8x16xf32>
    %1075 = arith.mulf %1074, %6 : vector<8x16xf32>
    %c253 = arith.constant 253 : index
    %1076 = memref.load %arg3[%c253] : memref<288xf32, #tpu.memory_space<smem>>
    %1077 = vector.broadcast %1076 : f32 to vector<8x16xf32>
    %1078 = arith.mulf %1077, %7 : vector<8x16xf32>
    %1079 = arith.addf %1075, %1078 : vector<8x16xf32>
    %c254 = arith.constant 254 : index
    %1080 = memref.load %arg3[%c254] : memref<288xf32, #tpu.memory_space<smem>>
    %1081 = vector.broadcast %1080 : f32 to vector<8x16xf32>
    %1082 = arith.mulf %1081, %8 : vector<8x16xf32>
    %1083 = arith.addf %1079, %1082 : vector<8x16xf32>
    %c255 = arith.constant 255 : index
    %1084 = memref.load %arg3[%c255] : memref<288xf32, #tpu.memory_space<smem>>
    %1085 = vector.broadcast %1084 : f32 to vector<8x16xf32>
    %1086 = arith.mulf %1085, %9 : vector<8x16xf32>
    %1087 = arith.addf %1083, %1086 : vector<8x16xf32>
    %c256 = arith.constant 256 : index
    %1088 = memref.load %arg3[%c256] : memref<288xf32, #tpu.memory_space<smem>>
    %1089 = vector.broadcast %1088 : f32 to vector<8x16xf32>
    %1090 = arith.mulf %1089, %10 : vector<8x16xf32>
    %1091 = arith.addf %1087, %1090 : vector<8x16xf32>
    %c257 = arith.constant 257 : index
    %1092 = memref.load %arg3[%c257] : memref<288xf32, #tpu.memory_space<smem>>
    %1093 = vector.broadcast %1092 : f32 to vector<8x16xf32>
    %1094 = arith.mulf %1093, %11 : vector<8x16xf32>
    %1095 = arith.addf %1091, %1094 : vector<8x16xf32>
    %c258 = arith.constant 258 : index
    %1096 = memref.load %arg3[%c258] : memref<288xf32, #tpu.memory_space<smem>>
    %1097 = vector.broadcast %1096 : f32 to vector<8x16xf32>
    %1098 = arith.mulf %1097, %12 : vector<8x16xf32>
    %1099 = arith.addf %1095, %1098 : vector<8x16xf32>
    %c259 = arith.constant 259 : index
    %1100 = memref.load %arg3[%c259] : memref<288xf32, #tpu.memory_space<smem>>
    %1101 = vector.broadcast %1100 : f32 to vector<8x16xf32>
    %1102 = arith.mulf %1101, %13 : vector<8x16xf32>
    %1103 = arith.addf %1099, %1102 : vector<8x16xf32>
    %c260 = arith.constant 260 : index
    %1104 = memref.load %arg3[%c260] : memref<288xf32, #tpu.memory_space<smem>>
    %1105 = vector.broadcast %1104 : f32 to vector<8x16xf32>
    %1106 = arith.mulf %1105, %14 : vector<8x16xf32>
    %1107 = arith.addf %1103, %1106 : vector<8x16xf32>
    %c261 = arith.constant 261 : index
    %1108 = memref.load %arg3[%c261] : memref<288xf32, #tpu.memory_space<smem>>
    %1109 = vector.broadcast %1108 : f32 to vector<8x16xf32>
    %1110 = arith.mulf %1109, %6 : vector<8x16xf32>
    %c262 = arith.constant 262 : index
    %1111 = memref.load %arg3[%c262] : memref<288xf32, #tpu.memory_space<smem>>
    %1112 = vector.broadcast %1111 : f32 to vector<8x16xf32>
    %1113 = arith.mulf %1112, %7 : vector<8x16xf32>
    %1114 = arith.addf %1110, %1113 : vector<8x16xf32>
    %c263 = arith.constant 263 : index
    %1115 = memref.load %arg3[%c263] : memref<288xf32, #tpu.memory_space<smem>>
    %1116 = vector.broadcast %1115 : f32 to vector<8x16xf32>
    %1117 = arith.mulf %1116, %8 : vector<8x16xf32>
    %1118 = arith.addf %1114, %1117 : vector<8x16xf32>
    %c264 = arith.constant 264 : index
    %1119 = memref.load %arg3[%c264] : memref<288xf32, #tpu.memory_space<smem>>
    %1120 = vector.broadcast %1119 : f32 to vector<8x16xf32>
    %1121 = arith.mulf %1120, %9 : vector<8x16xf32>
    %1122 = arith.addf %1118, %1121 : vector<8x16xf32>
    %c265 = arith.constant 265 : index
    %1123 = memref.load %arg3[%c265] : memref<288xf32, #tpu.memory_space<smem>>
    %1124 = vector.broadcast %1123 : f32 to vector<8x16xf32>
    %1125 = arith.mulf %1124, %10 : vector<8x16xf32>
    %1126 = arith.addf %1122, %1125 : vector<8x16xf32>
    %c266 = arith.constant 266 : index
    %1127 = memref.load %arg3[%c266] : memref<288xf32, #tpu.memory_space<smem>>
    %1128 = vector.broadcast %1127 : f32 to vector<8x16xf32>
    %1129 = arith.mulf %1128, %11 : vector<8x16xf32>
    %1130 = arith.addf %1126, %1129 : vector<8x16xf32>
    %c267 = arith.constant 267 : index
    %1131 = memref.load %arg3[%c267] : memref<288xf32, #tpu.memory_space<smem>>
    %1132 = vector.broadcast %1131 : f32 to vector<8x16xf32>
    %1133 = arith.mulf %1132, %12 : vector<8x16xf32>
    %1134 = arith.addf %1130, %1133 : vector<8x16xf32>
    %c268 = arith.constant 268 : index
    %1135 = memref.load %arg3[%c268] : memref<288xf32, #tpu.memory_space<smem>>
    %1136 = vector.broadcast %1135 : f32 to vector<8x16xf32>
    %1137 = arith.mulf %1136, %13 : vector<8x16xf32>
    %1138 = arith.addf %1134, %1137 : vector<8x16xf32>
    %c269 = arith.constant 269 : index
    %1139 = memref.load %arg3[%c269] : memref<288xf32, #tpu.memory_space<smem>>
    %1140 = vector.broadcast %1139 : f32 to vector<8x16xf32>
    %1141 = arith.mulf %1140, %14 : vector<8x16xf32>
    %1142 = arith.addf %1138, %1141 : vector<8x16xf32>
    %c270 = arith.constant 270 : index
    %1143 = memref.load %arg3[%c270] : memref<288xf32, #tpu.memory_space<smem>>
    %1144 = vector.broadcast %1143 : f32 to vector<8x16xf32>
    %1145 = arith.mulf %1144, %6 : vector<8x16xf32>
    %c271 = arith.constant 271 : index
    %1146 = memref.load %arg3[%c271] : memref<288xf32, #tpu.memory_space<smem>>
    %1147 = vector.broadcast %1146 : f32 to vector<8x16xf32>
    %1148 = arith.mulf %1147, %7 : vector<8x16xf32>
    %1149 = arith.addf %1145, %1148 : vector<8x16xf32>
    %c272 = arith.constant 272 : index
    %1150 = memref.load %arg3[%c272] : memref<288xf32, #tpu.memory_space<smem>>
    %1151 = vector.broadcast %1150 : f32 to vector<8x16xf32>
    %1152 = arith.mulf %1151, %8 : vector<8x16xf32>
    %1153 = arith.addf %1149, %1152 : vector<8x16xf32>
    %c273 = arith.constant 273 : index
    %1154 = memref.load %arg3[%c273] : memref<288xf32, #tpu.memory_space<smem>>
    %1155 = vector.broadcast %1154 : f32 to vector<8x16xf32>
    %1156 = arith.mulf %1155, %9 : vector<8x16xf32>
    %1157 = arith.addf %1153, %1156 : vector<8x16xf32>
    %c274 = arith.constant 274 : index
    %1158 = memref.load %arg3[%c274] : memref<288xf32, #tpu.memory_space<smem>>
    %1159 = vector.broadcast %1158 : f32 to vector<8x16xf32>
    %1160 = arith.mulf %1159, %10 : vector<8x16xf32>
    %1161 = arith.addf %1157, %1160 : vector<8x16xf32>
    %c275 = arith.constant 275 : index
    %1162 = memref.load %arg3[%c275] : memref<288xf32, #tpu.memory_space<smem>>
    %1163 = vector.broadcast %1162 : f32 to vector<8x16xf32>
    %1164 = arith.mulf %1163, %11 : vector<8x16xf32>
    %1165 = arith.addf %1161, %1164 : vector<8x16xf32>
    %c276 = arith.constant 276 : index
    %1166 = memref.load %arg3[%c276] : memref<288xf32, #tpu.memory_space<smem>>
    %1167 = vector.broadcast %1166 : f32 to vector<8x16xf32>
    %1168 = arith.mulf %1167, %12 : vector<8x16xf32>
    %1169 = arith.addf %1165, %1168 : vector<8x16xf32>
    %c277 = arith.constant 277 : index
    %1170 = memref.load %arg3[%c277] : memref<288xf32, #tpu.memory_space<smem>>
    %1171 = vector.broadcast %1170 : f32 to vector<8x16xf32>
    %1172 = arith.mulf %1171, %13 : vector<8x16xf32>
    %1173 = arith.addf %1169, %1172 : vector<8x16xf32>
    %c278 = arith.constant 278 : index
    %1174 = memref.load %arg3[%c278] : memref<288xf32, #tpu.memory_space<smem>>
    %1175 = vector.broadcast %1174 : f32 to vector<8x16xf32>
    %1176 = arith.mulf %1175, %14 : vector<8x16xf32>
    %1177 = arith.addf %1173, %1176 : vector<8x16xf32>
    %c279 = arith.constant 279 : index
    %1178 = memref.load %arg3[%c279] : memref<288xf32, #tpu.memory_space<smem>>
    %1179 = vector.broadcast %1178 : f32 to vector<8x16xf32>
    %1180 = arith.mulf %1179, %6 : vector<8x16xf32>
    %c280 = arith.constant 280 : index
    %1181 = memref.load %arg3[%c280] : memref<288xf32, #tpu.memory_space<smem>>
    %1182 = vector.broadcast %1181 : f32 to vector<8x16xf32>
    %1183 = arith.mulf %1182, %7 : vector<8x16xf32>
    %1184 = arith.addf %1180, %1183 : vector<8x16xf32>
    %c281 = arith.constant 281 : index
    %1185 = memref.load %arg3[%c281] : memref<288xf32, #tpu.memory_space<smem>>
    %1186 = vector.broadcast %1185 : f32 to vector<8x16xf32>
    %1187 = arith.mulf %1186, %8 : vector<8x16xf32>
    %1188 = arith.addf %1184, %1187 : vector<8x16xf32>
    %c282 = arith.constant 282 : index
    %1189 = memref.load %arg3[%c282] : memref<288xf32, #tpu.memory_space<smem>>
    %1190 = vector.broadcast %1189 : f32 to vector<8x16xf32>
    %1191 = arith.mulf %1190, %9 : vector<8x16xf32>
    %1192 = arith.addf %1188, %1191 : vector<8x16xf32>
    %c283 = arith.constant 283 : index
    %1193 = memref.load %arg3[%c283] : memref<288xf32, #tpu.memory_space<smem>>
    %1194 = vector.broadcast %1193 : f32 to vector<8x16xf32>
    %1195 = arith.mulf %1194, %10 : vector<8x16xf32>
    %1196 = arith.addf %1192, %1195 : vector<8x16xf32>
    %c284 = arith.constant 284 : index
    %1197 = memref.load %arg3[%c284] : memref<288xf32, #tpu.memory_space<smem>>
    %1198 = vector.broadcast %1197 : f32 to vector<8x16xf32>
    %1199 = arith.mulf %1198, %11 : vector<8x16xf32>
    %1200 = arith.addf %1196, %1199 : vector<8x16xf32>
    %c285 = arith.constant 285 : index
    %1201 = memref.load %arg3[%c285] : memref<288xf32, #tpu.memory_space<smem>>
    %1202 = vector.broadcast %1201 : f32 to vector<8x16xf32>
    %1203 = arith.mulf %1202, %12 : vector<8x16xf32>
    %1204 = arith.addf %1200, %1203 : vector<8x16xf32>
    %c286 = arith.constant 286 : index
    %1205 = memref.load %arg3[%c286] : memref<288xf32, #tpu.memory_space<smem>>
    %1206 = vector.broadcast %1205 : f32 to vector<8x16xf32>
    %1207 = arith.mulf %1206, %13 : vector<8x16xf32>
    %1208 = arith.addf %1204, %1207 : vector<8x16xf32>
    %c287 = arith.constant 287 : index
    %1209 = memref.load %arg3[%c287] : memref<288xf32, #tpu.memory_space<smem>>
    %1210 = vector.broadcast %1209 : f32 to vector<8x16xf32>
    %1211 = arith.mulf %1210, %14 : vector<8x16xf32>
    %1212 = arith.addf %1208, %1211 : vector<8x16xf32>
    %1213 = arith.maximumf %1107, %1142 : vector<8x16xf32>
    %1214 = arith.maximumf %1213, %1177 : vector<8x16xf32>
    %1215 = arith.maximumf %1214, %1212 : vector<8x16xf32>
    %1216 = arith.subf %1107, %1215 : vector<8x16xf32>
    %1217 = math.exp %1216 : vector<8x16xf32>
    %1218 = arith.subf %1142, %1215 : vector<8x16xf32>
    %1219 = math.exp %1218 : vector<8x16xf32>
    %1220 = arith.subf %1177, %1215 : vector<8x16xf32>
    %1221 = math.exp %1220 : vector<8x16xf32>
    %1222 = arith.subf %1212, %1215 : vector<8x16xf32>
    %1223 = math.exp %1222 : vector<8x16xf32>
    %1224 = arith.mulf %967, %1217 : vector<8x16xf32>
    %1225 = arith.addf %1217, %1219 : vector<8x16xf32>
    %1226 = arith.mulf %1002, %1219 : vector<8x16xf32>
    %1227 = arith.addf %1224, %1226 : vector<8x16xf32>
    %1228 = arith.addf %1225, %1221 : vector<8x16xf32>
    %1229 = arith.mulf %1037, %1221 : vector<8x16xf32>
    %1230 = arith.addf %1227, %1229 : vector<8x16xf32>
    %1231 = arith.addf %1228, %1223 : vector<8x16xf32>
    %1232 = arith.mulf %1072, %1223 : vector<8x16xf32>
    %1233 = arith.addf %1230, %1232 : vector<8x16xf32>
    %1234 = tpu.reciprocal %1231 {approx = true} : vector<8x16xf32> -> vector<8x16xf32>
    %1235 = arith.mulf %1233, %1234 : vector<8x16xf32>
    %c0_31 = arith.constant 0 : index
    %c3_32 = arith.constant 3 : index
    %c0_33 = arith.constant 0 : index
    %c0_34 = arith.constant 0 : index
    %1236 = vector.load %arg4[%c0_31, %c3_32, %c0_33, %c0_34] : memref<1x4x8x16xf32, #tpu.memory_space<vmem>>, vector<1x1x8x16xf32>
    %1237 = vector.shape_cast %1236 : vector<1x1x8x16xf32> to vector<8x16xf32>
    %1238 = vector.shape_cast %1235 : vector<8x16xf32> to vector<1x1x8x16xf32>
    tpu.vector_store %arg4[%c0_31, %c3_32, %c0_33, %c0_34], %1238 {strides = array<i32>} : memref<1x4x8x16xf32, #tpu.memory_space<vmem>>, vector<1x1x8x16xf32>,
    return
  }
  func.func @transform_1(%arg0: i32, %arg1: i32) -> i32 {
    %c0_i32 = arith.constant 0 : i32
    %c0_i32_0 = arith.constant 0 : i32
    return %c0_i32 : i32
  }
  func.func @transform_2(%arg0: i32, %arg1: i32) -> (i32, i32, i32, i32) {
    %c0_i32 = arith.constant 0 : i32
    %c0_i32_0 = arith.constant 0 : i32
    %c0_i32_1 = arith.constant 0 : i32
    return %arg0, %c0_i32, %arg1, %c0_i32_0 : i32, i32, i32, i32
  }
}

</mosaic_0001>

<bundles_post_ra>
// kernel: tpu_custom_call.1
= control target key start
LH: loop header
LB: loop body
LE: loop exit
PB: predicated region body
PF: predicated region fallthrough
CT: control target
= control target key end

     0   :  { %s4438_s0 = inlined_call_operand.vmem [shape: f32[2,18,18], index: 0, kind: input, shape index: {}]   ;;  %s4439_s1 = inlined_call_operand.vmem [shape: f32[288], index: 1, kind: input, shape index: {}]   ;;  %s4440_s2 = inlined_call_operand.hbm [shape: f32[2,4,16,16], index: 2, kind: output, shape index: {}]  }
   0x1   :  { %4448 = sst [smem:[#allocation14_spill]] %s4438_s0 }
   0x2   :  { %4449 = sst [smem:[#allocation15_spill]] %s4439_s1 }
   0x3   :  { %7 = vsyncpa [#allocation6], 0 }
   0x4   :  { %8 = vsyncpa [#allocation5], 0 }
   0x5   :  { %10 = vsyncpa [#allocation5 + $0x1], 0  ;;  %s2885_s9 = smov 0   ;;  %s2887_s10 = smov 0  }
   0x6   :  { %s2889_s11 = smov 0   ;;  %s2891_s12 = smov 0  }
   0x7   :  { %s2893_s13 = smov 0   ;;  %s2895_s14 = smov 0  }
   0x8   :  { %s2897_s15 = smov 0   ;;  %s2899_s16 = smov 0  }
   0x9 LB: > { %s2306_s17 = sadd.s32 4294967295, %s2861_s16   ;;  %s2307_s18 = sadd.s32 4294967294, %s2861_s16   ;;  %s2861_s16 = sphi %s2899_s16, %s16_s16   ;;  %s2857_s15 = sphi %s2897_s15, %s4470_s15   ;;  %s2853_s14 = sphi %s2895_s14, %s4469_s14   ;;  %s2849_s13 = sphi %s2893_s13, %s4468_s13   ;;  %s2845_s12 = sphi %s2891_s12, %s4467_s12   ;;  %s2841_s11 = sphi %s2889_s11, %s4466_s11   ;;  %s2837_s10 = sphi %s2887_s10, %s4465_s10   ;;  %s2833_s9 = sphi %s2885_s9, %s4464_s9  }
   0xa   : > { %s25_s19 = sadd.s32 1, %s2853_s14  ;;  %s28_s20 = sadd.s32 1, %s2857_s15 }
   0xb   : > { %p26_p0 = scmp.ge.s32.totalorder %s25_s19, 2  ;;  %s58_s21 = sadd.s32 1, %s2841_s11 }
   0xc   : > { %p68_p1 = scmp.ne.s32.totalorder %s2841_s11, %s2837_s10  ;;  %p69_p2 = scmp.eq.s32.totalorder %s2306_s17, 3 }
   0xd   : > { %s4472_s19 = smov (%p26_p0, %s25_s19), 0  ;;  %s4474_s20 = smov (!%p26_p0, %s28_s20), %s2857_s15 }
   0xe   : > { %4450 = sst [smem:[#allocation12_spill]] %s4472_s19  ;;  %s54_s22 = ssub.s32 %s2853_s14, %s4472_s19 }
   0xf   : > { %p2937_p3 = por %p69_p2, %p68_p1  ;;  %p30_p4 = scmp.ge.s32.totalorder %s4474_s20, 2 }
  0x10   : > { %p74_p5 = scmp.ne.s32.totalorder %s2837_s10, %s2833_s9  ;;  %p75_p6 = scmp.eq.s32.totalorder %s2307_s18, 3 }
  0x11   : > { %p2308_p7 = scmp.ge.s32.totalorder %s2861_s16, 1  ;;  %s4476_s20 = smov (%p30_p4, %s4474_s20), 0 }
  0x12   : > { %4452 = sst [smem:[#allocation13_spill]] %s4476_s20  ;;  %p2946_p8 = por %p75_p6, %p74_p5 }
  0x13   : > { %p82_p9 = scmp.lt.s32.totalorder %s2861_s16, 5  ;;  %s53_s25 = ssub.s32 %s2857_s15, %s4476_s20 }
  0x14   : > { %s4453_s24 = scalar_select %p2946_p8, 1, 0 }
  0x15   : > { %s55_s26 = sor.u32 %s54_s22, %s53_s25  ;;  %p2953_p10 = pnand %p2308_p7, %p82_p9 }
  0x16   : > { %p56_p11 = scmp.eq.s32.totalorder %s55_s26, 0  ;;  %p2957_p12 = scmp.eq.s32.totalorder %s2306_s17, 0 }
  0x17   : > { %p2617_p13 = pneg %p2953_p10  ;;  %s4456_s1 = sld [smem:[#allocation15_spill]] }
  0x18   : > { %s2967_s4 = scalar_select %p56_p11, %s2841_s11, %s58_s21  }
  0x19   : > { %p2618_p0 = pnand %p2957_p12, %p2617_p13 }
  0x1b   : > { %p2748_p2 = pneg %p2618_p0 }
  0x1d   : > { %s95_s3 = sshll.u32 %s4456_s1, 4  ;;  %s96_s3 = int_to_ptr.vmem [resolvable:$true] %s95_s3 }
  0x1e   : > { %s2746_s5 = scalar_lea.vmem %s96_s3, 48  ;;  %s2753_s6 = scalar_lea.vmem %s96_s3, 64 }
  0x1f   : > { %p2747_p1 = scmp.ne.s32.totalorder %s96_s3, %s2746_s5  ;;  %p2754_p6 = scmp.lt.s32.totalorder %s96_s3, %s96_s3 }
  0x20   : > { %p2755_p7 = scmp.lt.s32.totalorder %s2753_s6, %s2746_s5 }
  0x21   : > { %p2749_p4 = pnand %p2748_p2, %p2747_p1 }
  0x22   : > { %p2756_p9 = por %p2755_p7, %p2754_p6 }
  0x23   : > { %p2750_p5 = pneg %p2749_p4 }
  0x25   : > { %p2757_p8 = pnand %p2756_p9, %p2750_p5 }
  0x27   : > { %2760 = shalt.err (!%p2757_p8)
}
  0x28   : > { %s2863_s7 = smov [#allocation4]   ;;  %108 = sbr.rel (%p2953_p10) target bundleno = 593 (0x251), region = 24 }
  0x29   : > { %2620 = dma.vmem_to_smem (!%p2618_p0), %s96_s3, 48, %s2863_s7, [#allocation6]  }
  0x2f   : > { %2822 = dma.done.wait (%p2957_p12), [#allocation6], 48  }
  0x30   : > { %2824 = vsyncadd (%p2957_p12), [#allocation6], 4294967248 }
  0x31   : > { %114 = sfence }
  0x32   : > { %s4441_s8 = sand.u32 1, %s2837_s10   ;;  %s2313_s17 = sshll.u32 %s2845_s12, 3 }
  0x33   : > { %s2312_s18 = sshll.u32 %s4441_s8, 5  ;;  %s125_s21 = smul.u32 24, %s2849_s13 }
  0x34   : > { %s4457_s0 = sld [smem:[#allocation14_spill]]  ;;  %s2985_s28 = scalar_lea.vmem [#allocation7], %s2312_s18 }
  0x35   : > { %s126_s22 = sadd.s32 %s2313_s17, %s125_s21 }
  0x3a   : > { %s127_s27 = scalar_lea.vmem %s4457_s0, %s126_s22 }
  0x3b   : > { %v165_v0 = vld [vmem:[%s127_s27] sm:$0xff]  ;;  %v2314_v1 = vld [vmem:[%s127_s27 + $0x8] sm:$0x3] }
  0x3c   : > { %166 = vst [vmem:[#allocation2] sm:$0xff] %v165_v0  ;;  %177 = vst [vmem:[#allocation2 + $0x8] sm:$0x3] %v2314_v1 }
  0x3d   : > { %181 = vsyncadd [#allocation3], 160 }
  0x3e   : > { %2825 = dma.done.wait [#allocation3], 160 }
  0x3f   : > { %2826 = vsyncadd [#allocation3], 4294967136  ;;  %s2318_s29 = sld [smem:[#allocation4 + $0x4]]  ;;  %s2315_s30 = sld [smem:[#allocation4 + $0x1]]  ;;  %vm687_vm0 = vcmask 130048  }
  0x40   : > { %s2319_s3 = sld [smem:[#allocation4 + $0x5]]  ;;  %s2316_s5 = sld [smem:[#allocation4 + $0x2]] }
  0x41   : > { %s2322_s6 = sld [smem:[#allocation4 + $0x8]]  ;;  %s2321_s7 = sld [smem:[#allocation4 + $0x7]] }
  0x42   : > { %s2325_s17 = sld [smem:[#allocation4 + $0xb]]  ;;  %s2324_s21 = sld [smem:[#allocation4 + $0xa]] }
  0x43   : > { %v2987_v2 = vld [vmem:[#allocation2 + $0x1] sm:$0xff]  ;;  %s4442_s18 = smov 127   ;;  %s2328_s22 = sld [smem:[#allocation4 + $0xe]] }
  0x44   : > { %v2989_v4 = vld [vmem:[#allocation2] sm:$0xff]  ;;  %s2327_s25 = sld [smem:[#allocation4 + $0xd]]  ;;  %s4445_s26 = smov 126  }
  0x45   : > { %v212_v3 = vstv %s2318_s29  ;;  %v192_v5 = vstv %s2315_s30  ;;  %v2997_v12 = vld [vmem:[#allocation2 + $0x2] sm:$0xff]  ;;  %s2331_s27 = sld [smem:[#allocation4 + $0x11]]  ;;  %s2330_s29 = sld [smem:[#allocation4 + $0x10]] }
  0x46   : > { %v213_v6 = vmul.f32 %v212_v3, %v2987_v2  ;;  %v193_v7 = vmul.f32 %v192_v5, %v2989_v4  ;;  %v220_v8 = vstv %s2319_s3  ;;  %v200_v9 = vstv %s2316_s5  ;;  %s2334_s30 = sld [smem:[#allocation4 + $0x14]]  ;;  %s2333_s3 = sld [smem:[#allocation4 + $0x13]] }
  0x47   : > { %v221_v10 = vmul.f32 %v220_v8, %v2987_v2  ;;  %v201_v11 = vmul.f32 %v200_v9, %v2989_v4  ;;  %v240_v13 = vstv %s2322_s6  ;;  %v232_v14 = vstv %s2321_s7  ;;  %s2337_s5 = sld [smem:[#allocation4 + $0x17]]  ;;  %s2336_s6 = sld [smem:[#allocation4 + $0x16]] }
  0x48   : > { %215 = vrot.lane.b32.xlu1 %v213_v6, %s4442_s18  ;;  %195 = vrot.lane.b32.xlu0 %v193_v7, %s4442_s18  ;;  %v241_v15 = vmul.f32 %v240_v13, %v2997_v12  ;;  %v233_v16 = vmul.f32 %v232_v14, %v2997_v12  ;;  %v259_v17 = vstv %s2325_s17  ;;  %v251_v18 = vstv %s2324_s21  ;;  %s2340_s7 = sld [smem:[#allocation4 + $0x1a]]  ;;  %s2339_s17 = sld [smem:[#allocation4 + $0x19]] }
  0x49   : > { %v260_v19 = vmul.f32 %v259_v17, %v2989_v4  ;;  %v252_v20 = vmul.f32 %v251_v18, %v2989_v4  ;;  %v279_v21 = vstv %s2328_s22  ;;  %s2343_s21 = sld [smem:[#allocation4 + $0x1d]]  ;;  %s2342_s22 = sld [smem:[#allocation4 + $0x1c]] }
  0x4a   : > { %v271_v22 = vstv %s2327_s25  ;;  %v280_v23 = vmul.f32 %v279_v21, %v2987_v2  ;;  %s2346_s25 = sld [smem:[#allocation4 + $0x20]]  ;;  %s3338_s0 = sld [smem:[#allocation4 + $0x9e]] }
  0x4b   : > { %v272_v24 = vmul.f32 %v271_v22, %v2987_v2  ;;  %v299_v25 = vstv %s2331_s27  ;;  %v291_v26 = vstv %s2330_s29  ;;  %s2345_s27 = sld [smem:[#allocation4 + $0x1f]]  ;;  %s2349_s29 = sld [smem:[#allocation4 + $0x23]] }
  0x4c   : > { %223 = vrot.lane.b32.xlu1 %v221_v10, %s4445_s26  ;;  %203 = vrot.lane.b32.xlu0 %v201_v11, %s4445_s26  ;;  %v300_v27 = vmul.f32 %v299_v25, %v2997_v12  ;;  %v292_v28 = vmul.f32 %v291_v26, %v2997_v12  ;;  %v318_v29 = vstv %s2334_s30  ;;  %v310_v30 = vstv %s2333_s3  ;;  %s2348_s30 = sld [smem:[#allocation4 + $0x22]]  ;;  %s2352_s3 = sld [smem:[#allocation4 + $0x26]] }
  0x4d   : > { %v319_v31 = vmul.f32 %v318_v29, %v2989_v4  ;;  %v311_v32 = vmul.f32 %v310_v30, %v2989_v4  ;;  %v338_v33 = vstv %s2337_s5  ;;  %v330_v34 = vstv %s2336_s6  ;;  %s2351_s5 = sld [smem:[#allocation4 + $0x25]]  ;;  %s2355_s6 = sld [smem:[#allocation4 + $0x29]] }
  0x4e   : > { %v339_v35 = vmul.f32 %v338_v33, %v2987_v2  ;;  %v331_v36 = vmul.f32 %v330_v34, %v2987_v2  ;;  %v358_v37 = vstv %s2340_s7  ;;  %v350_v38 = vstv %s2339_s17  ;;  %s2354_s7 = sld [smem:[#allocation4 + $0x28]]  ;;  %s2358_s17 = sld [smem:[#allocation4 + $0x2c]] }
  0x4f   : > { %v359_v39 = vmul.f32 %v358_v37, %v2997_v12  ;;  %v351_v40 = vmul.f32 %v350_v38, %v2997_v12  ;;  %v377_v41 = vstv %s2343_s21  ;;  %v369_v42 = vstv %s2342_s22  ;;  %s2357_s21 = sld [smem:[#allocation4 + $0x2b]]  ;;  %s2361_s22 = sld [smem:[#allocation4 + $0x2f]] }
  0x50   : > { %243 = vrot.lane.b32.xlu1 %v241_v15, %s4445_s26  ;;  %235 = vrot.lane.b32.xlu0 %v233_v16, %s4442_s18  ;;  %v378_v43 = vmul.f32 %v377_v41, %v2989_v4  ;;  %v370_v44 = vmul.f32 %v369_v42, %v2989_v4  ;;  %v397_v45 = vstv %s2346_s25  ;;  %s2360_s25 = sld [smem:[#allocation4 + $0x2e]]  ;;  %s3324_s8 = sld [smem:[#allocation4]] }
  0x51   : > { %v389_v46 = vstv %s2345_s27  ;;  %v398_v47 = vmul.f32 %v397_v45, %v2987_v2  ;;  %v417_v49 = vstv %s2349_s29  ;;  %s2364_s27 = sld [smem:[#allocation4 + $0x32]]  ;;  %s2363_s29 = sld [smem:[#allocation4 + $0x31]] }
  0x52   : > { %v390_v48 = vmul.f32 %v389_v46, %v2987_v2  ;;  %v409_v50 = vstv %s2348_s30  ;;  %v418_v51 = vmul.f32 %v417_v49, %v2997_v12  ;;  %v436_v53 = vstv %s2352_s3  ;;  %s2367_s30 = sld [smem:[#allocation4 + $0x35]]  ;;  %s2366_s3 = sld [smem:[#allocation4 + $0x34]] }
  0x53   : > { %v410_v52 = vmul.f32 %v409_v50, %v2997_v12  ;;  %v428_v54 = vstv %s2351_s5  ;;  %v437_v55 = vmul.f32 %v436_v53, %v2989_v4  ;;  %v456_v57 = vstv %s2355_s6  ;;  %s2370_s5 = sld [smem:[#allocation4 + $0x38]]  ;;  %s2369_s6 = sld [smem:[#allocation4 + $0x37]] }
  0x54   : > { %262 = vrot.lane.b32.xlu1 %v260_v19, %s4445_s26  ;;  %254 = vrot.lane.b32.xlu0 %v252_v20, %s4442_s18  ;;  %v429_v56 = vmul.f32 %v428_v54, %v2989_v4  ;;  %v448_v58 = vstv %s2354_s7  ;;  %v457_v59 = vmul.f32 %v456_v57, %v2987_v2  ;;  %v476_v61 = vstv %s2358_s17  ;;  %s2373_s7 = sld [smem:[#allocation4 + $0x3b]]  ;;  %s2372_s17 = sld [smem:[#allocation4 + $0x3a]] }
  0x55   : > { %v449_v60 = vmul.f32 %v448_v58, %v2987_v2  ;;  %v468_v62 = vstv %s2357_s21  ;;  %v477_v63 = vmul.f32 %v476_v61, %v2997_v12  ;;  %v495_v1 = vstv %s2361_s22  ;;  %s2376_s21 = sld [smem:[#allocation4 + $0x3e]]  ;;  %s2375_s22 = sld [smem:[#allocation4 + $0x3d]] }
  0x56   : > { %v469_v0 = vmul.f32 %v468_v62, %v2997_v12  ;;  %v487_v3 = vstv %s2360_s25  ;;  %v496_v5 = vmul.f32 %v495_v1, %v2989_v4  ;;  %s2379_s25 = sld [smem:[#allocation4 + $0x41]]  ;;  %s3748_s20 = sld [smem:[#allocation4 + $0x112]] }
  0x57   : > { %v488_v6 = vmul.f32 %v487_v3, %v2989_v4  ;;  %v515_v7 = vstv %s2364_s27  ;;  %v507_v8 = vstv %s2363_s29  ;;  %s2378_s27 = sld [smem:[#allocation4 + $0x40]]  ;;  %s2382_s29 = sld [smem:[#allocation4 + $0x44]] }
  0x58   : > { %282 = vrot.lane.b32.xlu1 %v280_v23, %s4445_s26  ;;  %274 = vrot.lane.b32.xlu0 %v272_v24, %s4442_s18  ;;  %v516_v9 = vmul.f32 %v515_v7, %v2987_v2  ;;  %v508_v10 = vmul.f32 %v507_v8, %v2987_v2  ;;  %v535_v11 = vstv %s2367_s30  ;;  %v527_v13 = vstv %s2366_s3  ;;  %s2381_s30 = sld [smem:[#allocation4 + $0x43]]  ;;  %s2385_s3 = sld [smem:[#allocation4 + $0x47]] }
  0x59   : > { %v536_v14 = vmul.f32 %v535_v11, %v2997_v12  ;;  %v528_v15 = vmul.f32 %v527_v13, %v2997_v12  ;;  %v554_v16 = vstv %s2370_s5  ;;  %v546_v17 = vstv %s2369_s6  ;;  %s2384_s5 = sld [smem:[#allocation4 + $0x46]]  ;;  %s2388_s6 = sld [smem:[#allocation4 + $0x4a]] }
  0x5a   : > { %v555_v18 = vmul.f32 %v554_v16, %v2989_v4  ;;  %v547_v19 = vmul.f32 %v546_v17, %v2989_v4  ;;  %v574_v20 = vstv %s2373_s7  ;;  %v566_v21 = vstv %s2372_s17  ;;  %s2387_s7 = sld [smem:[#allocation4 + $0x49]]  ;;  %s2391_s17 = sld [smem:[#allocation4 + $0x4d]] }
  0x5b   : > { %v575_v22 = vmul.f32 %v574_v20, %v2987_v2  ;;  %v567_v23 = vmul.f32 %v566_v21, %v2987_v2  ;;  %v594_v24 = vstv %s2376_s21  ;;  %v586_v25 = vstv %s2375_s22  ;;  %s2390_s21 = sld [smem:[#allocation4 + $0x4c]]  ;;  %s2394_s22 = sld [smem:[#allocation4 + $0x50]] }
  0x5c   : > { %302 = vrot.lane.b32.xlu1 %v300_v27, %s4445_s26  ;;  %294 = vrot.lane.b32.xlu0 %v292_v28, %s4442_s18  ;;  %v595_v26 = vmul.f32 %v594_v24, %v2997_v12  ;;  %v587_v27 = vmul.f32 %v586_v25, %v2997_v12  ;;  %v613_v28 = vstv %s2379_s25  ;;  %s2393_s25 = sld [smem:[#allocation4 + $0x4f]]  ;;  %s3720_s1 = sld [smem:[#allocation4 + $0x51]] }
  0x5d   : > { %v605_v29 = vstv %s2378_s27  ;;  %v614_v30 = vmul.f32 %v613_v28, %v2989_v4  ;;  %s2397_s27 = sld [smem:[#allocation4 + $0x53]]  ;;  %s3754_s19 = sld [smem:[#allocation4 + $0x57]] }
  0x5e   : > { %v625_v33 = vstv %s2381_s30  ;;  %s2400_s30 = sld [smem:[#allocation4 + $0x56]] }
  0x5f   : > { %v645_v37 = vstv %s2384_s5  ;;  %s2403_s5 = sld [smem:[#allocation4 + $0x59]] }
  0x60   : > { %321 = vrot.lane.b32.xlu1 %v319_v31, %s4445_s26  ;;  %313 = vrot.lane.b32.xlu0 %v311_v32, %s4442_s18  ;;  %v606_v31 = vmul.f32 %v605_v29, %v2989_v4  ;;  %v633_v32 = vstv %s2382_s29  ;;  %v693_v41 = vstv %s2387_s7  ;;  %s2396_s29 = sld [smem:[#allocation4 + $0x52]]  ;;  %s2406_s7 = sld [smem:[#allocation4 + $0x5c]] }
  0x61   : > { %v634_v34 = vmul.f32 %v633_v32, %v2987_v2  ;;  %v713_v45 = vstv %s2390_s21  ;;  %s2409_s21 = sld [smem:[#allocation4 + $0x5f]] }
  0x62   : > { %v733_v49 = vstv %s2393_s25  ;;  %s2412_s25 = sld [smem:[#allocation4 + $0x62]] }
  0x64   : > { %341 = vrot.lane.b32.xlu1 %v339_v35, %s4445_s26  ;;  %333 = vrot.lane.b32.xlu0 %v331_v36, %s4442_s18  ;;  %v626_v35 = vmul.f32 %v625_v33, %v2987_v2  ;;  %v653_v36 = vstv %s2385_s3  ;;  %s2399_s3 = sld [smem:[#allocation4 + $0x55]] }
  0x65   : > { %v654_v38 = vmul.f32 %v653_v36, %v2997_v12 }
  0x66   : > { %v752_v53 = vstv %s2396_s29  ;;  %s2415_s29 = sld [smem:[#allocation4 + $0x65]] }
  0x67   : > { %v839_v8 = vstv %s2409_s21  ;;  %s2423_s21 = sld [smem:[#allocation4 + $0x6d]] }
  0x68   : > { %361 = vrot.lane.b32.xlu1 %v359_v39, %s4445_s26  ;;  %353 = vrot.lane.b32.xlu0 %v351_v40, %s4442_s18  ;;  %v646_v39 = vmul.f32 %v645_v37, %v2997_v12  ;;  %v701_v40 = vstv %s2388_s6  ;;  %s2402_s6 = sld [smem:[#allocation4 + $0x58]]  ;;  %v840_v13 = vmul.f32 %v839_v8, %v2987_v2 }
  0x69   : > { %v702_v42 = vmul.f32 %v701_v40, %v2989_v4 }
  0x6a   : > { %v772_v57 = vstv %s2399_s3  ;;  %s2418_s3 = sld [smem:[#allocation4 + $0x68]] }
  0x6c   : > { %380 = vrot.lane.b32.xlu1 %v378_v43, %s4445_s26  ;;  %372 = vrot.lane.b32.xlu0 %v370_v44, %s4442_s18  ;;  %v694_v43 = vmul.f32 %v693_v41, %v2989_v4  ;;  %v721_v44 = vstv %s2391_s17  ;;  %s2405_s17 = sld [smem:[#allocation4 + $0x5b]]  ;;  %v878_v21 = vstv %s2415_s29 }
  0x6d   : > { %v722_v46 = vmul.f32 %v721_v44, %v2987_v2  ;;  %v879_v25 = vmul.f32 %v878_v21, %v2989_v4  ;;  %v929_v40 = vstv %s2423_s21  ;;  %s2429_s29 = sld [smem:[#allocation4 + $0x73]]  ;;  %s2442_s21 = sld [smem:[#allocation4 + $0x80]] }
  0x6e   : > { %v792_v61 = vstv %s2402_s6  ;;  %s2421_s6 = sld [smem:[#allocation4 + $0x6b]]  ;;  %v930_v44 = vmul.f32 %v929_v40, %v2989_v4 }
  0x70   : > { %400 = vrot.lane.b32.xlu1 %v398_v47, %s4445_s26  ;;  %392 = vrot.lane.b32.xlu0 %v390_v48, %s4442_s18  ;;  %v714_v47 = vmul.f32 %v713_v45, %v2987_v2  ;;  %v741_v48 = vstv %s2394_s22  ;;  %s2408_s22 = sld [smem:[#allocation4 + $0x5e]] }
  0x71   : > { %v742_v50 = vmul.f32 %v741_v48, %v2997_v12 }
  0x72   : > { %v811_v1 = vstv %s2405_s17  ;;  %s2424_s17 = sld [smem:[#allocation4 + $0x6e]] }
  0x73   : > { %v812_v7 = vmul.f32 %v811_v1, %v2989_v4 }
  0x74   : > { %420 = vrot.lane.b32.xlu1 %v418_v51, %s4445_s26  ;;  %412 = vrot.lane.b32.xlu0 %v410_v52, %s4442_s18  ;;  %v734_v51 = vmul.f32 %v733_v49, %v2997_v12  ;;  %v760_v52 = vstv %s2397_s27  ;;  %s2411_s27 = sld [smem:[#allocation4 + $0x61]]  ;;  %v918_v33 = vstv %s2421_s6 }
  0x75   : > { %v761_v54 = vmul.f32 %v760_v52, %v2989_v4  ;;  %v919_v37 = vmul.f32 %v918_v33, %v2997_v12  ;;  %v969_v52 = vstv %s2429_s29  ;;  %s2435_s6 = sld [smem:[#allocation4 + $0x79]]  ;;  %s2448_s29 = sld [smem:[#allocation4 + $0x86]] }
  0x78   : > { %439 = vrot.lane.b32.xlu1 %v437_v55, %s4445_s26  ;;  %431 = vrot.lane.b32.xlu0 %v429_v56, %s4442_s18  ;;  %v753_v55 = vmul.f32 %v752_v53, %v2989_v4  ;;  %v780_v56 = vstv %s2400_s30  ;;  %s2414_s30 = sld [smem:[#allocation4 + $0x64]] }
  0x79   : > { %v781_v58 = vmul.f32 %v780_v56, %v2987_v2  ;;  %v970_v56 = vmul.f32 %v969_v52, %v2997_v12 }
  0x7a   : > { %v851_v16 = vstv %s2411_s27  ;;  %s2430_s27 = sld [smem:[#allocation4 + $0x74]] }
  0x7b   : > { %v852_v20 = vmul.f32 %v851_v16, %v2997_v12 }
  0x7c   : > { %459 = vrot.lane.b32.xlu1 %v457_v59, %s4445_s26  ;;  %451 = vrot.lane.b32.xlu0 %v449_v60, %s4442_s18  ;;  %v773_v59 = vmul.f32 %v772_v57, %v2987_v2  ;;  %v800_v60 = vstv %s2403_s5  ;;  %s2417_s5 = sld [smem:[#allocation4 + $0x67]] }
  0x7d   : > { %v801_v62 = vmul.f32 %v800_v60, %v2997_v12 }
  0x80   : > { %479 = vrot.lane.b32.xlu1 %v477_v63, %s4445_s26  ;;  %471 = vrot.lane.b32.xlu0 %v469_v0, %s4442_s18  ;;  %v793_v63 = vmul.f32 %v792_v61, %v2997_v12  ;;  %v819_v0 = vstv %s2406_s7  ;;  %s2420_s7 = sld [smem:[#allocation4 + $0x6a]] }
  0x82   : > { %v890_v28 = vstv %s2417_s5  ;;  %s2436_s5 = sld [smem:[#allocation4 + $0x7a]] }
  0x83   : > { %v891_v32 = vmul.f32 %v890_v28, %v2987_v2 }
  0x84   : > { %498 = vrot.lane.b32.xlu1 %v496_v5, %s4445_s26  ;;  %490 = vrot.lane.b32.xlu0 %v488_v6, %s4442_s18  ;;  %v820_v6 = vmul.f32 %v819_v0, %v2989_v4  ;;  %v1008_v0 = vstv %s2435_s6  ;;  %s3217_s6 = sld [smem:[#allocation4 + $0x88]] }
  0x85   : > { %v1009_v8 = vmul.f32 %v1008_v0, %v2987_v2 }
  0x88   : > { %518 = vrot.lane.b32.xlu1 %v516_v9, %s4445_s26  ;;  %510 = vrot.lane.b32.xlu0 %v508_v10, %s4442_s18  ;;  %v831_v9 = vstv %s2408_s22  ;;  %s2427_s22 = sld [smem:[#allocation4 + $0x71]] }
  0x8c   : > { %538 = vrot.lane.b32.xlu1 %v536_v14, %s4445_s26  ;;  %530 = vrot.lane.b32.xlu0 %v528_v15, %s4442_s18  ;;  %v832_v14 = vmul.f32 %v831_v9, %v2987_v2  ;;  %v859_v15 = vstv %s2412_s25  ;;  %s2426_s25 = sld [smem:[#allocation4 + $0x70]] }
  0x8e   : > { %v957_v45 = vstv %s2427_s22  ;;  %s2441_s22 = sld [smem:[#allocation4 + $0x7f]] }
  0x8f   : > { %v958_v49 = vmul.f32 %v957_v45, %v2987_v2 }
  0x90   : > { %557 = vrot.lane.b32.xlu1 %v555_v18, %s4445_s26  ;;  %549 = vrot.lane.b32.xlu0 %v547_v19, %s4442_s18  ;;  %v860_v19 = vmul.f32 %v859_v15, %v2997_v12 }
  0x94   : > { %577 = vrot.lane.b32.xlu1 %v575_v22, %s4445_s26  ;;  %569 = vrot.lane.b32.xlu0 %v567_v23, %s4442_s18  ;;  %v870_v22 = vstv %s2414_s30  ;;  %s2433_s30 = sld [smem:[#allocation4 + $0x77]]  ;;  %v1047_v21 = vstv %s2441_s22  ;;  %s3242_s22 = sld [smem:[#allocation4 + $0x30]] }
  0x98   : > { %597 = vrot.lane.b32.xlu1 %v595_v26, %s4445_s26  ;;  %589 = vrot.lane.b32.xlu0 %v587_v27, %s4442_s18  ;;  %v871_v26 = vmul.f32 %v870_v22, %v2989_v4  ;;  %v898_v27 = vstv %s2418_s3  ;;  %s2432_s3 = sld [smem:[#allocation4 + $0x76]] }
  0x9a   : > { %v996_v57 = vstv %s2433_s30  ;;  %s2447_s30 = sld [smem:[#allocation4 + $0x85]] }
  0x9b   : > { %v997_v61 = vmul.f32 %v996_v57, %v2989_v4 }
  0x9c   : > { %616 = vrot.lane.b32.xlu1 %v614_v30, %s4445_s26  ;;  %608 = vrot.lane.b32.xlu0 %v606_v31, %s4442_s18  ;;  %v899_v31 = vmul.f32 %v898_v27, %v2987_v2  ;;  %v1048_v27 = vmul.f32 %v1047_v21, %v2989_v4 }
  0xa0   : > { %636 = vrot.lane.b32.xlu1 %v634_v34, %s4445_s26  ;;  %628 = vrot.lane.b32.xlu0 %v626_v35, %s4442_s18  ;;  %v910_v34 = vstv %s2420_s7  ;;  %s2439_s7 = sld [smem:[#allocation4 + $0x7d]] }
  0xa4   : > { %656 = vrot.lane.b32.xlu1 %v654_v38, %s4445_s26  ;;  %648 = vrot.lane.b32.xlu0 %v646_v39, %s4442_s18  ;;  %v911_v38 = vmul.f32 %v910_v34, %v2997_v12  ;;  %v937_v39 = vstv %s2424_s17  ;;  %s2438_s17 = sld [smem:[#allocation4 + $0x7c]] }
  0xa6   : > { %v1036_v9 = vstv %s2439_s7  ;;  %s3219_s7 = sld [smem:[#allocation4 + $0x24]] }
  0xa7   : > { %v1037_v16 = vmul.f32 %v1036_v9, %v2997_v12  ;;  %v503_v9 = vstv %s3242_s22  ;;  %s3291_s22 = sld [smem:[#allocation4 + $0x33]] }
  0xa8   : > { %704 = vrot.lane.b32.xlu1 %v702_v42, %s4445_s26  ;;  %696 = vrot.lane.b32.xlu0 %v694_v43, %s4442_s18  ;;  %v938_v43 = vmul.f32 %v937_v39, %v2989_v4  ;;  %v1087_v39 = vstv %s2447_s30  ;;  %s3253_s30 = sld [smem:[#allocation4 + $0x27]] }
  0xac   : > { %724 = vrot.lane.b32.xlu1 %v722_v46, %s4445_s26  ;;  %716 = vrot.lane.b32.xlu0 %v714_v47, %s4442_s18  ;;  %v949_v46 = vstv %s2426_s25  ;;  %s2445_s25 = sld [smem:[#allocation4 + $0x83]] }
  0xb0   : > { %744 = vrot.lane.b32.xlu1 %v742_v50, %s4445_s26  ;;  %736 = vrot.lane.b32.xlu0 %v734_v51, %s4442_s18  ;;  %v950_v50 = vmul.f32 %v949_v46, %v2987_v2  ;;  %v977_v51 = vstv %s2430_s27  ;;  %s2444_s27 = sld [smem:[#allocation4 + $0x82]]  ;;  %v1088_v46 = vmul.f32 %v1087_v39, %v2997_v12 }
  0xb2   : > { %v1075_v28 = vstv %s2445_s25  ;;  %s3244_s25 = sld [smem:[#allocation4 + $0x36]] }
  0xb3   : > { %v1076_v34 = vmul.f32 %v1075_v28, %v2987_v2 }
  0xb4   : > { %763 = vrot.lane.b32.xlu1 %v761_v54, %s4445_s26  ;;  %755 = vrot.lane.b32.xlu0 %v753_v55, %s4442_s18  ;;  %v978_v55 = vmul.f32 %v977_v51, %v2997_v12  ;;  %v425_v51 = vstv %s3219_s7  ;;  %s3279_s7 = sld [smem:[#allocation4 + $0x95]] }
  0xb8   : > { %783 = vrot.lane.b32.xlu1 %v781_v58, %s4445_s26  ;;  %775 = vrot.lane.b32.xlu0 %v773_v59, %s4442_s18  ;;  %v988_v58 = vstv %s2432_s3  ;;  %s3213_s3 = sld [smem:[#allocation4 + $0x2d]] }
  0xba   : > { %v3111_v3 = vpop.permute.xlu1 %215  ;;  %v3113_v5 = vpop.permute.xlu0 %195 }
  0xbc   : > { %803 = vrot.lane.b32.xlu1 %v801_v62, %s4445_s26  ;;  %795 = vrot.lane.b32.xlu0 %v793_v63, %s4442_s18  ;;  %v989_v62 = vmul.f32 %v988_v58, %v2989_v4  ;;  %v1016_v63 = vstv %s2436_s5  ;;  %s3215_s5 = sld [smem:[#allocation4 + $0x89]] }
  0xbe   : > { %v3119_v10 = vpop.permute.xlu1 %223  ;;  %v3121_v11 = vpop.permute.xlu0 %203 }
  0xc0   : > { %822 = vrot.lane.b32.xlu1 %v820_v6, %s4445_s26  ;;  %814 = vrot.lane.b32.xlu0 %v812_v7, %s4442_s18  ;;  %v1017_v7 = vmul.f32 %v1016_v63, %v2987_v2 }
  0xc2   : > { %v3127_v17 = vpop.permute.xlu1 %243  ;;  %v3129_v18 = vpop.permute.xlu0 %235 }
  0xc4   : > { %842 = vrot.lane.b32.xlu1 %v840_v13, %s4445_s26  ;;  %834 = vrot.lane.b32.xlu0 %v832_v14, %s4442_s18  ;;  %v1028_v13 = vstv %s2438_s17  ;;  %s3229_s17 = sld [smem:[#allocation4 + $0x8c]] }
  0xc6   : > { %v3135_v23 = vpop.permute.xlu1 %262  ;;  %v3137_v24 = vpop.permute.xlu0 %254 }
  0xc8   : > { %862 = vrot.lane.b32.xlu1 %v860_v19, %s4445_s26  ;;  %854 = vrot.lane.b32.xlu0 %v852_v20, %s4442_s18  ;;  %v1029_v19 = vmul.f32 %v1028_v13, %v2997_v12  ;;  %v1055_v20 = vstv %s2442_s21  ;;  %s3231_s21 = sld [smem:[#allocation4 + $0x8b]] }
  0xca   : > { %v3143_v29 = vpop.permute.xlu1 %282  ;;  %v3145_v30 = vpop.permute.xlu0 %274 }
  0xcc   : > { %881 = vrot.lane.b32.xlu1 %v879_v25, %s4445_s26  ;;  %873 = vrot.lane.b32.xlu0 %v871_v26, %s4442_s18  ;;  %v1056_v26 = vmul.f32 %v1055_v20, %v2989_v4 }
  0xce   : > { %v3151_v35 = vpop.permute.xlu1 %302  ;;  %v3153_v36 = vpop.permute.xlu0 %294  ;;  %v1126_v63 = vstv %s3231_s21  ;;  %s3288_s21 = sld [smem:[#allocation4 + $0x2a]] }
  0xd0   : > { %901 = vrot.lane.b32.xlu1 %v899_v31, %s4445_s26  ;;  %893 = vrot.lane.b32.xlu0 %v891_v32, %s4442_s18  ;;  %v1067_v31 = vstv %s2444_s27  ;;  %s3248_s27 = sld [smem:[#allocation4 + $0x8f]] }
  0xd2   : > { %v3159_v41 = vpop.permute.xlu1 %321  ;;  %v3161_v42 = vpop.permute.xlu0 %313 }
  0xd4   : > { %921 = vrot.lane.b32.xlu1 %v919_v37, %s4445_s26  ;;  %913 = vrot.lane.b32.xlu0 %v911_v38, %s4442_s18  ;;  %v1068_v37 = vmul.f32 %v1067_v31, %v2987_v2  ;;  %v1095_v38 = vstv %s2448_s29  ;;  %s3250_s29 = sld [smem:[#allocation4 + $0x8e]] }
  0xd5   : > { %v1096_v45 = vmul.f32 %v1095_v38, %v2997_v12 }
  0xd6   : > { %v3167_v47 = vpop.permute.xlu1 %341  ;;  %v3169_v48 = vpop.permute.xlu0 %333  ;;  %v1154_v21 = vstv %s3248_s27  ;;  %s3301_s27 = sld [smem:[#allocation4 + $0x3f]] }
  0xd7   : > { %v1155_v38 = vmul.f32 %v1154_v21, %v2997_v12 }
  0xd8   : > { %940 = vrot.lane.b32.xlu1 %v938_v43, %s4445_s26  ;;  %932 = vrot.lane.b32.xlu0 %v930_v44, %s4442_s18  ;;  %v484_v44 = vstv %s3213_s3  ;;  %s3260_s3 = sld [smem:[#allocation4 + $0x39]] }
  0xda   : > { %v3175_v53 = vpop.permute.xlu1 %361  ;;  %v3177_v54 = vpop.permute.xlu0 %353 }
  0xdc   : > { %960 = vrot.lane.b32.xlu1 %v958_v49, %s4445_s26  ;;  %952 = vrot.lane.b32.xlu0 %v950_v50, %s4442_s18  ;;  %v1114_v49 = vstv %s3215_s5  ;;  %v1106_v50 = vstv %s3217_s6  ;;  %s3265_s5 = sld [smem:[#allocation4 + $0x92]]  ;;  %s3267_s6 = sld [smem:[#allocation4 + $0x91]] }
  0xdd   : > { %v1115_v57 = vmul.f32 %v1114_v49, %v2989_v4  ;;  %v1107_v58 = vmul.f32 %v1106_v50, %v2989_v4 }
  0xde   : > { %v3183_v59 = vpop.permute.xlu1 %380  ;;  %v3185_v60 = vpop.permute.xlu0 %372 }
  0xe0   : > { %980 = vrot.lane.b32.xlu1 %v978_v55, %s4445_s26  ;;  %972 = vrot.lane.b32.xlu0 %v970_v56, %s4442_s18  ;;  %v485_v56 = vmul.f32 %v484_v44, %v2989_v4  ;;  %v562_v44 = vstv %s3260_s3  ;;  %s3316_s3 = sld [smem:[#allocation4 + $0x42]] }
  0xe2   : > { %v3191_v1 = vpop.permute.xlu1 %400  ;;  %v3193_v6 = vpop.permute.xlu0 %392  ;;  %v1202_v49 = vstv %s3265_s5  ;;  %v1194_v50 = vstv %s3267_s6  ;;  %s3320_s5 = sld [smem:[#allocation4 + $0x9b]]  ;;  %s3322_s6 = sld [smem:[#allocation4 + $0x9a]] }
  0xe4   : > { %999 = vrot.lane.b32.xlu1 %v997_v61, %s4445_s26  ;;  %991 = vrot.lane.b32.xlu0 %v989_v62, %s4442_s18  ;;  %v426_v61 = vmul.f32 %v425_v51, %v2989_v4  ;;  %v1134_v62 = vstv %s3229_s17  ;;  %s3281_s17 = sld [smem:[#allocation4 + $0x94]] }
  0xe5   : > { %v1135_v13 = vmul.f32 %v1134_v62, %v2987_v2 }
  0xe6   : > { %v3199_v14 = vpop.permute.xlu1 %420  ;;  %v3201_v15 = vpop.permute.xlu0 %412 }
  0xe8   : > { %1019 = vrot.lane.b32.xlu1 %v1017_v7, %s4445_s26  ;;  %1011 = vrot.lane.b32.xlu0 %v1009_v8, %s4442_s18 }
  0xea   : > { %v3207_v22 = vpop.permute.xlu1 %439  ;;  %v432_v25 = vpop.permute.xlu0 %431 }
  0xeb   : > { %v434_v20 = vadd.f32 %v432_v25, %v426_v61 }
  0xec   : > { %1039 = vrot.lane.b32.xlu1 %v1037_v16, %s4445_s26  ;;  %1031 = vrot.lane.b32.xlu0 %v1029_v19, %s4442_s18  ;;  %v1127_v16 = vmul.f32 %v1126_v63, %v2987_v2  ;;  %v543_v19 = vstv %s3244_s25  ;;  %s3299_s25 = sld [smem:[#allocation4 + $0x3c]]  ;;  %v1222_v63 = vstv %s3279_s7  ;;  %s4458_s7 = smov 127  }
  0xed   : > { %v544_v25 = vmul.f32 %v543_v19, %v2989_v4 }
  0xee   : > { %v3221_v32 = vpop.permute.xlu1 %459  ;;  %v3223_v33 = vpop.permute.xlu0 %451 }
  0xf0   : > { %1058 = vrot.lane.b32.xlu1 %v1056_v26, %s4445_s26  ;;  %1050 = vrot.lane.b32.xlu0 %v1048_v27, %s4442_s18  ;;  %v1146_v26 = vstv %s3250_s29  ;;  %v444_v27 = vstv %s3253_s30  ;;  %s3307_s29 = sld [smem:[#allocation4 + $0x98]]  ;;  %s3309_s30 = sld [smem:[#allocation4 + $0x97]] }
  0xf1   : > { %v1147_v39 = vmul.f32 %v1146_v26, %v2997_v12 }
  0xf2   : > { %v3233_v40 = vpop.permute.xlu1 %479  ;;  %v3235_v43 = vpop.permute.xlu0 %471  ;;  %v582_v26 = vstv %s3299_s25  ;;  %s3359_s25 = sld [smem:[#allocation4 + $0xa1]] }
  0xf4   : > { %1078 = vrot.lane.b32.xlu1 %v1076_v34, %s4445_s26  ;;  %1070 = vrot.lane.b32.xlu0 %v1068_v37, %s4442_s18  ;;  %v504_v37 = vmul.f32 %v503_v9, %v2987_v2 }
  0xf6   : > { %v499_v52 = vpop.permute.xlu1 %498  ;;  %v491_v55 = vpop.permute.xlu0 %490 }
  0xf7   : > { %v493_v8 = vadd.f32 %v491_v55, %v485_v56 }
  0xf8   : > { %1098 = vrot.lane.b32.xlu1 %v1096_v45, %s4445_s26  ;;  %1090 = vrot.lane.b32.xlu0 %v1088_v46, %s4442_s18  ;;  %v442_v45 = vadd.f32 %v3207_v22, %v434_v20  ;;  %v445_v46 = vmul.f32 %v444_v27, %v2987_v2  ;;  %v1203_v22 = vmul.f32 %v1202_v49, %v2989_v4  ;;  %v523_v20 = vstv %s3291_s22  ;;  %s3347_s22 = sld [smem:[#allocation4 + $0x12]] }
  0xf9   : > { %v501_v34 = vadd.f32 %v499_v52, %v493_v8  ;;  %v1214_v8 = vstv %s3281_s17  ;;  %v1223_v27 = vmul.f32 %v1222_v63, %v2987_v2  ;;  %s3336_s17 = sld [smem:[#allocation4 + $0x45]]  ;;  %v3374_v63 = vld [vmem:[#allocation2 + $0x1] sm:$0xff] }
  0xfa   : > { %v3269_v0 = vpop.permute.xlu1 %518  ;;  %v511_v7 = vpop.permute.xlu0 %510  ;;  %v446_v61 = vadd.f32 %v445_v46, %v442_v45 }
  0xfb   : > { %v505_v55 = vadd.f32 %v504_v37, %v501_v34  ;;  %v1215_v34 = vmul.f32 %v1214_v8, %v2987_v2  ;;  %v602_v37 = vstv %s3301_s27  ;;  %s3364_s27 = sld [smem:[#allocation4 + $0xa0]] }
  0xfc   : > { %1117 = vrot.lane.b32.xlu1 %v1115_v57, %s4445_s26  ;;  %1109 = vrot.lane.b32.xlu0 %v1107_v58, %s4442_s18  ;;  %v563_v57 = vmul.f32 %v562_v44, %v2987_v2  ;;  %v1195_v58 = vmul.f32 %v1194_v50, %v2989_v4  ;;  %v603_v49 = vmul.f32 %v602_v37, %v2989_v4  ;;  %v189_v4 = vstv %s3324_s8  ;;  %s3385_s8 = sld [smem:[#allocation4 + $0xa4]] }
  0xfd   : > { %v513_v19 = vadd.f32 %v511_v7, %v505_v55  ;;  %v1242_v7 = vstv %s3307_s29  ;;  %v583_v50 = vmul.f32 %v582_v26, %v2997_v12  ;;  %v621_v55 = vstv %s3316_s3  ;;  %s3367_s29 = sld [smem:[#allocation4 + $0x3]] }
  0xfe   : > { %v3284_v28 = vpop.permute.xlu1 %538  ;;  %v3286_v31 = vpop.permute.xlu0 %530  ;;  %s3372_s3 = sld [smem:[#allocation4 + $0x1b]]  ;;  %v622_v8 = vmul.f32 %v3374_v63, %v621_v55 }
  0xff   : > { %v521_v46 = vadd.f32 %v3269_v0, %v513_v19  ;;  %v641_v19 = vstv %s3336_s17  ;;  %s3410_s17 = sld [smem:[#allocation4 + $0xa6]] }
 0x100   : > { %1137 = vrot.lane.b32.xlu1 %v1135_v13, %s4445_s26  ;;  %1129 = vrot.lane.b32.xlu0 %v1127_v16, %s4442_s18  ;;  %v464_v16 = vstv %s3288_s21  ;;  %s3343_s21 = sld [smem:[#allocation4 + $0x9d]] }
 0x101   : > { %v465_v2 = vmul.f32 %v464_v16, %v2997_v12 }
 0x102   : > { %v558_v51 = vpop.permute.xlu1 %557  ;;  %v550_v52 = vpop.permute.xlu0 %549 }
 0x103   : > { %v552_v56 = vadd.f32 %v550_v52, %v544_v25  ;;  %v454_v25 = vadd.f32 %v3223_v33, %v446_v61  ;;  %v524_v33 = vmul.f32 %v523_v20, %v2997_v12  ;;  %v1281_v20 = vstv %s3338_s0  ;;  %s3396_s0 = sld [smem:[#allocation4 + $0x15]] }
 0x104   : > { %1157 = vrot.lane.b32.xlu1 %v1155_v38, %s4445_s26  ;;  %1149 = vrot.lane.b32.xlu0 %v1147_v39, %s4442_s18  ;;  %s3326_s18 = sld [smem:[#allocation4 + $0x9]]  ;;  %v1234_v39 = vstv %s3309_s30  ;;  %s3369_s30 = sld [smem:[#allocation4 + $0xc]] }
 0x105   : > { %v560_v62 = vadd.f32 %v558_v51, %v552_v56  ;;  %v1243_v51 = vmul.f32 %v1242_v7, %v2997_v12  ;;  %v1235_v52 = vmul.f32 %v1234_v39, %v2997_v12  ;;  %v462_v0 = vadd.f32 %v3221_v32, %v454_v25 }
 0x106   : > { %v578_v9 = vpop.permute.xlu1 %577  ;;  %v570_v13 = vpop.permute.xlu0 %569  ;;  %v307_v39 = vstv %s3347_s22  ;;  %s3428_s22 = sld [smem:[#allocation4 + $0xaa]] }
 0x107   : > { %v564_v21 = vadd.f32 %v563_v57, %v560_v62  ;;  %v1261_v57 = vstv %s3320_s5  ;;  %v525_v62 = vadd.f32 %v524_v33, %v521_v46  ;;  %s3392_s5 = sld [smem:[#allocation4 + $0x6]]  ;;  %v3400_v33 = vld [vmem:[#allocation2 + $0x2] sm:$0xff] }
 0x108   : > { %1205 = vrot.lane.b32.xlu1 %v1203_v22, %s4445_s26  ;;  %1197 = vrot.lane.b32.xlu0 %v1195_v58, %s4458_s7  ;;  %v1253_v22 = vstv %s3322_s6  ;;  %s3408_s6 = sld [smem:[#allocation4 + $0xa7]] }
 0x109   : > { %v572_v38 = vadd.f32 %v570_v13, %v564_v21  ;;  %v466_v21 = vadd.f32 %v465_v2, %v462_v0  ;;  %v533_v46 = vadd.f32 %v3286_v31, %v525_v62  ;;  %v366_v62 = vstv %s3372_s3  ;;  %s3467_s3 = sld [smem:[#allocation4 + $0x18]] }
 0x10a   : > { %v3345_v44 = vpop.permute.xlu1 %597  ;;  %v590_v45 = vpop.permute.xlu0 %589  ;;  %v248_v12 = vstv %s3326_s18  ;;  %s3388_s18 = sld [smem:[#allocation4 + $0xa3]] }
 0x10b   : > { %v580_v56 = vadd.f32 %v578_v9, %v572_v38  ;;  %v3379_v9 = vld [vmem:[#allocation2] sm:$0xff]  ;;  %v474_v31 = vadd.f32 %v3235_v43, %v466_v21  ;;  %v3420_v43 = vadd.f32 %v3284_v28, %v533_v46 }
 0x10c   : > { %1225 = vrot.lane.b32.xlu1 %v1223_v27, %s4445_s26  ;;  %1217 = vrot.lane.b32.xlu0 %v1215_v34, %s4458_s7  ;;  %v1262_v13 = vmul.f32 %v3379_v9, %v1261_v57  ;;  %v1254_v16 = vmul.f32 %v3379_v9, %v1253_v22  ;;  %v1273_v34 = vstv %s3343_s21  ;;  %v249_v37 = vmul.f32 %v3379_v9, %v248_v12  ;;  %s3417_s21 = sld [smem:[#allocation4 + $0x1e]] }
 0x10d   : > { %v584_v26 = vadd.f32 %v583_v50, %v580_v56  ;;  %v190_v7 = vmul.f32 %v3379_v9, %v189_v4  ;;  %v1282_v50 = vmul.f32 %v3374_v63, %v1281_v20  ;;  %v1293_v56 = vstv %s3364_s27  ;;  %s3439_s27 = sld [smem:[#allocation4 + $0xf]] }
 0x10e   : > { %v617_v58 = vpop.permute.xlu1 %616  ;;  %v609_v61 = vpop.permute.xlu0 %608  ;;  %v208_v57 = vstv %s3367_s29  ;;  %v257_v22 = vadd.f32 %v3137_v24, %v249_v37  ;;  %v267_v4 = vstv %s3369_s30  ;;  %v308_v12 = vmul.f32 %v3379_v9, %v307_v39  ;;  %s3456_s29 = sld [smem:[#allocation4 + $0xad]]  ;;  %s3458_s30 = sld [smem:[#allocation4 + $0xac]] }
 0x10f   : > { %v611_v32 = vadd.f32 %v609_v61, %v603_v49  ;;  %v642_v49 = vmul.f32 %v3400_v33, %v641_v19  ;;  %v592_v55 = vadd.f32 %v590_v45, %v584_v26 }
 0x110   : > { %1245 = vrot.lane.b32.xlu1 %v1243_v51, %s4445_s26  ;;  %1237 = vrot.lane.b32.xlu0 %v1235_v52, %s4458_s7  ;;  %v1274_v51 = vmul.f32 %v3374_v63, %v1273_v34  ;;  %v1301_v52 = vstv %s3359_s25  ;;  %v1312_v20 = vstv %s3388_s18  ;;  %s3433_s25 = sld [smem:[#allocation4 + $0xa9]]  ;;  %v265_v26 = vadd.f32 %v3135_v23, %v257_v22  ;;  %s3480_s18 = sld [smem:[#allocation4 + $0xaf]] }
 0x111   : > { %v619_v27 = vadd.f32 %v617_v58, %v611_v32  ;;  %v198_v32 = vadd.f32 %v3113_v5, %v190_v7  ;;  %v1302_v24 = vmul.f32 %v3400_v33, %v1301_v52  ;;  %v600_v28 = vadd.f32 %v3345_v44, %v592_v55 }
 0x112   : > { %v637_v25 = vpop.permute.xlu1 %636  ;;  %v629_v38 = vpop.permute.xlu0 %628  ;;  %v209_v5 = vmul.f32 %v3374_v63, %v208_v57  ;;  %v228_v44 = vstv %s3392_s5  ;;  %v316_v37 = vadd.f32 %v3161_v42, %v308_v12  ;;  %v326_v7 = vstv %s3396_s0  ;;  %s3491_s5 = sld [smem:[#allocation4 + $0x21]]  ;;  %s3500_s0 = sld [smem:[#allocation4 + $0xb3]] }
 0x113   : > { %v623_v2 = vadd.f32 %v622_v8, %v619_v27  ;;  %v1294_v8 = vmul.f32 %v3400_v33, %v1293_v56  ;;  %v206_v21 = vadd.f32 %v3121_v11, %v198_v32  ;;  %v268_v27 = vmul.f32 %v3374_v63, %v267_v4 }
 0x114   : > { %1264 = vrot.lane.b32.xlu1 %v1262_v13, %s4445_s26  ;;  %1256 = vrot.lane.b32.xlu0 %v1254_v16, %s4458_s7  ;;  %v1320_v13 = vstv %s3385_s8  ;;  %v482_v16 = vadd.f32 %v3233_v40, %v474_v31  ;;  %v367_v11 = vmul.f32 %v3379_v9, %v366_v62  ;;  %v1313_v39 = vmul.f32 %v3379_v9, %v1312_v20  ;;  %s3478_s8 = sld [smem:[#allocation4 + $0xb0]] }
 0x115   : > { %v631_v0 = vadd.f32 %v629_v38, %v623_v2  ;;  %v1321_v23 = vmul.f32 %v3379_v9, %v1320_v13  ;;  %v210_v42 = vadd.f32 %v209_v5, %v206_v21  ;;  %v269_v52 = vadd.f32 %v268_v27, %v265_v26 }
 0x116   : > { %v657_v58 = vpop.permute.xlu1 %656  ;;  %v649_v61 = vpop.permute.xlu0 %648  ;;  %v327_v56 = vmul.f32 %v3374_v63, %v326_v7  ;;  %v385_v57 = vstv %s3417_s21  ;;  %v375_v4 = vadd.f32 %v3185_v60, %v367_v11  ;;  %v1360_v12 = vstv %s3428_s22  ;;  %s3518_s21 = sld [smem:[#allocation4 + $0xb5]]  ;;  %s3528_s22 = sld [smem:[#allocation4 + $0xb9]] }
 0x117   : > { %v639_v45 = vadd.f32 %v637_v25, %v631_v0  ;;  %v660_v25 = vmax.f32 %v482_v16, %v3420_v43  ;;  %v324_v0 = vadd.f32 %v3159_v41, %v316_v37  ;;  %v1352_v32 = vstv %s3433_s25  ;;  %s3536_s25 = sld [smem:[#allocation4 + $0xb8]] }
 0x118   : > { %1284 = vrot.lane.b32.xlu1 %v1282_v50, %s4445_s26  ;;  %1276 = vrot.lane.b32.xlu0 %v1274_v51, %s4458_s7  ;;  %v1332_v50 = vstv %s3410_s17  ;;  %v229_v51 = vmul.f32 %v3400_v33, %v228_v44  ;;  %v218_v60 = vadd.f32 %v3111_v3, %v210_v42  ;;  %v383_v21 = vadd.f32 %v3183_v59, %v375_v4  ;;  %s3512_s17 = sld [smem:[#allocation4 + $0xb6]] }
 0x119   : > { %v643_v19 = vadd.f32 %v642_v49, %v639_v45  ;;  %v661_v46 = vmax.f32 %v660_v25, %v600_v28  ;;  %v1340_v49 = vstv %s3408_s6  ;;  %v1353_v26 = vmul.f32 %v3400_v33, %v1352_v32  ;;  %s3502_s6 = sld [smem:[#allocation4 + $0xb2]] }
 0x11a   : > { %v3441_v40 = vpop.permute.xlu1 %704  ;;  %v3443_v34 = vpop.permute.xlu0 %696  ;;  %v1379_v44 = vstv %s3456_s29  ;;  %v1371_v37 = vstv %s3458_s30  ;;  %v226_v59 = vadd.f32 %v3119_v10, %v218_v60  ;;  %s3556_s29 = sld [smem:[#allocation4 + $0xbb]]  ;;  %s3571_s30 = sld [smem:[#allocation4 + $0xbf]] }
 0x11b   : > { %v651_v38 = vadd.f32 %v649_v61, %v643_v19  ;;  %v1333_v61 = vmul.f32 %v3374_v63, %v1332_v50  ;;  %v1380_v10 = vmul.f32 %v3379_v9, %v1379_v44 }
 0x11c   : > { %1304 = vrot.lane.b32.xlu1 %v1302_v24, %s4445_s26  ;;  %1296 = vrot.lane.b32.xlu0 %v1294_v8, %s4458_s7  ;;  %v277_v24 = vadd.f32 %v3145_v30, %v269_v52  ;;  %v287_v8 = vstv %s3439_s27  ;;  %v1361_v30 = vmul.f32 %v3400_v33, %v1360_v12  ;;  %s3554_s27 = sld [smem:[#allocation4 + $0xbc]]  ;;  %v1458_v44 = vstv %s3528_s22  ;;  %s2517_s22 = sld [smem:[#allocation4 + $0xca]] }
 0x11d   : > { %v659_v2 = vadd.f32 %v657_v58, %v651_v38  ;;  %v1341_v58 = vmul.f32 %v3374_v63, %v1340_v49  ;;  %v288_v27 = vmul.f32 %v3400_v33, %v287_v8  ;;  %v1391_v49 = vstv %s3480_s18  ;;  %s3589_s18 = sld [smem:[#allocation4 + $0xc1]] }
 0x11e   : > { %v3461_v31 = vpop.permute.xlu1 %724  ;;  %v3463_v55 = vpop.permute.xlu0 %716  ;;  %v285_v25 = vadd.f32 %v3143_v29, %v277_v24  ;;  %v1372_v29 = vmul.f32 %v3379_v9, %v1371_v37  ;;  %v1392_v4 = vmul.f32 %v3374_v63, %v1391_v49  ;;  %v1438_v60 = vstv %s3512_s17  ;;  %s2514_s17 = sld [smem:[#allocation4 + $0xc7]] }
 0x11f   : > { %v662_v22 = vmax.f32 %v661_v46, %v659_v2 }
 0x120   : > { %1323 = vrot.lane.b32.xlu1 %v1321_v23, %s4445_s26  ;;  %1315 = vrot.lane.b32.xlu0 %v1313_v39, %s4458_s7  ;;  %v346_v39 = vstv %s3467_s3  ;;  %v289_v50 = vadd.f32 %v288_v27, %v285_v25  ;;  %s3573_s3 = sld [smem:[#allocation4 + $0xbe]] }
 0x121   : > { %v663_v62 = vsub.f32 %v482_v16, %v662_v22  ;;  %v666_v41 = vsub.f32 %v3420_v43, %v662_v22  ;;  %v669_v45 = vsub.f32 %v600_v28, %v662_v22  ;;  %v672_v13 = vsub.f32 %v659_v2, %v662_v22 }
 0x122   : > { %v3485_v19 = vpop.permute.xlu1 %744  ;;  %v3487_v20 = vpop.permute.xlu0 %736  ;;  %v328_v16 = vadd.f32 %v327_v56, %v324_v0  ;;  %v386_v43 = vmul.f32 %v3374_v63, %v385_v57  ;;  %v1399_v2 = vstv %s3478_s8  ;;  %v347_v56 = vmul.f32 %v3400_v33, %v346_v39  ;;  %s3587_s8 = sld [smem:[#allocation4 + $0xc2]] }
 0x123   : > { %v664_v28 = vmul.f32 1.442695, %v663_v62  ;;  %v667_v5 = vmul.f32 1.442695, %v666_v41  ;;  %v670_v3 = vmul.f32 1.442695, %v669_v45  ;;  %v405_v22 = vstv %s3491_s5 }
 0x124   : > { %1343 = vrot.lane.b32.xlu1 %v1341_v58, %s4445_s26  ;;  %1335 = vrot.lane.b32.xlu0 %v1333_v61, %s4458_s7  ;;  %v673_v38 = vmul.f32 1.442695, %v672_v13  ;;  %v336_v23 = vadd.f32 %v3169_v48, %v328_v16  ;;  %v387_v46 = vadd.f32 %v386_v43, %v383_v21  ;;  %v230_v48 = vadd.f32 %v229_v51, %v226_v59  ;;  %s3602_s5 = sld [smem:[#allocation4 + $0xc5]] }
 0x125   : > { %2698 = vpow2.f32 %v664_v28  ;;  %v1400_v51 = vmul.f32 %v3374_v63, %v1399_v2  ;;  %v1419_v58 = vstv %s3500_s0  ;;  %v297_v12 = vadd.f32 %v3153_v36, %v289_v50  ;;  %s3604_s0 = sld [smem:[#allocation4 + $0xc4]] }
 0x126   : > { %2700 = vpow2.f32 %v667_v5  ;;  %v3506_v7 = vpop.permute.xlu1 %763  ;;  %v3508_v11 = vpop.permute.xlu0 %755  ;;  %v344_v0 = vadd.f32 %v3167_v47, %v336_v23  ;;  %v395_v57 = vadd.f32 %v3193_v6, %v387_v46  ;;  %v1411_v47 = vstv %s3502_s6  ;;  %s2515_s6 = sld [smem:[#allocation4 + $0xc8]] }
 0x127   : > { %2702 = vpow2.f32 %v670_v3  ;;  %v238_v61 = vadd.f32 %v3129_v18, %v230_v48  ;;  %v406_v32 = vmul.f32 %v3400_v33, %v405_v22  ;;  %v1420_v18 = vmul.f32 %v3400_v33, %v1419_v58 }
 0x128   : > { %1363 = vrot.lane.b32.xlu1 %v1361_v30, %s4445_s26  ;;  %1355 = vrot.lane.b32.xlu0 %v1353_v26, %s4458_s7  ;;  %2704 = vpow2.f32 %v673_v38  ;;  %v348_v45 = vadd.f32 %v347_v56, %v344_v0  ;;  %v403_v8 = vadd.f32 %v3191_v1, %v395_v57  ;;  %v1412_v36 = vmul.f32 %v3400_v33, %v1411_v47 }
 0x129   : > { %v1430_v13 = vstv %s3518_s21  ;;  %v246_v28 = vadd.f32 %v3127_v17, %v238_v61  ;;  %v305_v1 = vadd.f32 %v3151_v35, %v297_v12  ;;  %v1439_v3 = vmul.f32 %v3379_v9, %v1438_v60  ;;  %s2569_s21 = sld [smem:[#allocation4 + $0xfd]] }
 0x12a   : > { %v3522_v42 = vpop.permute.xlu1 %783  ;;  %v3524_v52 = vpop.permute.xlu0 %775  ;;  %v356_v30 = vadd.f32 %v3177_v54, %v348_v45  ;;  %v1431_v27 = vmul.f32 %v3379_v9, %v1430_v13  ;;  %v407_v59 = vadd.f32 %v406_v32, %v403_v8  ;;  %v1450_v17 = vstv %s3536_s25  ;;  %s2570_s25 = sld [smem:[#allocation4 + $0xfe]] }
 0x12b   : > { %v1459_v39 = vmul.f32 %v3374_v63, %v1458_v44  ;;  %v1451_v46 = vmul.f32 %v3374_v63, %v1450_v17  ;;  %v1478_v49 = vstv %s3554_s27  ;;  %v1470_v48 = vstv %s3556_s29  ;;  %s2578_s27 = sld [smem:[#allocation4 + $0x106]]  ;;  %s3642_s29 = sld [smem:[#allocation4 + $0x75]] }
 0x12c   : > { %1382 = vrot.lane.b32.xlu1 %v1380_v10, %s4445_s26  ;;  %1374 = vrot.lane.b32.xlu0 %v1372_v29, %s4458_s7  ;;  %v364_v10 = vadd.f32 %v3175_v53, %v356_v30  ;;  %v415_v29 = vadd.f32 %v3201_v15, %v407_v59  ;;  %v1479_v53 = vmul.f32 %v3400_v33, %v1478_v49  ;;  %v1517_v32 = vstv %s3587_s8  ;;  %s3648_s8 = sld [smem:[#allocation4 + $0x6c]] }
 0x12d   : > { %v1471_v22 = vmul.f32 %v3400_v33, %v1470_v48  ;;  %v1509_v60 = vstv %s3589_s18  ;;  %v1568_v17 = vstv %s2517_s22  ;;  %s3658_s18 = sld [smem:[#allocation4 + $0x110]]  ;;  %s3682_s22 = sld [smem:[#allocation4 + $0x6f]] }
 0x12e   : > { %v3542_v6 = vpop.permute.xlu1 %803  ;;  %v3544_v62 = vpop.permute.xlu0 %795  ;;  %v423_v15 = vadd.f32 %v3199_v14, %v415_v29  ;;  %v1510_v13 = vmul.f32 %v3374_v63, %v1509_v60 }
 0x12f   : > { %v2699_v41 = vpop.eup %2698 }
 0x130   : > { %v2701_v24 = vpop.eup %2700  ;;  %1402 = vrot.lane.b32.xlu1 %v1400_v51, %s4445_s26  ;;  %1394 = vrot.lane.b32.xlu0 %v1392_v4, %s4458_s7  ;;  %v675_v25 = vmul.f32 %v2699_v41, %v246_v28  ;;  %v1497_v51 = vstv %s3571_s30  ;;  %v1489_v4 = vstv %s3573_s3  ;;  %s3644_s30 = sld [smem:[#allocation4 + $0x10f]] }
 0x131   : > { %v676_v16 = vadd.f32 %v2701_v24, %v2699_v41  ;;  %v2703_v43 = vpop.eup %2702  ;;  %v677_v38 = vmul.f32 %v2701_v24, %v305_v1  ;;  %v1498_v12 = vmul.f32 %v3379_v9, %v1497_v51  ;;  %v1490_v41 = vmul.f32 %v3379_v9, %v1489_v4  ;;  %s3646_s3 = sld [smem:[#allocation4 + $0x107]] }
 0x132   : > { %v3560_v5 = vpop.permute.xlu1 %822  ;;  %v3562_v21 = vpop.permute.xlu0 %814  ;;  %v680_v50 = vmul.f32 %v2703_v43, %v364_v10  ;;  %v1569_v10 = vmul.f32 %v3374_v63, %v1568_v17  ;;  %v1939_v29 = vstv %s2570_s25  ;;  %v926_v51 = vstv %s3648_s8  ;;  %s3689_s25 = sld [smem:[#allocation4 + $0x81]]  ;;  %s3706_s8 = sld [smem:[#allocation4 + $0x4e]] }
 0x133   : > { %v679_v26 = vadd.f32 %v2703_v43, %v676_v16  ;;  %v2705_v37 = vpop.eup %2704  ;;  %v678_v2 = vadd.f32 %v677_v38, %v675_v25  ;;  %v1537_v16 = vstv %s3602_s5  ;;  %v1529_v43 = vstv %s3604_s0  ;;  %s3660_s5 = sld [smem:[#allocation4 + $0xd0]] }
 0x134   : > { %1422 = vrot.lane.b32.xlu1 %v1420_v18, %s4445_s26  ;;  %1414 = vrot.lane.b32.xlu0 %v1412_v36, %s4458_s7  ;;  %v683_v58 = vmul.f32 %v2705_v37, %v423_v15  ;;  %v1518_v36 = vmul.f32 %v3374_v63, %v1517_v32  ;;  %v1530_v30 = vmul.f32 %v3400_v33, %v1529_v43  ;;  %v1931_v38 = vstv %s2569_s21  ;;  %s3671_s0 = sld [smem:[#allocation4 + $0x78]] }
 0x135   : > { %v682_v35 = vadd.f32 %v2705_v37, %v679_v26  ;;  %v681_v57 = vadd.f32 %v680_v50, %v678_v2  ;;  %v1556_v26 = vstv %s2515_s6  ;;  %v1990_v2 = vstv %s2578_s27  ;;  %s3673_s6 = sld [smem:[#allocation4 + $0x7e]]  ;;  %s3679_s21 = sld [smem:[#allocation4 + $0x118]] }
 0x136   : > { %v3575_v54 = vpop.permute.xlu1 %842  ;;  %v3577_v23 = vpop.permute.xlu0 %834  ;;  %v1557_v59 = vmul.f32 %v3379_v9, %v1556_v26  ;;  %v985_v50 = vstv %s3642_s29  ;;  %v1991_v15 = vmul.f32 %v3379_v9, %v1990_v2  ;;  %v2057_v32 = vstv %s3658_s18  ;;  %s3694_s27 = sld [smem:[#allocation4 + $0x109]]  ;;  %s3696_s29 = sld [smem:[#allocation4 + $0x100]] }
 0x137   : > { %2706 = vrcp.f32 %v682_v35  ;;  %v684_v14 = vadd.f32 %v683_v58, %v681_v57  ;;  %v2049_v57 = vstv %s3644_s30  ;;  %s3698_s30 = sld [smem:[#allocation4 + $0x48]]  ;;  %v2058_v43 = vmul.f32 %v3379_v9, %v2057_v32  ;;  %s3716_s18 = sld [smem:[#allocation4 + $0x101]] }
 0x138   : > { %1441 = vrot.lane.b32.xlu1 %v1439_v3, %s4445_s26  ;;  %1433 = vrot.lane.b32.xlu0 %v1431_v27, %s4458_s7  ;;  %v1538_v3 = vmul.f32 %v3400_v33, %v1537_v16  ;;  %v1548_v27 = vstv %s2514_s17  ;;  %s3677_s17 = sld [smem:[#allocation4 + $0xd1]] }
 0x139   : > { %v1549_v25 = vmul.f32 %v3379_v9, %v1548_v27  ;;  %v1607_v60 = vstv %s3660_s5  ;;  %s3718_s5 = sld [smem:[#allocation4 + $0x119]] }
 0x13a   : > { %v3591_v0 = vpop.permute.xlu1 %862  ;;  %v3593_v56 = vpop.permute.xlu0 %854  ;;  %v1004_v16 = vstv %s3671_s0  ;;  %s3722_s0 = sld [smem:[#allocation4 + $0x54]] }
 0x13c   : > { %1461 = vrot.lane.b32.xlu1 %v1459_v39, %s4445_s26  ;;  %1453 = vrot.lane.b32.xlu0 %v1451_v46, %s4458_s7  ;;  %v1932_v46 = vmul.f32 %v3379_v9, %v1931_v38 }
 0x13e   : > { %v3606_v47 = vpop.permute.xlu1 %881  ;;  %v3608_v61 = vpop.permute.xlu0 %873  ;;  %v1615_v27 = vstv %s3677_s17  ;;  %s3732_s17 = sld [smem:[#allocation4 + $0x7b]] }
 0x140   : > { %1481 = vrot.lane.b32.xlu1 %v1479_v53, %s4445_s26  ;;  %1473 = vrot.lane.b32.xlu0 %v1471_v22, %s4458_s7  ;;  %v1940_v53 = vmul.f32 %v3379_v9, %v1939_v29  ;;  %v1998_v22 = vstv %s3646_s3  ;;  %s3700_s3 = sld [smem:[#allocation4 + $0x4b]]  ;;  %v1616_v29 = vmul.f32 %v3379_v9, %v1615_v27 }
 0x141   : > { %v2707_v45 = vpop.eup %2706 }
 0x142   : > { %v686_v24 = vmul.f32 %v2707_v45, %v684_v14  ;;  %v3616_v8 = vpop.permute.xlu1 %901  ;;  %v3618_v18 = vpop.permute.xlu0 %893  ;;  %v986_v14 = vmul.f32 %v3379_v9, %v985_v50  ;;  %v927_v45 = vmul.f32 %v3379_v9, %v926_v51  ;;  %v1063_v50 = vstv %s3689_s25  ;;  %s3756_s25 = sld [smem:[#allocation4 + $0x5a]] }
 0x143   : > { %v690_v51 = vstv %s3698_s30  ;;  %s3768_s30 = sld [smem:[#allocation4 + $0xd3]] }
 0x144   : > { %1500 = vrot.lane.b32.xlu1 %v1498_v12, %s4445_s26  ;;  %1492 = vrot.lane.b32.xlu0 %v1490_v41, %s4458_s7  ;;  %688 = vst.msk [vmem:[%s2985_s28] sm:$0xff] %vm687_vm0, %v686_v24  ;;  %v2050_v12 = vmul.f32 %v3379_v9, %v2049_v57  ;;  %v1999_v41 = vmul.f32 %v3379_v9, %v1998_v22  ;;  %v2010_v57 = vstv %s3694_s27  ;;  %s4459_s27 = smov 126  }
 0x145   : > { %v1951_v22 = vstv %s3696_s29  ;;  %v2011_v32 = vmul.f32 %v3374_v63, %v2010_v57  ;;  %s3764_s29 = sld [smem:[#allocation4 + $0x8a]] }
 0x146   : > { %v3628_v28 = vpop.permute.xlu1 %921  ;;  %v3630_v1 = vpop.permute.xlu0 %913 }
 0x148   : > { %1520 = vrot.lane.b32.xlu1 %v1518_v36, %s4445_s26  ;;  %1512 = vrot.lane.b32.xlu0 %v1510_v13, %s4458_s7 }
 0x14a   : > { %v3636_v44 = vpop.permute.xlu1 %940  ;;  %v933_v37 = vpop.permute.xlu0 %932 }
 0x14b   : > { %v935_v26 = vadd.f32 %v933_v37, %v927_v45  ;;  %v1064_v45 = vmul.f32 %v3374_v63, %v1063_v50 }
 0x14c   : > { %1540 = vrot.lane.b32.xlu1 %v1538_v3, %s4445_s26  ;;  %1532 = vrot.lane.b32.xlu0 %v1530_v30, %s4458_s7  ;;  %v1608_v3 = vmul.f32 %v3379_v9, %v1607_v60  ;;  %v1044_v30 = vstv %s3673_s6  ;;  %s3729_s6 = sld [smem:[#allocation4 + $0x72]]  ;;  %v1952_v60 = vmul.f32 %v3374_v63, %v1951_v22  ;;  %v2069_v22 = vstv %s3748_s20  ;;  %s3829_s20 = sld [smem:[#allocation4 + $0xd4]] }
 0x14e   : > { %v3650_v35 = vpop.permute.xlu1 %960  ;;  %v3652_v39 = vpop.permute.xlu0 %952 }
 0x150   : > { %1559 = vrot.lane.b32.xlu1 %v1557_v59, %s4445_s26  ;;  %1551 = vrot.lane.b32.xlu0 %v1549_v25, %s4458_s7  ;;  %v2108_v59 = vstv %s3679_s21  ;;  %v945_v25 = vstv %s3682_s22  ;;  %s3740_s21 = sld [smem:[#allocation4 + $0x84]]  ;;  %s3742_s22 = sld [smem:[#allocation4 + $0x87]] }
 0x151   : > { %v2109_v2 = vmul.f32 %v3379_v9, %v2108_v59 }
 0x152   : > { %v3662_v49 = vpop.permute.xlu1 %980  ;;  %v3664_v48 = vpop.permute.xlu0 %972 }
 0x154   : > { %1934 = vrot.lane.b32.xlu1 %v1932_v46, %s4458_s7  ;;  %1571 = vrot.lane.b32.xlu0 %v1569_v10, %s4458_s7  ;;  %v1005_v46 = vmul.f32 %v3374_v63, %v1004_v16  ;;  %v1045_v10 = vmul.f32 %v3379_v9, %v1044_v30  ;;  %v3773_v30 = vmul.f32 %v3379_v9, %v690_v51 }
 0x156   : > { %v1000_v4 = vpop.permute.xlu1 %999  ;;  %v992_v58 = vpop.permute.xlu0 %991 }
 0x157   : > { %v994_v13 = vadd.f32 %v992_v58, %v986_v14 }
 0x158   : > { %1942 = vrot.lane.b32.xlu1 %v1940_v53, %s4445_s26  ;;  %1993 = vrot.lane.b32.xlu0 %v1991_v15, %s4458_s7  ;;  %v943_v53 = vadd.f32 %v3636_v44, %v935_v26  ;;  %v946_v15 = vmul.f32 %v3374_v63, %v945_v25 }
 0x159   : > { %v1002_v37 = vadd.f32 %v1000_v4, %v994_v13  ;;  %v709_v4 = vstv %s3700_s3  ;;  %s3770_s3 = sld [smem:[#allocation4 + $0xcb]] }
 0x15a   : > { %v3702_v24 = vpop.permute.xlu1 %1019  ;;  %v3704_v36 = vpop.permute.xlu0 %1011  ;;  %v947_v13 = vadd.f32 %v946_v15, %v943_v53  ;;  %v3776_v26 = vmul.f32 %v3374_v63, %v709_v4  ;;  %v1103_v15 = vstv %s3742_s22  ;;  %v749_v4 = vstv %s3720_s1  ;;  %s3809_s22 = sld [smem:[#allocation4 + $0x66]]  ;;  %s3819_s1 = sld [smem:[#allocation4 + $0x90]] }
 0x15b   : > { %v1006_v44 = vadd.f32 %v1005_v46, %v1002_v37  ;;  %v965_v37 = vstv %s3729_s6  ;;  %s3796_s6 = sld [smem:[#allocation4 + $0x60]] }
 0x15c   : > { %2052 = vrot.lane.b32.xlu1 %v2050_v12, %s4458_s7  ;;  %2001 = vrot.lane.b32.xlu0 %v1999_v41, %s4445_s26  ;;  %v729_v12 = vstv %s3706_s8  ;;  %s3781_s8 = sld [smem:[#allocation4 + $0x5d]] }
 0x15d   : > { %v3779_v27 = vmul.f32 %v3400_v33, %v729_v12  ;;  %v1014_v46 = vadd.f32 %v3704_v36, %v1006_v44  ;;  %v955_v36 = vadd.f32 %v3652_v39, %v947_v13  ;;  %v808_v12 = vstv %s3756_s25  ;;  %s3856_s25 = sld [smem:[#allocation4 + $0x10c]] }
 0x15e   : > { %v3725_v38 = vpop.permute.xlu1 %1039  ;;  %v3727_v17 = vpop.permute.xlu0 %1031  ;;  %v966_v39 = vmul.f32 %v3400_v33, %v965_v37  ;;  %v1627_v37 = vstv %s3768_s30  ;;  %s3867_s30 = sld [smem:[#allocation4 + $0xcd]] }
 0x160   : > { %2060 = vrot.lane.b32.xlu1 %v2058_v43, %s4445_s26  ;;  %1610 = vrot.lane.b32.xlu0 %v1608_v3, %s4458_s7  ;;  %s3750_s26 = sld [smem:[#allocation4 + $0x10a]]  ;;  %v1959_v43 = vstv %s3716_s18  ;;  %v2116_v3 = vstv %s3718_s5  ;;  %s3792_s18 = sld [smem:[#allocation4 + $0x11b]] }
 0x161   : > { %v1960_v50 = vmul.f32 %v3374_v63, %v1959_v43  ;;  %v2117_v53 = vmul.f32 %v3379_v9, %v2116_v3  ;;  %s3794_s5 = sld [smem:[#allocation4 + $0x113]]  ;;  %v1122_v3 = vstv %s3764_s29  ;;  %s3865_s29 = sld [smem:[#allocation4 + $0x104]] }
 0x162   : > { %v1059_v58 = vpop.permute.xlu1 %1058  ;;  %v1051_v14 = vpop.permute.xlu0 %1050 }
 0x163   : > { %v1053_v41 = vadd.f32 %v1051_v14, %v1045_v10  ;;  %v1024_v10 = vstv %s3732_s17  ;;  %s3801_s17 = sld [smem:[#allocation4 + $0x8d]]  ;;  %v788_v14 = vstv %s3754_s19  ;;  %s3827_s19 = sld [smem:[#allocation4 + $0x103]] }
 0x164   : > { %1618 = vrot.lane.b32.xlu1 %v1616_v29, %s4459_s27  ;;  %2111 = vrot.lane.b32.xlu0 %v2109_v2, %s4458_s7  ;;  %v1083_v2 = vstv %s3740_s21  ;;  %s3807_s21 = sld [smem:[#allocation4 + $0x63]] }
 0x165   : > { %v1061_v16 = vadd.f32 %v1059_v58, %v1053_v41  ;;  %v768_v58 = vstv %s3722_s0  ;;  %v1084_v13 = vmul.f32 %v3400_v33, %v1083_v2  ;;  %v3839_v2 = vmul.f32 %v3400_v33, %v788_v14  ;;  %s3854_s0 = sld [smem:[#allocation4 + $0x11c]] }
 0x166   : > { %v1079_v59 = vpop.permute.xlu1 %1078  ;;  %v1071_v25 = vpop.permute.xlu0 %1070  ;;  %v2018_v51 = vstv %s3750_s26  ;;  %s3846_s26 = sld [smem:[#allocation4 + $0x93]] }
 0x167   : > { %v1065_v29 = vadd.f32 %v1064_v45, %v1061_v16  ;;  %v1022_v45 = vadd.f32 %v3702_v24, %v1014_v46  ;;  %v2070_v16 = vmul.f32 %v3374_v63, %v2069_v22  ;;  %v2019_v43 = vmul.f32 %v3374_v63, %v2018_v51 }
 0x168   : > { %2013 = vrot.lane.b32.xlu1 %v2011_v32, %s4458_s7  ;;  %1954 = vrot.lane.b32.xlu0 %v1952_v60, %s4458_s7  ;;  %v1025_v32 = vmul.f32 %v3400_v33, %v1024_v10  ;;  %v1104_v60 = vmul.f32 %v3379_v9, %v1103_v15  ;;  %v963_v24 = vadd.f32 %v3650_v35, %v955_v36  ;;  %v1576_v46 = vstv %s3770_s3  ;;  %s3878_s3 = sld [smem:[#allocation4 + $0x96]] }
 0x169   : > { %v1073_v57 = vadd.f32 %v1071_v25, %v1065_v29  ;;  %v750_v10 = vmul.f32 %v3379_v9, %v749_v4  ;;  %v3836_v29 = vmul.f32 %v3374_v63, %v768_v58  ;;  %v827_v22 = vstv %s3781_s8  ;;  %s3880_s8 = sld [smem:[#allocation4 + $0x99]] }
 0x16a   : > { %v3811_v44 = vpop.permute.xlu1 %1098  ;;  %v3813_v41 = vpop.permute.xlu0 %1090  ;;  %v1026_v35 = vadd.f32 %v1025_v32, %v1022_v45  ;;  %v1123_v36 = vmul.f32 %v3374_v63, %v1122_v3  ;;  %v1577_v51 = vmul.f32 %v3374_v63, %v1576_v46  ;;  %v2128_v4 = vstv %s3792_s18  ;;  %s3894_s18 = sld [smem:[#allocation4 + $0x69]] }
 0x16b   : > { %v1081_v25 = vadd.f32 %v1079_v59, %v1073_v57  ;;  %v1628_v57 = vmul.f32 %v3374_v63, %v1627_v37  ;;  %v2077_v58 = vstv %s3794_s5  ;;  %v967_v14 = vadd.f32 %v966_v39, %v963_v24  ;;  %s3896_s5 = sld [smem:[#allocation4 + $0x115]] }
 0x16c   : > { %1962 = vrot.lane.b32.xlu1 %v1960_v50, %s4459_s27  ;;  %2119 = vrot.lane.b32.xlu0 %v2117_v53, %s4459_s27  ;;  %v3842_v50 = vmul.f32 %v3379_v9, %v808_v12  ;;  %v1142_v32 = vstv %s3801_s17  ;;  %v886_v3 = vstv %s3809_s22  ;;  %s3927_s17 = sld [smem:[#allocation4 + $0x9c]]  ;;  %s3932_s22 = sld [smem:[#allocation4 + $0xce]] }
 0x16d   : > { %v1085_v12 = vadd.f32 %v1084_v13, %v1081_v25  ;;  %v2129_v13 = vmul.f32 %v3374_v63, %v2128_v4  ;;  %v1191_v24 = vstv %s3819_s1  ;;  %v1143_v25 = vmul.f32 %v3400_v33, %v1142_v32  ;;  %s3948_s1 = sld [smem:[#allocation4 + $0x11e]] }
 0x16e   : > { %v1118_v53 = vpop.permute.xlu1 %1117  ;;  %v1110_v15 = vpop.permute.xlu0 %1109  ;;  %v2136_v32 = vstv %s3854_s0  ;;  %s3968_s0 = sld [smem:[#allocation4 + $0x11f]] }
 0x16f   : > { %v1112_v59 = vadd.f32 %v1110_v15, %v1104_v60  ;;  %v3860_v60 = vmul.f32 %v3374_v63, %v827_v22  ;;  %v1034_v15 = vadd.f32 %v3727_v17, %v1026_v35  ;;  %v1971_v22 = vstv %s3827_s19  ;;  %s3952_s19 = sld [smem:[#allocation4 + $0x9f]] }
 0x170   : > { %2072 = vrot.lane.b32.xlu1 %v2070_v16, %s4458_s7  ;;  %2021 = vrot.lane.b32.xlu0 %v2019_v43, %s4459_s27  ;;  %v847_v16 = vstv %s3796_s6  ;;  %v867_v43 = vstv %s3807_s21  ;;  %v699_v17 = vadd.f32 %v3443_v34, %v3773_v30  ;;  %v975_v35 = vadd.f32 %v3664_v48, %v967_v14  ;;  %s3909_s6 = sld [smem:[#allocation4 + $0x10d]]  ;;  %s3930_s21 = sld [smem:[#allocation4 + $0xd6]] }
 0x171   : > { %v1120_v45 = vadd.f32 %v1118_v53, %v1112_v59  ;;  %v2078_v53 = vmul.f32 %v3374_v63, %v2077_v58  ;;  %v1635_v59 = vstv %s3829_s20  ;;  %v3888_v4 = vmul.f32 %v3400_v33, %v847_v16  ;;  %s3954_s20 = sld [smem:[#allocation4 + $0x116]] }
 0x172   : > { %v1138_v37 = vpop.permute.xlu1 %1137  ;;  %v1130_v46 = vpop.permute.xlu0 %1129  ;;  %v868_v58 = vmul.f32 %v3379_v9, %v867_v43  ;;  %v3899_v48 = vadd.f32 %v3725_v38, %v1034_v15  ;;  %v1972_v14 = vmul.f32 %v3400_v33, %v1971_v22  ;;  %v2030_v16 = vstv %s3856_s25  ;;  %s3973_s25 = sld [smem:[#allocation4 + $0xd7]] }
 0x173   : > { %v1124_v39 = vadd.f32 %v1123_v36, %v1120_v45  ;;  %v1093_v36 = vadd.f32 %v3813_v41, %v1085_v12  ;;  %v3892_v45 = vmul.f32 %v3374_v63, %v886_v3  ;;  %v1192_v41 = vmul.f32 %v3379_v9, %v1191_v24 }
 0x174   : > { %1630 = vrot.lane.b32.xlu1 %v1628_v57, %s4458_s7  ;;  %1579 = vrot.lane.b32.xlu0 %v1577_v51, %s4459_s27  ;;  %v758_v51 = vadd.f32 %v3508_v11, %v750_v10  ;;  %v1210_v10 = vstv %s3846_s26  ;;  %v1636_v12 = vmul.f32 %v3374_v63, %v1635_v59  ;;  %v707_v38 = vadd.f32 %v3441_v40, %v699_v17  ;;  %s3966_s26 = sld [smem:[#allocation4 + $0xa2]] }
 0x175   : > { %v1132_v57 = vadd.f32 %v1130_v46, %v1124_v39  ;;  %v983_v43 = vadd.f32 %v3662_v49, %v975_v35  ;;  %v1101_v9 = vadd.f32 %v3811_v44, %v1093_v36  ;;  %v1211_v39 = vmul.f32 %v3374_v63, %v1210_v10 }
 0x176   : > { %v1158_v34 = vpop.permute.xlu1 %1157  ;;  %v1150_v30 = vpop.permute.xlu0 %1149  ;;  %v1588_v24 = vstv %s3867_s30  ;;  %v2031_v44 = vmul.f32 %v3400_v33, %v2030_v16  ;;  %v1250_v59 = vstv %s3880_s8  ;;  %v2038_v16 = vstv %s3909_s6  ;;  %s3978_s30 = sld [smem:[#allocation4 + $0xe2]]  ;;  %s3998_s8 = sld [smem:[#allocation4 + $0xe3]] }
 0x177   : > { %v1140_v11 = vadd.f32 %v1138_v37, %v1132_v57  ;;  %v766_v37 = vadd.f32 %v3506_v7, %v758_v51  ;;  %v1161_v40 = vmax.f32 %v983_v43, %v3899_v48  ;;  %v2137_v7 = vmul.f32 %v3374_v63, %v2136_v32  ;;  %s4025_s6 = sld [smem:[#allocation4 + $0xab]] }
 0x178   : > { %2131 = vrot.lane.b32.xlu1 %v2129_v13, %s4458_s7  ;;  %2080 = vrot.lane.b32.xlu0 %v2078_v53, %s4459_s27  ;;  %v1979_v13 = vstv %s3865_s29  ;;  %v817_v53 = vadd.f32 %v3562_v21, %v3842_v50  ;;  %v711_v21 = vadd.f32 %v3776_v26, %v707_v38  ;;  %v906_v63 = vstv %s3894_s18  ;;  %s3975_s29 = sld [smem:[#allocation4 + $0xa5]]  ;;  %s4020_s18 = sld [smem:[#allocation4 + $0xa8]] }
 0x179   : > { %v1144_v3 = vadd.f32 %v1143_v25, %v1140_v11  ;;  %v1230_v25 = vstv %s3878_s3  ;;  %v1162_v50 = vmax.f32 %v1161_v40, %v1101_v9  ;;  %v770_v36 = vadd.f32 %v3836_v29, %v766_v37  ;;  %s3980_s3 = sld [smem:[#allocation4 + $0xd9]] }
 0x17a   : > { %v1206_v46 = vpop.permute.xlu1 %1205  ;;  %v1198_v15 = vpop.permute.xlu0 %1197  ;;  %v2089_v11 = vstv %s3896_s5  ;;  %v876_v26 = vadd.f32 %v3608_v61, %v868_v58  ;;  %v1589_v29 = vmul.f32 %v3400_v33, %v1588_v24  ;;  %v1269_v40 = vstv %s3927_s17  ;;  %s4000_s5 = sld [smem:[#allocation4 + $0xda]]  ;;  %s4027_s17 = sld [smem:[#allocation4 + $0xec]] }
 0x17b   : > { %v1152_v22 = vadd.f32 %v1150_v30, %v1144_v3  ;;  %v1200_v49 = vadd.f32 %v1198_v15, %v1192_v41  ;;  %v1980_v30 = vmul.f32 %v3400_v33, %v1979_v13  ;;  %v825_v41 = vadd.f32 %v3560_v5, %v817_v53 }
 0x17c   : > { %1974 = vrot.lane.b32.xlu1 %v1972_v14, %s4458_s7  ;;  %1638 = vrot.lane.b32.xlu0 %v1636_v12, %s4459_s27  ;;  %v1231_v14 = vmul.f32 %v3400_v33, %v1230_v25  ;;  %v3944_v12 = vld [vmem:[#allocation2] sm:$0xff]  ;;  %v719_v5 = vadd.f32 %v3463_v55, %v711_v21  ;;  %v778_v3 = vadd.f32 %v3524_v52, %v770_v36 }
 0x17d   : > { %v1160_v17 = vadd.f32 %v1158_v34, %v1152_v22  ;;  %v1208_v35 = vadd.f32 %v1206_v46, %v1200_v49  ;;  %v1251_v32 = vmul.f32 %v3944_v12, %v1250_v59 }
 0x17e   : > { %v1226_v57 = vpop.permute.xlu1 %1225  ;;  %v1218_v51 = vpop.permute.xlu0 %1217  ;;  %v727_v22 = vadd.f32 %v3461_v31, %v719_v5  ;;  %v786_v49 = vadd.f32 %v3522_v42, %v778_v3 }
 0x17f   : > { %v1163_v10 = vmax.f32 %v1162_v50, %v1160_v17  ;;  %v1212_v34 = vadd.f32 %v1211_v39, %v1208_v35  ;;  %v3957_v39 = vld [vmem:[#allocation2 + $0x2] sm:$0xff] }
 0x180   : > { %2139 = vrot.lane.b32.xlu1 %v2137_v7, %s4459_s27  ;;  %2033 = vrot.lane.b32.xlu0 %v2031_v44, %s4458_s7  ;;  %v2090_v55 = vmul.f32 %v3957_v39, %v2089_v11  ;;  %v2039_v52 = vmul.f32 %v3957_v39, %v2038_v16  ;;  %v731_v11 = vadd.f32 %v3779_v27, %v727_v22 }
 0x181   : > { %v1164_v61 = vsub.f32 %v983_v43, %v1163_v10  ;;  %v1167_v58 = vsub.f32 %v3899_v48, %v1163_v10  ;;  %v1170_v38 = vsub.f32 %v1101_v9, %v1163_v10  ;;  %v1173_v33 = vsub.f32 %v1160_v17, %v1163_v10  ;;  %v3984_v17 = vld [vmem:[#allocation2 + $0x1] sm:$0xff] }
 0x182   : > { %v1220_v37 = vadd.f32 %v1218_v51, %v1212_v34  ;;  %v1246_v46 = vpop.permute.xlu1 %1245  ;;  %v1238_v15 = vpop.permute.xlu0 %1237  ;;  %v829_v48 = vadd.f32 %v3860_v60, %v825_v41  ;;  %v884_v43 = vadd.f32 %v3606_v47, %v876_v26  ;;  %v1647_v60 = vstv %s3930_s21  ;;  %s4034_s21 = sld [smem:[#allocation4 + $0xeb]] }
 0x183   : > { %v1165_v9 = vmul.f32 1.442695, %v1164_v61  ;;  %v1168_v13 = vmul.f32 1.442695, %v1167_v58  ;;  %v1171_v24 = vmul.f32 1.442695, %v1170_v38  ;;  %v1596_v47 = vstv %s3932_s22 }
 0x184   : > { %v1228_v53 = vadd.f32 %v1226_v57, %v1220_v37  ;;  %1982 = vrot.lane.b32.xlu1 %v1980_v30, %s4459_s27  ;;  %1591 = vrot.lane.b32.xlu0 %v1589_v29, %s4458_s7  ;;  %v1174_v7 = vmul.f32 1.442695, %v1173_v33  ;;  %v837_v31 = vadd.f32 %v3577_v23, %v829_v48  ;;  %v888_v21 = vadd.f32 %v3892_v45, %v884_v43  ;;  %s4043_s22 = sld [smem:[#allocation4 + $0xae]] }
 0x185   : > { %2708 = vpow2.f32 %v1165_v9  ;;  %v1270_v42 = vmul.f32 %v3984_v17, %v1269_v40  ;;  %v1648_v36 = vmul.f32 %v3957_v39, %v1647_v60  ;;  %v1597_v57 = vmul.f32 %v3957_v39, %v1596_v47 }
 0x186   : > { %2710 = vpow2.f32 %v1168_v13  ;;  %v1232_v44 = vadd.f32 %v1231_v14, %v1228_v53  ;;  %v1265_v25 = vpop.permute.xlu1 %1264  ;;  %v1257_v59 = vpop.permute.xlu0 %1256  ;;  %v1289_v23 = vstv %s3952_s19  ;;  %v2148_v30 = vstv %s3948_s1  ;;  %s4047_s1 = sld [smem:[#allocation4 + $0xdc]] }
 0x187   : > { %v1259_v50 = vadd.f32 %v1257_v59, %v1251_v32  ;;  %2712 = vpow2.f32 %v1171_v24  ;;  %v2097_v45 = vstv %s3954_s20  ;;  %v790_v41 = vadd.f32 %v3839_v2, %v786_v49  ;;  %s4051_s19 = sld [smem:[#allocation4 + $0xf4]]  ;;  %s4063_s20 = sld [smem:[#allocation4 + $0xf5]] }
 0x188   : > { %v1240_v35 = vadd.f32 %v1238_v15, %v1232_v44  ;;  %2092 = vrot.lane.b32.xlu1 %v2090_v55, %s4458_s7  ;;  %2041 = vrot.lane.b32.xlu0 %v2039_v52, %s4459_s27  ;;  %2714 = vpow2.f32 %v1174_v7  ;;  %v845_v14 = vadd.f32 %v3575_v54, %v837_v31  ;;  %v896_v29 = vadd.f32 %v3618_v18, %v888_v21 }
 0x189   : > { %v1267_v51 = vadd.f32 %v1265_v25, %v1259_v50  ;;  %v907_v27 = vmul.f32 %v3957_v39, %v906_v63  ;;  %v1290_v32 = vmul.f32 %v3957_v39, %v1289_v23  ;;  %v2149_v16 = vmul.f32 %v3957_v39, %v2148_v30 }
 0x18a   : > { %v3996_v26 = vadd.f32 %v1246_v46, %v1240_v35  ;;  %v1285_v10 = vpop.permute.xlu1 %1284  ;;  %v1277_v34 = vpop.permute.xlu0 %1276  ;;  %v2098_v5 = vmul.f32 %v3957_v39, %v2097_v45  ;;  %v1309_v61 = vstv %s3966_s26  ;;  %v2156_v58 = vstv %s3968_s0  ;;  %s4065_s26 = sld [smem:[#allocation4 + $0xe5]]  ;;  %s4068_s0 = sld [smem:[#allocation4 + $0xb1]] }
 0x18b   : > { %v1271_v2 = vadd.f32 %v1270_v42, %v1267_v51  ;;  %v1655_v18 = vstv %s3973_s25  ;;  %v1328_v38 = vstv %s3975_s29  ;;  %v739_v63 = vadd.f32 %v3487_v20, %v731_v11  ;;  %s4078_s25 = sld [smem:[#allocation4 + $0xb4]]  ;;  %s4081_s29 = sld [smem:[#allocation4 + $0xe6]] }
 0x18c   : > { %1650 = vrot.lane.b32.xlu1 %v1648_v36, %s4458_s7  ;;  %1599 = vrot.lane.b32.xlu0 %v1597_v57, %s4459_s27  ;;  %v798_v3 = vadd.f32 %v3544_v62, %v790_v41  ;;  %v1754_v46 = vstv %s3978_s30  ;;  %v1695_v15 = vstv %s3980_s3  ;;  %v849_v48 = vadd.f32 %v3888_v4, %v845_v14  ;;  %s4083_s30 = sld [smem:[#allocation4 + $0xdd]]  ;;  %s4090_s3 = sld [smem:[#allocation4 + $0xb7]] }
 0x18d   : > { %v1279_v54 = vadd.f32 %v1277_v34, %v1271_v2  ;;  %v904_v43 = vadd.f32 %v3616_v8, %v896_v29  ;;  %v1310_v13 = vmul.f32 %v3944_v12, %v1309_v61  ;;  %v2157_v62 = vmul.f32 %v3957_v39, %v2156_v58 }
 0x18e   : > { %v1305_v33 = vpop.permute.xlu1 %1304  ;;  %v1297_v37 = vpop.permute.xlu0 %1296  ;;  %v1656_v4 = vmul.f32 %v3957_v39, %v1655_v18  ;;  %v1329_v8 = vmul.f32 %v3984_v17, %v1328_v38  ;;  %v1755_v52 = vmul.f32 %v3944_v12, %v1754_v46  ;;  %v1696_v40 = vmul.f32 %v3944_v12, %v1695_v15 }
 0x18f   : > { %v2709_v55 = vpop.eup %2708  ;;  %v1287_v9 = vadd.f32 %v1285_v10, %v1279_v54  ;;  %v747_v60 = vadd.f32 %v3485_v19, %v739_v63  ;;  %v806_v47 = vadd.f32 %v3542_v6, %v798_v3  ;;  %v1762_v44 = vstv %s3998_s8  ;;  %s4094_s8 = sld [smem:[#allocation4 + $0xef]] }
 0x190   : > { %v2711_v20 = vpop.eup %2710  ;;  %2151 = vrot.lane.b32.xlu1 %v2149_v16, %s4458_s7  ;;  %2100 = vrot.lane.b32.xlu0 %v2098_v5, %s4459_s27  ;;  %v1703_v25 = vstv %s4000_s5  ;;  %v857_v59 = vadd.f32 %v3593_v56, %v849_v48  ;;  %v908_v31 = vadd.f32 %v907_v27, %v904_v43  ;;  %v1348_v30 = vstv %s4020_s18  ;;  %s4096_s5 = sld [smem:[#allocation4 + $0xee]]  ;;  %s4111_s18 = sld [smem:[#allocation4 + $0xdf]] }
 0x191   : > { %v1177_v24 = vadd.f32 %v2711_v20, %v2709_v55  ;;  %v1291_v53 = vadd.f32 %v1290_v32, %v1287_v9  ;;  %v2713_v22 = vpop.eup %2712  ;;  %v1176_v35 = vmul.f32 %v2709_v55, %v747_v60  ;;  %v1178_v36 = vmul.f32 %v2711_v20, %v806_v47 }
 0x192   : > { %v1324_v49 = vpop.permute.xlu1 %1323  ;;  %v1316_v7 = vpop.permute.xlu0 %1315  ;;  %v1763_v45 = vmul.f32 %v3944_v12, %v1762_v44  ;;  %v1704_v11 = vmul.f32 %v3944_v12, %v1703_v25  ;;  %v865_v41 = vadd.f32 %v3591_v0, %v857_v59  ;;  %v1368_v10 = vstv %s4025_s6  ;;  %s4113_s6 = sld [smem:[#allocation4 + $0xf7]] }
 0x193   : > { %v1180_v21 = vadd.f32 %v2713_v22, %v1177_v24  ;;  %v1299_v50 = vadd.f32 %v1297_v37, %v1291_v53  ;;  %v2715_v42 = vpop.eup %2714  ;;  %v1318_v57 = vadd.f32 %v1316_v7, %v1310_v13  ;;  %v1821_v34 = vstv %s4027_s17  ;;  %s4115_s17 = sld [smem:[#allocation4 + $0xba]] }
 0x194   : > { %2159 = vrot.lane.b32.xlu1 %v2157_v62, %s4459_s27  ;;  %1658 = vrot.lane.b32.xlu0 %v1656_v4, %s4459_s27  ;;  %v916_v14 = vadd.f32 %v3630_v1, %v908_v31  ;;  %v1179_v29 = vadd.f32 %v1178_v36, %v1176_v35  ;;  %v1813_v2 = vstv %s4034_s21  ;;  %v1181_v32 = vmul.f32 %v2713_v22, %v865_v41  ;;  %s4123_s21 = sld [smem:[#allocation4 + $0xbd]] }
 0x195   : > { %v1183_v19 = vadd.f32 %v2715_v42, %v1180_v21  ;;  %v4049_v6 = vadd.f32 %v1305_v33, %v1299_v50  ;;  %v1326_v56 = vadd.f32 %v1324_v49, %v1318_v57  ;;  %v1349_v5 = vmul.f32 %v3957_v39, %v1348_v30 }
 0x196   : > { %v1344_v51 = vpop.permute.xlu1 %1343  ;;  %v1336_v23 = vpop.permute.xlu0 %1335  ;;  %v1369_v61 = vmul.f32 %v3944_v12, %v1368_v10  ;;  %v1822_v54 = vmul.f32 %v3944_v12, %v1821_v34  ;;  %v1814_v58 = vmul.f32 %v3944_v12, %v1813_v2  ;;  %v1387_v18 = vstv %s4043_s22  ;;  %s4127_s22 = sld [smem:[#allocation4 + $0xf8]] }
 0x197   : > { %2716 = vrcp.f32 %v1183_v19  ;;  %v1330_v27 = vadd.f32 %v1329_v8, %v1326_v56  ;;  %v924_v38 = vadd.f32 %v3628_v28, %v916_v14  ;;  %v1182_v63 = vadd.f32 %v1181_v32, %v1179_v29 }
 0x198   : > { %1757 = vrot.lane.b32.xlu1 %v1755_v52, %s4458_s7  ;;  %1698 = vrot.lane.b32.xlu0 %v1696_v40, %s4458_s7  ;;  %v1715_v33 = vstv %s4047_s1  ;;  %v1872_v37 = vstv %s4051_s19  ;;  %v1388_v43 = vmul.f32 %v3984_v17, %v1387_v18  ;;  %s4129_s1 = sld [smem:[#allocation4 + $0xe8]] }
 0x199   : > { %v1338_v0 = vadd.f32 %v1336_v23, %v1330_v27  ;;  %v1184_v46 = vmul.f32 %v2715_v42, %v924_v38  ;;  %v1716_v9 = vmul.f32 %v3984_v17, %v1715_v33  ;;  %v1873_v62 = vmul.f32 %v3944_v12, %v1872_v37  ;;  %s4136_s19 = sld [smem:[#allocation4 + $0xc0]] }
 0x19a   : > { %v1364_v16 = vpop.permute.xlu1 %1363  ;;  %v1356_v1 = vpop.permute.xlu0 %1355  ;;  %v1880_v24 = vstv %s4063_s20  ;;  %v1774_v53 = vstv %s4065_s26  ;;  %v1407_v47 = vstv %s4068_s0  ;;  %v1427_v25 = vstv %s4078_s25  ;;  %s4142_s20 = sld [smem:[#allocation4 + $0xe9]]  ;;  %s4144_s26 = sld [smem:[#allocation4 + $0xe0]] }
 0x19b   : > { %v1346_v3 = vadd.f32 %v1344_v51, %v1338_v0  ;;  %v1185_v13 = vadd.f32 %v1184_v46, %v1182_v63  ;;  %v1881_v7 = vmul.f32 %v3944_v12, %v1880_v24  ;;  %v1775_v44 = vmul.f32 %v3984_v17, %v1774_v53  ;;  %s4155_s0 = sld [smem:[#allocation4 + $0xf1]]  ;;  %s4157_s25 = sld [smem:[#allocation4 + $0xf2]] }
 0x19c   : > { %1765 = vrot.lane.b32.xlu1 %v1763_v45, %s4459_s27  ;;  %1706 = vrot.lane.b32.xlu0 %v1704_v11, %s4459_s27  ;;  %v1408_v31 = vmul.f32 %v3957_v39, %v1407_v47  ;;  %v1782_v21 = vstv %s4081_s29  ;;  %v1723_v50 = vstv %s4083_s30  ;;  %v1428_v57 = vmul.f32 %v3944_v12, %v1427_v25  ;;  %s4159_s29 = sld [smem:[#allocation4 + $0xc3]]  ;;  %s4169_s30 = sld [smem:[#allocation4 + $0xfa]] }
 0x19d   : > { %v1350_v15 = vadd.f32 %v1349_v5, %v1346_v3  ;;  %v1783_v19 = vmul.f32 %v3984_v17, %v1782_v21  ;;  %v1724_v56 = vmul.f32 %v3984_v17, %v1723_v50  ;;  %v1446_v51 = vstv %s4090_s3  ;;  %s4171_s3 = sld [smem:[#allocation4 + $0xfb]] }
 0x19e   : > { %v1383_v55 = vpop.permute.xlu1 %1382  ;;  %v1375_v28 = vpop.permute.xlu0 %1374  ;;  %v1841_v30 = vstv %s4094_s8  ;;  %v1833_v45 = vstv %s4096_s5  ;;  %v1447_v14 = vmul.f32 %v3984_v17, %v1446_v51  ;;  %v1735_v0 = vstv %s4111_s18  ;;  %s2577_s8 = sld [smem:[#allocation4 + $0x105]]  ;;  %s2586_s5 = sld [smem:[#allocation4 + $0x10e]] }
 0x19f   : > { %v1377_v48 = vadd.f32 %v1375_v28, %v1369_v61  ;;  %v1358_v20 = vadd.f32 %v1356_v1, %v1350_v15  ;;  %v1842_v29 = vmul.f32 %v3984_v17, %v1841_v30  ;;  %v1834_v27 = vmul.f32 %v3984_v17, %v1833_v45  ;;  %s2516_s18 = sld [smem:[#allocation4 + $0xc9]] }
 0x1a0   : > { %1824 = vrot.lane.b32.xlu1 %v1822_v54, %s4459_s27  ;;  %1816 = vrot.lane.b32.xlu0 %v1814_v58, %s4458_s7  ;;  %v1466_v61 = vstv %s4115_s17  ;;  %v1736_v58 = vmul.f32 %v3957_v39, %v1735_v0  ;;  %v1486_v38 = vstv %s4123_s21  ;;  %s2595_s17 = sld [smem:[#allocation4 + $0x117]] }
 0x1a1   : > { %v2717_v4 = vpop.eup %2716  ;;  %v1385_v8 = vadd.f32 %v1383_v55, %v1377_v48  ;;  %v4098_v40 = vadd.f32 %v1364_v16, %v1358_v20  ;;  %v1892_v16 = vstv %s4113_s6  ;;  %v1467_v3 = vmul.f32 %v3957_v39, %v1466_v61  ;;  %s2522_s6 = sld [smem:[#allocation4 + $0xcf]] }
 0x1a2   : > { %v1187_v52 = vmul.f32 %v2717_v4, %v1185_v13  ;;  %v1403_v22 = vpop.permute.xlu1 %1402  ;;  %v1395_v60 = vpop.permute.xlu0 %1394  ;;  %v1893_v18 = vmul.f32 %v3984_v17, %v1892_v16  ;;  %v1900_v33 = vstv %s4127_s22  ;;  %v1794_v37 = vstv %s4129_s1  ;;  %s4227_s21 = sld [smem:[#allocation4 + $0xff]]  ;;  %s4233_s22 = sld [smem:[#allocation4 + $0x108]] }
 0x1a3   : > { %v1389_v49 = vadd.f32 %v1388_v43, %v1385_v8  ;;  %v1487_v28 = vmul.f32 %v3944_v12, %v1486_v38  ;;  %v1901_v48 = vmul.f32 %v3984_v17, %v1900_v33  ;;  %v1795_v43 = vmul.f32 %v3957_v39, %v1794_v37  ;;  %s4235_s1 = sld [smem:[#allocation4 + $0x111]] }
 0x1a4   : > { %1718 = vrot.lane.b32.xlu1 %v1716_v9, %s4458_s7  ;;  %1875 = vrot.lane.b32.xlu0 %v1873_v62, %s4458_s7  ;;  %2458 = vst.msk [vmem:[%s2985_s28 + $0x8] sm:$0xff] %vm687_vm0, %v1187_v52  ;;  %v1505_v9 = vstv %s4136_s19  ;;  %s4237_s19 = sld [smem:[#allocation4 + $0xd2]] }
 0x1a5   : > { %v1397_v59 = vadd.f32 %v1395_v60, %v1389_v49  ;;  %v1802_v20 = vstv %s4142_s20  ;;  %v1743_v62 = vstv %s4144_s26  ;;  %v1506_v52 = vmul.f32 %v3984_v17, %v1505_v9  ;;  %s4243_s20 = sld [smem:[#allocation4 + $0x11a]]  ;;  %s4248_s26 = sld [smem:[#allocation4 + $0xcc]] }
 0x1a6   : > { %v1423_v42 = vpop.permute.xlu1 %1422  ;;  %v1415_v35 = vpop.permute.xlu0 %1414  ;;  %v1744_v60 = vmul.f32 %v3957_v39, %v1743_v62  ;;  %v1987_v62 = vstv %s2577_s8  ;;  %s2550_s8 = sld [smem:[#allocation4 + $0xea]] }
 0x1a7   : > { %v1405_v36 = vadd.f32 %v1403_v22, %v1397_v59  ;;  %v1803_v22 = vmul.f32 %v3957_v39, %v1802_v20 }
 0x1a8   : > { %1883 = vrot.lane.b32.xlu1 %v1881_v7, %s4459_s27  ;;  %1777 = vrot.lane.b32.xlu0 %v1775_v44, %s4458_s7  ;;  %v1853_v7 = vstv %s4155_s0  ;;  %v1861_v44 = vstv %s4157_s25  ;;  %s4252_s0 = sld [smem:[#allocation4 + $0x102]]  ;;  %s4256_s25 = sld [smem:[#allocation4 + $0x10b]] }
 0x1a9   : > { %v1409_v23 = vadd.f32 %v1408_v31, %v1405_v36  ;;  %v1525_v31 = vstv %s4159_s29  ;;  %v1854_v50 = vmul.f32 %v3957_v39, %v1853_v7  ;;  %v2105_v7 = vstv %s2595_s17  ;;  %s4265_s29 = sld [smem:[#allocation4 + $0xd5]] }
 0x1aa   : > { %v1442_v11 = vpop.permute.xlu1 %1441  ;;  %v1434_v41 = vpop.permute.xlu0 %1433  ;;  %v1526_v36 = vmul.f32 %v3957_v39, %v1525_v31  ;;  %s4331_s17 = sld [smem:[#allocation4 + $0xed]] }
 0x1ab   : > { %v1417_v10 = vadd.f32 %v1415_v35, %v1409_v23  ;;  %v1436_v34 = vadd.f32 %v1434_v41, %v1428_v57  ;;  %v1912_v57 = vstv %s4169_s30  ;;  %s4267_s30 = sld [smem:[#allocation4 + $0x114]] }
 0x1ac   : > { %1785 = vrot.lane.b32.xlu1 %v1783_v19, %s4459_s27  ;;  %1726 = vrot.lane.b32.xlu0 %v1724_v56, %s4459_s27  ;;  %v1920_v19 = vstv %s4171_s3  ;;  %v1913_v30 = vmul.f32 %v3957_v39, %v1912_v57  ;;  %s4277_s3 = sld [smem:[#allocation4 + $0x11d]] }
 0x1ad   : > { %v4138_v2 = vadd.f32 %v1423_v42, %v1417_v10  ;;  %v1444_v32 = vadd.f32 %v1442_v11, %v1436_v34  ;;  %v1862_v42 = vmul.f32 %v3957_v39, %v1861_v44  ;;  %v1921_v45 = vmul.f32 %v3957_v39, %v1920_v19 }
 0x1ae   : > { %v1462_v5 = vpop.permute.xlu1 %1461  ;;  %v1454_v1 = vpop.permute.xlu0 %1453 }
 0x1af   : > { %v1448_v54 = vadd.f32 %v1447_v14, %v1444_v32 }
 0x1b0   : > { %1844 = vrot.lane.b32.xlu1 %v1842_v29, %s4459_s27  ;;  %1836 = vrot.lane.b32.xlu0 %v1834_v27, %s4458_s7 }
 0x1b1   : > { %v1456_v63 = vadd.f32 %v1454_v1, %v1448_v54 }
 0x1b2   : > { %v1482_v46 = vpop.permute.xlu1 %1481  ;;  %v1474_v15 = vpop.permute.xlu0 %1473 }
 0x1b3   : > { %v1464_v55 = vadd.f32 %v1462_v5, %v1456_v63 }
 0x1b4   : > { %1738 = vrot.lane.b32.xlu1 %v1736_v58, %s4458_s7  ;;  %1895 = vrot.lane.b32.xlu0 %v1893_v18, %s4458_s7 }
 0x1b5   : > { %v1468_v13 = vadd.f32 %v1467_v3, %v1464_v55 }
 0x1b6   : > { %v1501_v4 = vpop.permute.xlu1 %1500  ;;  %v1493_v8 = vpop.permute.xlu0 %1492 }
 0x1b7   : > { %v1476_v24 = vadd.f32 %v1474_v15, %v1468_v13  ;;  %v1495_v53 = vadd.f32 %v1493_v8, %v1487_v28  ;;  %v1564_v8 = vstv %s2516_s18  ;;  %s4323_s18 = sld [smem:[#allocation4 + $0xe4]] }
 0x1b8   : > { %1903 = vrot.lane.b32.xlu1 %v1901_v48, %s4459_s27  ;;  %1797 = vrot.lane.b32.xlu0 %v1795_v43, %s4458_s7 }
 0x1b9   : > { %v4178_v47 = vadd.f32 %v1482_v46, %v1476_v24  ;;  %v1503_v49 = vadd.f32 %v1501_v4, %v1495_v53  ;;  %v2046_v4 = vstv %s2586_s5  ;;  %v1604_v24 = vstv %s2522_s6  ;;  %s4321_s5 = sld [smem:[#allocation4 + $0xdb]] }
 0x1ba   : > { %v1521_v25 = vpop.permute.xlu1 %1520  ;;  %v1513_v59 = vpop.permute.xlu0 %1512  ;;  %s4327_s6 = sld [smem:[#allocation4 + $0xf3]] }
 0x1bb   : > { %v1507_v21 = vadd.f32 %v1506_v52, %v1503_v49  ;;  %v2047_v49 = vmul.f32 %v3944_v12, %v2046_v4 }
 0x1bc   : > { %1805 = vrot.lane.b32.xlu1 %v1803_v22, %s4459_s27  ;;  %1746 = vrot.lane.b32.xlu0 %v1744_v60, %s4459_s27  ;;  %v1988_v60 = vmul.f32 %v3944_v12, %v1987_v62  ;;  %v1967_v62 = vstv %s4252_s0 }
 0x1bd   : > { %v1515_v35 = vadd.f32 %v1513_v59, %v1507_v21  ;;  %v1605_v59 = vmul.f32 %v3944_v12, %v1604_v24  ;;  %v2026_v24 = vstv %s4256_s25  ;;  %s2207_s25 = sshll.u32 %s2985_s28, 4  ;;  %s4375_s25 = int_to_ptr.vmem [resolvable:$true] %s2207_s25 }
 0x1be   : > { %v1541_v56 = vpop.permute.xlu1 %1540  ;;  %v1533_v51 = vpop.permute.xlu0 %1532 }
 0x1bf   : > { %v1523_v23 = vadd.f32 %v1521_v25, %v1515_v35  ;;  %v1565_v25 = vmul.f32 %v3984_v17, %v1564_v8  ;;  %v1947_v35 = vstv %s4227_s21  ;;  %s4340_s21 = sld [smem:[#allocation4 + $0xf6]] }
 0x1c0   : > { %1856 = vrot.lane.b32.xlu0 %v1854_v50, %s4458_s7  ;;  %1864 = vrot.lane.b32.xlu1 %v1862_v42, %s4459_s27  ;;  %v2106_v50 = vmul.f32 %v3944_v12, %v2105_v7  ;;  %v2006_v42 = vstv %s4233_s22  ;;  %s4343_s22 = sld [smem:[#allocation4 + $0xde]] }
 0x1c1   : > { %v1527_v11 = vadd.f32 %v1526_v36, %v1523_v23  ;;  %v2065_v36 = vstv %s4235_s1  ;;  %s4345_s1 = sld [smem:[#allocation4 + $0xe7]] }
 0x1c2   : > { %v1560_v41 = vpop.permute.xlu1 %1559  ;;  %v1552_v10 = vpop.permute.xlu0 %1551 }
 0x1c3   : > { %v1535_v34 = vadd.f32 %v1533_v51, %v1527_v11  ;;  %v1623_v51 = vstv %s4237_s19  ;;  %v2007_v11 = vmul.f32 %v3984_v17, %v2006_v42  ;;  %s4354_s19 = sld [smem:[#allocation4 + $0xf0]] }
 0x1c4   : > { %1915 = vrot.lane.b32.xlu0 %v1913_v30, %s4458_s7  ;;  %1923 = vrot.lane.b32.xlu1 %v1921_v45, %s4459_s27  ;;  %s2513_s7 = sld [smem:[#allocation4 + $0xc6]]  ;;  %s2568_s27 = sld [smem:[#allocation4 + $0xfc]] }
 0x1c5   : > { %v4196_v14 = vadd.f32 %v1541_v56, %v1535_v34 }
 0x1c6   : > { %v1935_v29 = vpop.permute.xlu1 %1934  ;;  %v4198_v27 = vpop.permute.xlu0 %1571 }
 0x1c7   : > { %v1662_v32 = vmax.f32 %v4178_v47, %v4196_v14 }
 0x1ca   : > { %v4202_v0 = vpop.permute.xlu1 %1942  ;;  %v1994_v16 = vpop.permute.xlu0 %1993  ;;  %v1545_v15 = vstv %s2513_s7  ;;  %v1928_v20 = vstv %s2568_s27  ;;  %s2541_s7 = sld [smem:[#allocation4 + $0xe1]]  ;;  %s2532_s27 = sld [smem:[#allocation4 + $0xd8]] }
 0x1cb   : > { %v1546_v48 = vmul.f32 %v3944_v12, %v1545_v15  ;;  %v1929_v22 = vmul.f32 %v3944_v12, %v1928_v20  ;;  %v1996_v19 = vadd.f32 %v1994_v16, %v1988_v60  ;;  %v2066_v16 = vmul.f32 %v3984_v17, %v2065_v36 }
 0x1cc   : > { %v2124_v15 = vstv %s4243_s20  ;;  %s4362_s20 = sld [smem:[#allocation4 + $0xf9]] }
 0x1cd   : > { %v1554_v13 = vadd.f32 %v1552_v10, %v1546_v48  ;;  %v1937_v57 = vadd.f32 %v1935_v29, %v1929_v22  ;;  %v2125_v8 = vmul.f32 %v3984_v17, %v2124_v15 }
 0x1ce   : > { %v2053_v5 = vpop.permute.xlu1 %2052  ;;  %v2002_v1 = vpop.permute.xlu0 %2001 }
 0x1cf   : > { %v1562_v44 = vadd.f32 %v1560_v41, %v1554_v13  ;;  %v2055_v56 = vadd.f32 %v2053_v5, %v2047_v49  ;;  %v2004_v45 = vadd.f32 %v2002_v1, %v1996_v19  ;;  %v1948_v41 = vmul.f32 %v3984_v17, %v1947_v35 }
 0x1d0   : > { %v1624_v5 = vmul.f32 %v3984_v17, %v1623_v51  ;;  %v1584_v13 = vstv %s4248_s26  ;;  %s2606_s26 = sshll.u32 %s2849_s13, 3 }
 0x1d1   : > { %v1566_v23 = vadd.f32 %v1565_v25, %v1562_v44  ;;  %v2008_v4 = vadd.f32 %v2007_v11, %v2004_v45  ;;  %v1643_v44 = vstv %s4265_s29  ;;  %s2204_s0 = sadd.s32 %s2845_s12, %s2606_s26  ;;  %s4460_s12 = sand.u32 1, %s2837_s10  }
 0x1d2   : > { %v4204_v61 = vpop.permute.xlu1 %2060  ;;  %v1611_v54 = vpop.permute.xlu0 %1610  ;;  %v1644_v51 = vmul.f32 %v3957_v39, %v1643_v44  ;;  %s2607_s29 = sshll.u32 %s2204_s0, 7 }
 0x1d3   : > { %v1613_v30 = vadd.f32 %v1611_v54, %v1605_v59  ;;  %v1945_v54 = vadd.f32 %v4202_v0, %v1937_v57  ;;  %v2063_v1 = vadd.f32 %v4204_v61, %v2055_v56  ;;  %v1574_v20 = vadd.f32 %v4198_v27, %v1566_v23 }
 0x1d4   : > { %v1585_v61 = vmul.f32 %v3957_v39, %v1584_v13  ;;  %v2027_v59 = vmul.f32 %v3957_v39, %v2026_v24 }
 0x1d5   : > { %v1949_v7 = vadd.f32 %v1948_v41, %v1945_v54  ;;  %v2067_v27 = vadd.f32 %v2066_v16, %v2063_v1 }
 0x1d6   : > { %v4206_v58 = vpop.permute.xlu1 %1618  ;;  %v4208_v18 = vpop.permute.xlu0 %2111 }
 0x1d7   : > { %v1621_v29 = vadd.f32 %v4206_v58, %v1613_v30  ;;  %v2114_v48 = vadd.f32 %v4208_v18, %v2106_v50  ;;  %v2085_v50 = vstv %s4267_s30 }
 0x1d9   : > { %v1625_v49 = vadd.f32 %v1624_v5, %v1621_v29 }
 0x1da   : > { %v4210_v38 = vpop.permute.xlu1 %2013  ;;  %v4212_v63 = vpop.permute.xlu0 %1954 }
 0x1db   : > { %v2016_v18 = vadd.f32 %v4210_v38, %v2008_v4  ;;  %v1957_v42 = vadd.f32 %v4212_v63, %v1949_v7  ;;  %v2086_v63 = vmul.f32 %v3957_v39, %v2085_v50 }
 0x1de   : > { %v4214_v3 = vpop.permute.xlu1 %1962  ;;  %v4216_v33 = vpop.permute.xlu0 %2119 }
 0x1df   : > { %v2122_v58 = vadd.f32 %v4216_v33, %v2114_v48  ;;  %v1968_v33 = vmul.f32 %v3957_v39, %v1967_v62  ;;  %v1965_v23 = vadd.f32 %v4214_v3, %v1957_v42 }
 0x1e1   : > { %v2126_v36 = vadd.f32 %v2125_v8, %v2122_v58  ;;  %v1969_v15 = vadd.f32 %v1968_v33, %v1965_v23  ;;  %v1711_v23 = vstv %s4321_s5 }
 0x1e2   : > { %v4218_v37 = vpop.permute.xlu1 %2072  ;;  %v4220_v46 = vpop.permute.xlu0 %2021 }
 0x1e3   : > { %v2075_v35 = vadd.f32 %v4218_v37, %v2067_v27 }
 0x1e6   : > { %v4222_v55 = vpop.permute.xlu1 %1630  ;;  %v4224_v28 = vpop.permute.xlu0 %1579 }
 0x1e7   : > { %v1582_v0 = vadd.f32 %v4224_v28, %v1574_v20  ;;  %v1633_v25 = vadd.f32 %v4222_v55, %v1625_v49  ;;  %v2024_v28 = vadd.f32 %v4220_v46, %v2016_v18  ;;  %v2144_v55 = vstv %s4277_s3  ;;  %s4380_s3 = scalar_lea.hbm %s4440_s2, %s2607_s29 }
 0x1e8   : > { %v2145_v41 = vmul.f32 %v3957_v39, %v2144_v55 }
 0x1e9   : > { %v1586_v56 = vadd.f32 %v1585_v61, %v1582_v0  ;;  %v2028_v11 = vadd.f32 %v2027_v59, %v2024_v28 }
 0x1ea   : > { %v4229_v43 = vpop.permute.xlu1 %2131  ;;  %v4231_v9 = vpop.permute.xlu0 %2080 }
 0x1eb   : > { %v2134_v30 = vadd.f32 %v4229_v43, %v2126_v36  ;;  %v2083_v45 = vadd.f32 %v4231_v9, %v2075_v35 }
 0x1ed   : > { %v2087_v3 = vadd.f32 %v2086_v63, %v2083_v45 }
 0x1ee   : > { %v4239_v53 = vpop.permute.xlu1 %1974  ;;  %v4241_v52 = vpop.permute.xlu0 %1638 }
 0x1ef   : > { %v1641_v19 = vadd.f32 %v4241_v52, %v1633_v25  ;;  %v1977_v43 = vadd.f32 %v4239_v53, %v1969_v15 }
 0x1f1   : > { %v1645_v16 = vadd.f32 %v1644_v51, %v1641_v19 }
 0x1f2   : > { %v4254_v31 = vpop.permute.xlu1 %2139  ;;  %v4258_v21 = vpop.permute.xlu0 %2033 }
 0x1f3   : > { %v2142_v46 = vadd.f32 %v4254_v31, %v2134_v30  ;;  %v2036_v54 = vadd.f32 %v4258_v21, %v2028_v11 }
 0x1f5   : > { %v2146_v13 = vadd.f32 %v2145_v41, %v2142_v46 }
 0x1f6   : > { %v4271_v10 = vpop.permute.xlu1 %1982  ;;  %v1592_v34 = vpop.permute.xlu0 %1591 }
 0x1f7   : > { %v1594_v37 = vadd.f32 %v1592_v34, %v1586_v56  ;;  %v1985_v62 = vadd.f32 %v4271_v10, %v1977_v43  ;;  %v1810_v56 = vstv %s2550_s8  ;;  %s2866_s8 = smov [#allocation7]  }
 0x1f8   : > { %v1811_v63 = vmul.f32 %v3944_v12, %v1810_v56  ;;  %s2765_s5 = sshll.u32 %s2866_s8, 4  ;;  %s2766_s5 = int_to_ptr.vmem [resolvable:$false] %s2765_s5 }
 0x1f9   : > { %p2768_p12 = scmp.lt.s32.totalorder %s4375_s25, %s2766_s5 }
 0x1fa   : > { %v2093_v22 = vpop.permute.xlu1 %2092  ;;  %v2042_v60 = vpop.permute.xlu0 %2041 }
 0x1fb   : > { %v2095_v9 = vadd.f32 %v2093_v22, %v2087_v3  ;;  %v2044_v48 = vadd.f32 %v2042_v60, %v2036_v54 }
 0x1fd   : > { %v2163_v21 = vmax.f32 %v1985_v62, %v2044_v48 }
 0x1fe   : > { %v1651_v57 = vpop.permute.xlu1 %1650  ;;  %v1600_v38 = vpop.permute.xlu0 %1599 }
 0x1ff   : > { %v1602_v5 = vadd.f32 %v1600_v38, %v1594_v37  ;;  %v1653_v1 = vadd.f32 %v1651_v57, %v1645_v16  ;;  %v1692_v38 = vstv %s2532_s27  ;;  %v1770_v37 = vstv %s4323_s18  ;;  %s2761_s27 = scalar_lea.vmem %s4375_s25, 512  ;;  %s2767_s18 = scalar_lea.vmem %s2766_s5, 1024 }
 0x200   : > { %v1693_v55 = vmul.f32 %v3944_v12, %v1692_v38  ;;  %v1771_v54 = vmul.f32 %v3984_v17, %v1770_v37  ;;  %p2762_p8 = scmp.ne.s32.totalorder %s4375_s25, %s2761_s27  ;;  %p2769_p13 = scmp.lt.s32.totalorder %s2767_s18, %s2761_s27 }
 0x201   : > { %v1663_v39 = vmax.f32 %v1662_v32, %v1602_v5 }
 0x202   : > { %v2152_v29 = vpop.permute.xlu1 %2151  ;;  %v2101_v52 = vpop.permute.xlu0 %2100  ;;  %p2763_p10 = pnand %p2762_p8, %p2937_p3  ;;  %p2770_p0 = por %p2769_p13, %p2768_p12 }
 0x203   : > { %v2154_v4 = vadd.f32 %v2152_v29, %v2146_v13  ;;  %v2103_v58 = vadd.f32 %v2101_v52, %v2095_v9  ;;  %v1712_v52 = vmul.f32 %v3984_v17, %v1711_v23 }
 0x204   : > { %p2764_p11 = pneg %p2763_p10 }
 0x205   : > { %v2164_v22 = vmax.f32 %v2163_v21, %v2103_v58  ;;  %v2744_v21 = vld [vmem:[#allocation2] sm:$0xff] }
 0x206   : > { %v2160_v34 = vpop.permute.xlu1 %2159  ;;  %v1659_v20 = vpop.permute.xlu0 %1658  ;;  %p2771_p1 = pnand %p2770_p0, %p2764_p11 }
 0x207   : > { %v1661_v31 = vadd.f32 %v1659_v20, %v1653_v1  ;;  %v4314_v24 = vadd.f32 %v2160_v34, %v2154_v4  ;;  %v1829_v34 = vstv %s4331_s17 }
 0x209   : > { %v1664_v8 = vmax.f32 %v1663_v39, %v1661_v31  ;;  %v2165_v32 = vmax.f32 %v2164_v22, %v4314_v24 }
 0x20a   : > { %v1758_v49 = vpop.permute.xlu1 %1757  ;;  %v1699_v53 = vpop.permute.xlu0 %1698 }
 0x20b   : > { %v1665_v60 = vsub.f32 %v4178_v47, %v1664_v8  ;;  %v1668_v0 = vsub.f32 %v4196_v14, %v1664_v8  ;;  %v1671_v61 = vsub.f32 %v1602_v5, %v1664_v8  ;;  %v1674_v18 = vsub.f32 %v1661_v31, %v1664_v8 }
 0x20c   : > { %v2166_v33 = vsub.f32 %v1985_v62, %v2165_v32  ;;  %v2169_v47 = vsub.f32 %v2044_v48, %v2165_v32  ;;  %v1751_v14 = vstv %s2541_s7  ;;  %v2172_v51 = vsub.f32 %v2103_v58, %v2165_v32  ;;  %s4386_s7 = scalar_lea.sflag [#allocation5], %s4460_s12 }
 0x20d   : > { %v1666_v27 = vmul.f32 1.442695, %v1665_v60  ;;  %v1669_v44 = vmul.f32 1.442695, %v1668_v0  ;;  %v1672_v25 = vmul.f32 1.442695, %v1671_v61  ;;  %v1752_v19 = vmul.f32 %v3944_v12, %v1751_v14 }
 0x20e   : > { %v1766_v7 = vpop.permute.xlu1 %1765  ;;  %v1707_v10 = vpop.permute.xlu0 %1706  ;;  %v1675_v59 = vmul.f32 1.442695, %v1674_v18  ;;  %v2167_v35 = vmul.f32 1.442695, %v2166_v33  ;;  %v2170_v57 = vmul.f32 1.442695, %v2169_v47  ;;  %v2175_v46 = vsub.f32 %v4314_v24, %v2165_v32 }
 0x20f   : > { %2718 = vpow2.f32 %v1666_v27  ;;  %v1760_v11 = vadd.f32 %v1758_v49, %v1752_v19  ;;  %v2173_v29 = vmul.f32 1.442695, %v2172_v51  ;;  %v1701_v15 = vadd.f32 %v1699_v53, %v1693_v55 }
 0x210   : > { %2720 = vpow2.f32 %v1669_v44  ;;  %v1869_v12 = vstv %s4327_s6  ;;  %v2176_v39 = vmul.f32 1.442695, %v2175_v46  ;;  %v1830_v49 = vmul.f32 %v3984_v17, %v1829_v34 }
 0x211   : > { %2722 = vpow2.f32 %v1672_v25  ;;  %v1768_v62 = vadd.f32 %v1766_v7, %v1760_v11  ;;  %v1709_v4 = vadd.f32 %v1707_v10, %v1701_v15  ;;  %v1888_v0 = vstv %s4340_s21 }
 0x212   : > { %v4319_v50 = vpop.permute.xlu1 %1824  ;;  %v1817_v42 = vpop.permute.xlu0 %1816  ;;  %2724 = vpow2.f32 %v1675_v59  ;;  %v1731_v32 = vstv %s4343_s22  ;;  %v1790_v18 = vstv %s4345_s1  ;;  %v1889_v25 = vmul.f32 %v3984_v17, %v1888_v0 }
 0x213   : > { %2726 = vpow2.f32 %v2167_v35  ;;  %v1819_v13 = vadd.f32 %v1817_v42, %v1811_v63  ;;  %v1713_v10 = vadd.f32 %v1712_v52, %v1709_v4  ;;  %v1772_v27 = vadd.f32 %v1771_v54, %v1768_v62  ;;  %v2745_v35 = vld [vmem:[#allocation2 + $0x2] sm:$0xff] }
 0x214   : > { %2728 = vpow2.f32 %v2170_v57  ;;  %v1732_v57 = vmul.f32 %v2745_v35, %v1731_v32  ;;  %v1791_v38 = vmul.f32 %v2745_v35, %v1790_v18  ;;  %v1849_v19 = vstv %s4354_s19 }
 0x215   : > { %2730 = vpow2.f32 %v2173_v29  ;;  %v1827_v60 = vadd.f32 %v4319_v50, %v1819_v13  ;;  %v1908_v11 = vstv %s4362_s20 }
 0x216   : > { %v4325_v28 = vpop.permute.xlu1 %1718  ;;  %v4329_v36 = vpop.permute.xlu0 %1875  ;;  %2732 = vpow2.f32 %v2176_v39 }
 0x217   : > { %v1721_v59 = vadd.f32 %v4325_v28, %v1713_v10  ;;  %v1831_v47 = vadd.f32 %v1830_v49, %v1827_v60  ;;  %v1850_v28 = vmul.f32 %v2745_v35, %v1849_v19 }
 0x219   : > { %v2719_v41 = vpop.eup %2718 }
 0x21a   : > { %v4336_v30 = vpop.permute.xlu1 %1883  ;;  %v1778_v45 = vpop.permute.xlu0 %1777  ;;  %v1677_v5 = vmul.f32 %v2719_v41, %v3996_v26 }
 0x21b   : > { %v2721_v16 = vpop.eup %2720  ;;  %v1780_v42 = vadd.f32 %v1778_v45, %v1772_v27 }
 0x21c   : > { %v2723_v43 = vpop.eup %2722  ;;  %v1678_v9 = vadd.f32 %v2721_v16, %v2719_v41  ;;  %v1679_v48 = vmul.f32 %v2721_v16, %v4049_v6  ;;  %v1870_v6 = vmul.f32 %v2744_v21, %v1869_v12 }
 0x21d   : > { %v2725_v20 = vpop.eup %2724  ;;  %v1682_v31 = vmul.f32 %v2723_v43, %v4098_v40 }
 0x21e   : > { %v1786_v3 = vpop.permute.xlu1 %1785  ;;  %v1727_v1 = vpop.permute.xlu0 %1726  ;;  %v1680_v26 = vadd.f32 %v1679_v48, %v1677_v5  ;;  %v1681_v58 = vadd.f32 %v2723_v43, %v1678_v9  ;;  %v1685_v8 = vmul.f32 %v2725_v20, %v4138_v2  ;;  %v1878_v50 = vadd.f32 %v4329_v36, %v1870_v6 }
 0x21f   : > { %v2727_v61 = vpop.eup %2726  ;;  %v1788_v51 = vadd.f32 %v1786_v3, %v1780_v42  ;;  %v1729_v55 = vadd.f32 %v1727_v1, %v1721_v59  ;;  %v1909_v43 = vmul.f32 %v2745_v35, %v1908_v11 }
 0x220   : > { %v1683_v22 = vadd.f32 %v1682_v31, %v1680_v26  ;;  %v1684_v40 = vadd.f32 %v2725_v20, %v1681_v58  ;;  %v2729_v7 = vpop.eup %2728  ;;  %v1886_v56 = vadd.f32 %v4336_v30, %v1878_v50 }
 0x221   : > { %v2179_v14 = vadd.f32 %v2729_v7, %v2727_v61  ;;  %v2731_v37 = vpop.eup %2730  ;;  %v1733_v45 = vadd.f32 %v1732_v57, %v1729_v55  ;;  %v1792_v29 = vadd.f32 %v1791_v38, %v1788_v51 }
 0x222   : > { %v1845_v24 = vpop.permute.xlu1 %1844  ;;  %v1837_v53 = vpop.permute.xlu0 %1836  ;;  %v1686_v2 = vadd.f32 %v1685_v8, %v1683_v22  ;;  %2734 = vrcp.f32 %v1684_v40  ;;  %v1890_v41 = vadd.f32 %v1889_v25, %v1886_v56 }
 0x223   : > { %v1839_v23 = vadd.f32 %v1837_v53, %v1831_v47  ;;  %v2182_v46 = vadd.f32 %v2731_v37, %v2179_v14  ;;  %v2733_v52 = vpop.eup %2732 }
 0x225   : > { %v1847_v36 = vadd.f32 %v1845_v24, %v1839_v23  ;;  %v2185_v3 = vadd.f32 %v2733_v52, %v2182_v46 }
 0x226   : > { %v1739_v44 = vpop.permute.xlu1 %1738  ;;  %v1896_v33 = vpop.permute.xlu0 %1895 }
 0x227   : > { %v1741_v12 = vadd.f32 %v1739_v44, %v1733_v45  ;;  %v1898_v30 = vadd.f32 %v1896_v33, %v1890_v41  ;;  %v1851_v34 = vadd.f32 %v1850_v28, %v1847_v36  ;;  %2736 = vrcp.f32 %v2185_v3 }
 0x22a   : > { %v1904_v63 = vpop.permute.xlu1 %1903  ;;  %v1798_v17 = vpop.permute.xlu0 %1797 }
 0x22b   : > { %v1800_v54 = vadd.f32 %v1798_v17, %v1792_v29  ;;  %v1906_v9 = vadd.f32 %v1904_v63, %v1898_v30 }
 0x22c   : > { %v2735_v15 = vpop.eup %2734 }
 0x22d   : > { %v1688_v1 = vmul.f32 %v2735_v15, %v1686_v2  ;;  %v1910_v58 = vadd.f32 %v1909_v43, %v1906_v9 }
 0x22e   : > { %v1806_v16 = vpop.permute.xlu1 %1805  ;;  %v1747_v5 = vpop.permute.xlu0 %1746 }
 0x22f   : > { %v1808_v48 = vadd.f32 %v1806_v16, %v1800_v54  ;;  %v1749_v13 = vadd.f32 %v1747_v5, %v1741_v12  ;;  %2531 = vst.msk [vmem:[%s2985_s28 + $0x10] sm:$0xff] %vm687_vm0, %v1688_v1 }
 0x231   : > { %v2180_v62 = vmul.f32 %v2729_v7, %v1808_v48  ;;  %v2178_v4 = vmul.f32 %v2727_v61, %v1749_v13  ;;  %v2737_v0 = vpop.eup %2736 }
 0x232   : > { %v1857_v20 = vpop.permute.xlu0 %1856  ;;  %v1865_v39 = vpop.permute.xlu1 %1864 }
 0x233   : > { %v1859_v31 = vadd.f32 %v1857_v20, %v1851_v34  ;;  %v2181_v49 = vadd.f32 %v2180_v62, %v2178_v4 }
 0x235   : > { %v1867_v26 = vadd.f32 %v1865_v39, %v1859_v31 }
 0x236   : > { %v1916_v8 = vpop.permute.xlu0 %1915  ;;  %v1924_v21 = vpop.permute.xlu1 %1923 }
 0x237   : > { %v2183_v6 = vmul.f32 %v2731_v37, %v1867_v26  ;;  %v1918_v24 = vadd.f32 %v1916_v8, %v1910_v58 }
 0x239   : > { %v1926_v53 = vadd.f32 %v1924_v21, %v1918_v24  ;;  %v2184_v22 = vadd.f32 %v2183_v6, %v2181_v49 }
 0x23b   : > { %v2186_v40 = vmul.f32 %v2733_v52, %v1926_v53 }
 0x23d   : > { %v2187_v60 = vadd.f32 %v2186_v40, %v2184_v22 }
 0x23f   : > { %v2189_v61 = vmul.f32 %v2737_v0, %v2187_v60 }
 0x241   : > { %2604 = vst.msk [vmem:[%s2985_s28 + $0x18] sm:$0xff] %vm687_vm0, %v2189_v61 }
 0x242   : > { %2774 = shalt.err (!%p2771_p1)
}
 0x243   : > { %s2775_s28 = scalar_lea.hbm %s4380_s3, 512  ;;  %s2779_s21 = scalar_lea.hbm %s4440_s2, 2048 }
 0x244   : > { %p2776_p2 = scmp.ne.s32.totalorder %s4380_s3, %s2775_s28  ;;  %p2780_p6 = scmp.lt.u32.totalorder %s4380_s3, %s4440_s2 }
 0x245   : > { %p2781_p7 = scmp.lt.u32.totalorder %s2779_s21, %s2775_s28  ;;  %p2783_p8 = scmp.lt.u32.totalorder %s2775_s28, %s4380_s3 }
 0x246   : > { %p2777_p4 = pnand %p2776_p2, %p2937_p3 }
 0x247   : > { %p2782_p9 = por %p2781_p7, %p2780_p6 }
 0x248   : > { %p2778_p5 = pneg %p2777_p4 }
 0x249   : > { %p2784_p10 = por %p2783_p8, %p2782_p9 }
 0x24b   : > { %p2785_p11 = pnand %p2784_p10, %p2778_p5 }
 0x24d   : > { %2788 = shalt.err (!%p2785_p11)
}
 0x24e   : > { %s2867_s19 = smov 128   ;;  %s2868_s20 = smov 256  }
 0x24f   : > { %s2869_s26 = smov 8  }
 0x250   : > { %2615 = dma.vmem_to_hbm [thread:$0]  (%p2937_p3), %s4375_s25, 512, %s4380_s3, %s4386_s7, %s2867_s19, %s2868_s20, %s2869_s26  }
 0x251 PF: > { %p2627_p12 = scmp.ge.s32.totalorder %s2861_s16, 2  ;;  %s2222_s0 = sand.u32 1, %s2833_s9  }
 0x252   : > { %p4461_p13 = scmp.ne.s32.totalorder %s4453_s24, 0  ;;  %s2223_s29 = scalar_lea.sflag [#allocation5], %s2222_s0 }
 0x254   : > { %p2622_p0 = pnand %p2627_p12, %p4461_p13 }
 0x256   : > { %2828 = dma.done.wait (!%p2622_p0), %s2223_s29, 512  }
 0x257   : > { %2830 = vsyncadd (!%p2622_p0), %s2223_s29, 4294966784  ;;  %s16_s16 = sadd.s32 1, %s2861_s16   ;;  %s4462_s23 = sld [smem:[#allocation12_spill]] }
 0x258   : > { %p13_p1 = scmp.ge.s32.totalorder %s16_s16, 6   ;;  %s4463_s25 = sld [smem:[#allocation13_spill]] }
 0x259   : > { %s4464_s9 = smov %s2837_s10  ;;  %s4465_s10 = smov %s2841_s11 }
 0x25a   : > { %s4466_s11 = smov %s2967_s4  ;;  %s4467_s12 = smov %s2853_s14 }
 0x25b   : > { %s4468_s13 = smov %s2857_s15  ;;  %15 = sbr.rel (!%p13_p1) target bundleno = 9 (0x9), region = 116 }
 0x25d   : > { %s4469_s14 = smov %s4462_s23 }
 0x25e   : > { %s4470_s15 = smov %s4463_s25 }
 0x262   :  { %2228 = vsyncpa [#allocation5], 1 }
 0x263   :  { %2230 = vsyncpa [#allocation5 + $0x1], 1 }
 0x264   :  { %2231 = vsyncpa [#allocation6], 1 }
 0x265   :  { %2233 = vsyncpa [#allocation6 + $0x1], 1 }
 0x266   :  { %2234 = vsyncmov [#allocation3] }
 0x269   :  { %s2235_s24 = vpop.sfrf %2234 }
 0x26a   :  { %p2610_p3 = scmp.ne.s32.totalorder %s2235_s24, 0 }
 0x26c   :  { %2239 = shalt.err (%p2610_p3)  }

</bundles_post_ra>
